<compile_context>
chip_gen: v5e
topology: v5e:2x2
jax: 0.10.0
libtpu: 0.0.40
codegen_flags: <defaults>
</compile_context>

<pallas_src>
import jax
import jax.numpy as jnp
import numpy as np
from jax.experimental import pallas as pl
from jax.experimental.pallas import tpu as pltpu

INPUT_DIM = 512
HIDDEN_DIM = 256
OUTPUT_DIM = 128
N_MEMORY = 100
N_MEMORY_PAD = 128
BATCH = 256
TILE_M = 128  # 128 fills v5e's MXU height exactly; fine on v6e/v7x too.

# Packed-constants segment offsets (all lane-aligned multiples of 128).
_FB1, _FB2, _FB3 = 0, 256, 512
_AB1, _AB2, _PB1 = 640, 896, 1024
_PW2, _PB2 = 1280, 1536
_CONSTS_LEN = 1664


def _meta_kernel(
    x_ref,
    fw1_ref, fw2_ref, fw3_ref,          # feature_extractor weights (bf16)
    aw1_ref, aw2_ref,                   # adaptation_network weights (bf16)
    mem_ref,                            # model_memory padded (128, 128) bf16
    pw1a_ref, pw1b_ref,                 # performance_predictor Linear1, split
    c_ref,                              # packed biases + pw2 row (1, 1664) f32
    adapted_ref, perf_ref,
):
    f32 = jnp.float32
    bf16 = jnp.bfloat16

    fb1 = c_ref[:, pl.ds(_FB1, HIDDEN_DIM)]
    fb2 = c_ref[:, pl.ds(_FB2, HIDDEN_DIM)]
    fb3 = c_ref[:, pl.ds(_FB3, OUTPUT_DIM)]
    ab1 = c_ref[:, pl.ds(_AB1, HIDDEN_DIM)]
    ab2 = c_ref[:, pl.ds(_AB2, OUTPUT_DIM)]
    pb1 = c_ref[:, pl.ds(_PB1, HIDDEN_DIM)]
    pw2_row = c_ref[:, pl.ds(_PW2, HIDDEN_DIM)]   # (1, 256)
    pb2_row = c_ref[:, pl.ds(_PB2, 128)]          # pb2 broadcast over 128 lanes

    x = x_ref[...].astype(bf16)

    # ---- feature_extractor: Linear -> ReLU -> (Drop) -> Linear -> ReLU -> (Drop) -> Linear
    h = jnp.maximum(jnp.dot(x, fw1_ref[...], preferred_element_type=f32) + fb1, 0.0)
    h = jnp.maximum(
        jnp.dot(h.astype(bf16), fw2_ref[...], preferred_element_type=f32) + fb2, 0.0)
    feats = jnp.dot(h.astype(bf16), fw3_ref[...], preferred_element_type=f32) + fb3
    feats_bf = feats.astype(bf16)

    # ---- adaptation_network: Linear -> ReLU -> Linear
    a = jnp.maximum(
        jnp.dot(feats_bf, aw1_ref[...], preferred_element_type=f32) + ab1, 0.0)
    adapted_ref[...] = (
        jnp.dot(a.astype(bf16), aw2_ref[...], preferred_element_type=f32) + ab2)

    # ---- memory similarity + first-max argmax gather (one-hot matmul)
    mem = mem_ref[...]                                    # (128, 128) bf16, rows>=100 are 0
    sim = jax.lax.dot_general(
        feats_bf, mem,
        dimension_numbers=(((1,), (1,)), ((), ())),
        preferred_element_type=f32,
    )                                                     # (TILE_M, 128)
    iota = jax.lax.broadcasted_iota(jnp.int32, sim.shape, 1)
    sim = jnp.where(iota < N_MEMORY, sim, -jnp.inf)       # mask padded memory rows
    max_val = jnp.max(sim, axis=1, keepdims=True)
    cand = jnp.where(sim == max_val, iota, N_MEMORY_PAD)
    argmax_idx = jnp.min(cand, axis=1, keepdims=True)     # first index hitting max
    onehot = (iota == argmax_idx).astype(bf16)            # (TILE_M, 128)
    best_memory = jnp.dot(onehot, mem, preferred_element_type=f32)  # (TILE_M, 128)

    # ---- performance_predictor: split matmul (no lane concat) -> ReLU -> VPU reduce -> Sigmoid
    p = (jnp.dot(feats_bf, pw1a_ref[...], preferred_element_type=f32)
         + jnp.dot(best_memory.astype(bf16), pw1b_ref[...], preferred_element_type=f32)
         + pb1)
    p = jnp.maximum(p, 0.0)
    logits = jnp.sum(p * pw2_row, axis=-1, keepdims=True)  # (TILE_M, 1), VPU + XLU
    # lane-dense output: same value broadcast across all 128 lanes
    perf_ref[...] = jax.nn.sigmoid(logits + pb2_row)


def prepare_params(p):
    """One-time conversion: bf16 weights, padded memory, packed f32 constants."""
    bf16 = jnp.bfloat16

    def seg(v, n):
        v = jnp.asarray(v, jnp.float32).reshape(-1)
        return jnp.pad(v, (0, n - v.shape[0]))

    consts = jnp.concatenate([
        seg(p["fb1"], HIDDEN_DIM), seg(p["fb2"], HIDDEN_DIM), seg(p["fb3"], OUTPUT_DIM),
        seg(p["ab1"], HIDDEN_DIM), seg(p["ab2"], OUTPUT_DIM), seg(p["pb1"], HIDDEN_DIM),
        seg(p["pw2"], HIDDEN_DIM),
        jnp.broadcast_to(jnp.asarray(p["pb2"], jnp.float32).reshape(-1)[:1], (128,)),
    ]).reshape(1, _CONSTS_LEN)

    mem_pad = jnp.zeros((N_MEMORY_PAD, OUTPUT_DIM), bf16).at[:N_MEMORY].set(
        p["memory"].astype(bf16))

    return dict(
        fw1=p["fw1"].astype(bf16), fw2=p["fw2"].astype(bf16), fw3=p["fw3"].astype(bf16),
        aw1=p["aw1"].astype(bf16), aw2=p["aw2"].astype(bf16),
        mem=mem_pad,
        pw1a=p["pw1"][:OUTPUT_DIM].astype(bf16),
        pw1b=p["pw1"][OUTPUT_DIM:].astype(bf16),
        consts=consts,
    )


def meta_learning_forward(x, prep):
    """Batched forward: grid over batch tiles, weights resident in VMEM."""
    batch = x.shape[0]
    pad = (-batch) % TILE_M
    if pad:
        x = jnp.pad(x, ((0, pad), (0, 0)))
    n_tiles = x.shape[0] // TILE_M

    def resident(shape):  # weight blocks: same block for every grid step
        return pl.BlockSpec(shape, lambda i: (0, 0))

    adapted, perf_block = pl.pallas_call(
        _meta_kernel,
        out_shape=(
            jax.ShapeDtypeStruct((x.shape[0], OUTPUT_DIM), jnp.float32),  # adapted_output
            jax.ShapeDtypeStruct((x.shape[0], 128), jnp.float32),         # perf (lane-dense)
        ),
        grid_spec=pltpu.PrefetchScalarGridSpec(
            num_scalar_prefetch=0,
            grid=(n_tiles,),
            in_specs=[
                pl.BlockSpec((TILE_M, INPUT_DIM), lambda i: (i, 0)),   # x tile
                resident((INPUT_DIM, HIDDEN_DIM)),                      # fw1
                resident((HIDDEN_DIM, HIDDEN_DIM)),                     # fw2
                resident((HIDDEN_DIM, OUTPUT_DIM)),                     # fw3
                resident((OUTPUT_DIM, HIDDEN_DIM)),                     # aw1
                resident((HIDDEN_DIM, OUTPUT_DIM)),                     # aw2
                resident((N_MEMORY_PAD, OUTPUT_DIM)),                   # memory (padded)
                resident((OUTPUT_DIM, HIDDEN_DIM)),                     # pw1 top half
                resident((OUTPUT_DIM, HIDDEN_DIM)),                     # pw1 bottom half
                resident((1, _CONSTS_LEN)),                             # packed consts
            ],
            out_specs=(
                pl.BlockSpec((TILE_M, OUTPUT_DIM), lambda i: (i, 0)),
                pl.BlockSpec((TILE_M, 128), lambda i: (i, 0)),
            ),
        ),
        compiler_params=pltpu.CompilerParams(
            dimension_semantics=("parallel",)),
    )(x, prep["fw1"], prep["fw2"], prep["fw3"], prep["aw1"], prep["aw2"],
      prep["mem"], prep["pw1a"], prep["pw1b"], prep["consts"])

    return adapted[:batch], perf_block[:batch, :1]


def init_params(key):
    """Deterministic synthetic parameters. Weights stored as (in, out), f32."""
    def linear(k, fan_in, fan_out):
        kw, kb = jax.random.split(k)
        scale = 1.0 / np.sqrt(fan_in)
        w = jax.random.uniform(kw, (fan_in, fan_out), jnp.float32, -scale, scale)
        b = jax.random.uniform(kb, (1, fan_out), jnp.float32, -scale, scale)
        return w, b

    keys = jax.random.split(key, 9)
    fw1, fb1 = linear(keys[0], INPUT_DIM, HIDDEN_DIM)
    fw2, fb2 = linear(keys[1], HIDDEN_DIM, HIDDEN_DIM)
    fw3, fb3 = linear(keys[2], HIDDEN_DIM, OUTPUT_DIM)
    aw1, ab1 = linear(keys[3], OUTPUT_DIM, HIDDEN_DIM)
    aw2, ab2 = linear(keys[4], HIDDEN_DIM, OUTPUT_DIM)
    memory = jax.random.normal(keys[5], (N_MEMORY, OUTPUT_DIM), jnp.float32)
    pw1, pb1 = linear(keys[6], 2 * OUTPUT_DIM, HIDDEN_DIM)
    pw2, pb2 = linear(keys[7], HIDDEN_DIM, 1)
    return dict(
        fw1=fw1, fb1=fb1, fw2=fw2, fb2=fb2, fw3=fw3, fb3=fb3,
        aw1=aw1, ab1=ab1, aw2=aw2, ab2=ab2,
        memory=memory,
        pw1=pw1, pb1=pb1, pw2=pw2, pb2=pb2,
    )


def reference_forward(x, p):
    """Pure-JAX reference mirroring the PyTorch forward (eval mode) with the
    same bf16-input / f32-accumulate matmul precision as the kernel."""
    bf = jnp.bfloat16
    mm = lambda a, w: jnp.dot(a.astype(bf), w.astype(bf),
                              preferred_element_type=jnp.float32)
    h = jnp.maximum(mm(x, p["fw1"]) + p["fb1"], 0.0)
    h = jnp.maximum(mm(h, p["fw2"]) + p["fb2"], 0.0)
    feats = mm(h, p["fw3"]) + p["fb3"]
    a = jnp.maximum(mm(feats, p["aw1"]) + p["ab1"], 0.0)
    adapted = mm(a, p["aw2"]) + p["ab2"]
    mem_bf = p["memory"].astype(bf)
    sim = jnp.dot(feats.astype(bf), mem_bf.T, preferred_element_type=jnp.float32)
    best = mem_bf[jnp.argmax(sim, axis=1)]
    q = jnp.maximum(mm(feats, p["pw1"][:OUTPUT_DIM])
                    + mm(best, p["pw1"][OUTPUT_DIM:]) + p["pb1"], 0.0)
    logits = (jnp.sum(q * p["pw2"].reshape(1, -1), axis=-1, keepdims=True)
              + p["pb2"].reshape(1, 1))
    return adapted, jax.nn.sigmoid(logits)


if __name__ == "__main__":
    key = jax.random.PRNGKey(0)
    k_params, k_x = jax.random.split(key)
    params = init_params(k_params)
    x = jax.random.normal(k_x, (BATCH, INPUT_DIM), jnp.float32)

    prep = prepare_params(params)
    adapted, perf = jax.block_until_ready(meta_learning_forward(x, prep))
    ref_adapted, ref_perf = reference_forward(x, params)

    assert adapted.shape == (BATCH, OUTPUT_DIM)
    assert perf.shape == (BATCH, 1)
    np.testing.assert_allclose(np.asarray(adapted), np.asarray(ref_adapted),
                               rtol=1e-3, atol=1e-3)
    np.testing.assert_allclose(np.asarray(perf), np.asarray(ref_perf),
                               rtol=1e-3, atol=1e-3)
    print("KERNEL_OK")
</pallas_src>

<mosaic_0001>
module attributes {stable_mosaic.version = 11 : i64} {
  func.func @_meta_kernel(%arg0: i32, %arg1: memref<128x512xf32, #tpu.memory_space<vmem>>, %arg2: memref<512x256xbf16, #tpu.memory_space<vmem>>, %arg3: memref<256x256xbf16, #tpu.memory_space<vmem>>, %arg4: memref<256x128xbf16, #tpu.memory_space<vmem>>, %arg5: memref<128x256xbf16, #tpu.memory_space<vmem>>, %arg6: memref<256x128xbf16, #tpu.memory_space<vmem>>, %arg7: memref<128x128xbf16, #tpu.memory_space<vmem>>, %arg8: memref<128x256xbf16, #tpu.memory_space<vmem>>, %arg9: memref<128x256xbf16, #tpu.memory_space<vmem>>, %arg10: memref<1x1664xf32, #tpu.memory_space<vmem>>, %arg11: memref<128x128xf32, #tpu.memory_space<vmem>>, %arg12: memref<128x128xf32, #tpu.memory_space<vmem>>) attributes {dimension_semantics = [#tpu.dimension_semantics<parallel>], iteration_bounds = array<i64: 2>, scalar_prefetch = 0 : i64, scratch_operands = 0 : i64, tpu.core_type = #tpu.core_type<tc>, window_params = [{transform_indices = @transform_0, window_bounds = array<i64: 128, 512>}, {pipeline_mode = #tpu.pipeline_mode<synchronous>, transform_indices = @transform_1, window_bounds = array<i64: 512, 256>}, {pipeline_mode = #tpu.pipeline_mode<synchronous>, transform_indices = @transform_2, window_bounds = array<i64: 256, 256>}, {pipeline_mode = #tpu.pipeline_mode<synchronous>, transform_indices = @transform_3, window_bounds = array<i64: 256, 128>}, {pipeline_mode = #tpu.pipeline_mode<synchronous>, transform_indices = @transform_4, window_bounds = array<i64: 128, 256>}, {pipeline_mode = #tpu.pipeline_mode<synchronous>, transform_indices = @transform_5, window_bounds = array<i64: 256, 128>}, {pipeline_mode = #tpu.pipeline_mode<synchronous>, transform_indices = @transform_6, window_bounds = array<i64: 128, 128>}, {pipeline_mode = #tpu.pipeline_mode<synchronous>, transform_indices = @transform_7, window_bounds = array<i64: 128, 256>}, {pipeline_mode = #tpu.pipeline_mode<synchronous>, transform_indices = @transform_8, window_bounds = array<i64: 128, 256>}, {pipeline_mode = #tpu.pipeline_mode<synchronous>, transform_indices = @transform_9, window_bounds = array<i64: 1, 1664>}, {transform_indices = @transform_10, window_bounds = array<i64: 128, 128>}, {transform_indices = @transform_11, window_bounds = array<i64: 128, 128>}]} {
    %c0 = arith.constant 0 : index
    %c0_0 = arith.constant 0 : index
    %0 = vector.load %arg10[%c0, %c0_0] : memref<1x1664xf32, #tpu.memory_space<vmem>>, vector<1x256xf32>
    %c0_1 = arith.constant 0 : index
    %c256 = arith.constant 256 : index
    %1 = vector.load %arg10[%c0_1, %c256] : memref<1x1664xf32, #tpu.memory_space<vmem>>, vector<1x256xf32>
    %c0_2 = arith.constant 0 : index
    %c512 = arith.constant 512 : index
    %2 = vector.load %arg10[%c0_2, %c512] : memref<1x1664xf32, #tpu.memory_space<vmem>>, vector<1x128xf32>
    %c0_3 = arith.constant 0 : index
    %c640 = arith.constant 640 : index
    %3 = vector.load %arg10[%c0_3, %c640] : memref<1x1664xf32, #tpu.memory_space<vmem>>, vector<1x256xf32>
    %c0_4 = arith.constant 0 : index
    %c896 = arith.constant 896 : index
    %4 = vector.load %arg10[%c0_4, %c896] : memref<1x1664xf32, #tpu.memory_space<vmem>>, vector<1x128xf32>
    %c0_5 = arith.constant 0 : index
    %c1024 = arith.constant 1024 : index
    %5 = vector.load %arg10[%c0_5, %c1024] : memref<1x1664xf32, #tpu.memory_space<vmem>>, vector<1x256xf32>
    %c0_6 = arith.constant 0 : index
    %c1280 = arith.constant 1280 : index
    %6 = vector.load %arg10[%c0_6, %c1280] : memref<1x1664xf32, #tpu.memory_space<vmem>>, vector<1x256xf32>
    %c0_7 = arith.constant 0 : index
    %c1536 = arith.constant 1536 : index
    %7 = vector.load %arg10[%c0_7, %c1536] : memref<1x1664xf32, #tpu.memory_space<vmem>>, vector<1x128xf32>
    %c0_8 = arith.constant 0 : index
    %c0_9 = arith.constant 0 : index
    %8 = vector.load %arg1[%c0_8, %c0_9] : memref<128x512xf32, #tpu.memory_space<vmem>>, vector<128x512xf32>
    %9 = arith.truncf %8 : vector<128x512xf32> to vector<128x512xbf16>
    %c0_10 = arith.constant 0 : index
    %c0_11 = arith.constant 0 : index
    %10 = vector.load %arg2[%c0_10, %c0_11] : memref<512x256xbf16, #tpu.memory_space<vmem>>, vector<512x256xbf16>
    %cst = arith.constant dense<0.000000e+00> : vector<128x256xf32>
    %11 = tpu.matmul %9, %10, %cst {dimension_numbers = #tpu.dot_dimension_numbers<[1], [0], [0], [1], [0, 0, 1, 1], [], []>} : vector<128x512xbf16>, vector<512x256xbf16>, vector<128x256xf32> -> vector<128x256xf32>
    %12 = vector.broadcast %0 : vector<1x256xf32> to vector<128x256xf32>
    %13 = arith.addf %11, %12 : vector<128x256xf32>
    %cst_12 = arith.constant 0.000000e+00 : f32
    %14 = vector.broadcast %cst_12 : f32 to vector<128x256xf32>
    %15 = arith.maximumf %13, %14 : vector<128x256xf32>
    %16 = arith.truncf %15 : vector<128x256xf32> to vector<128x256xbf16>
    %c0_13 = arith.constant 0 : index
    %c0_14 = arith.constant 0 : index
    %17 = vector.load %arg3[%c0_13, %c0_14] : memref<256x256xbf16, #tpu.memory_space<vmem>>, vector<256x256xbf16>
    %cst_15 = arith.constant dense<0.000000e+00> : vector<128x256xf32>
    %18 = tpu.matmul %16, %17, %cst_15 {dimension_numbers = #tpu.dot_dimension_numbers<[1], [0], [0], [1], [0, 0, 1, 1], [], []>} : vector<128x256xbf16>, vector<256x256xbf16>, vector<128x256xf32> -> vector<128x256xf32>
    %19 = vector.broadcast %1 : vector<1x256xf32> to vector<128x256xf32>
    %20 = arith.addf %18, %19 : vector<128x256xf32>
    %cst_16 = arith.constant 0.000000e+00 : f32
    %21 = vector.broadcast %cst_16 : f32 to vector<128x256xf32>
    %22 = arith.maximumf %20, %21 : vector<128x256xf32>
    %23 = arith.truncf %22 : vector<128x256xf32> to vector<128x256xbf16>
    %c0_17 = arith.constant 0 : index
    %c0_18 = arith.constant 0 : index
    %24 = vector.load %arg4[%c0_17, %c0_18] : memref<256x128xbf16, #tpu.memory_space<vmem>>, vector<256x128xbf16>
    %cst_19 = arith.constant dense<0.000000e+00> : vector<128x128xf32>
    %25 = tpu.matmul %23, %24, %cst_19 {dimension_numbers = #tpu.dot_dimension_numbers<[1], [0], [0], [1], [0, 0, 1, 1], [], []>} : vector<128x256xbf16>, vector<256x128xbf16>, vector<128x128xf32> -> vector<128x128xf32>
    %26 = vector.broadcast %2 : vector<1x128xf32> to vector<128x128xf32>
    %27 = arith.addf %25, %26 : vector<128x128xf32>
    %28 = arith.truncf %27 : vector<128x128xf32> to vector<128x128xbf16>
    %c0_20 = arith.constant 0 : index
    %c0_21 = arith.constant 0 : index
    %29 = vector.load %arg5[%c0_20, %c0_21] : memref<128x256xbf16, #tpu.memory_space<vmem>>, vector<128x256xbf16>
    %cst_22 = arith.constant dense<0.000000e+00> : vector<128x256xf32>
    %30 = tpu.matmul %28, %29, %cst_22 {dimension_numbers = #tpu.dot_dimension_numbers<[1], [0], [0], [1], [0, 0, 1, 1], [], []>} : vector<128x128xbf16>, vector<128x256xbf16>, vector<128x256xf32> -> vector<128x256xf32>
    %31 = vector.broadcast %3 : vector<1x256xf32> to vector<128x256xf32>
    %32 = arith.addf %30, %31 : vector<128x256xf32>
    %cst_23 = arith.constant 0.000000e+00 : f32
    %33 = vector.broadcast %cst_23 : f32 to vector<128x256xf32>
    %34 = arith.maximumf %32, %33 : vector<128x256xf32>
    %35 = arith.truncf %34 : vector<128x256xf32> to vector<128x256xbf16>
    %c0_24 = arith.constant 0 : index
    %c0_25 = arith.constant 0 : index
    %36 = vector.load %arg6[%c0_24, %c0_25] : memref<256x128xbf16, #tpu.memory_space<vmem>>, vector<256x128xbf16>
    %cst_26 = arith.constant dense<0.000000e+00> : vector<128x128xf32>
    %37 = tpu.matmul %35, %36, %cst_26 {dimension_numbers = #tpu.dot_dimension_numbers<[1], [0], [0], [1], [0, 0, 1, 1], [], []>} : vector<128x256xbf16>, vector<256x128xbf16>, vector<128x128xf32> -> vector<128x128xf32>
    %38 = vector.broadcast %4 : vector<1x128xf32> to vector<128x128xf32>
    %39 = arith.addf %37, %38 : vector<128x128xf32>
    %c0_27 = arith.constant 0 : index
    %c0_28 = arith.constant 0 : index
    %40 = vector.load %arg11[%c0_27, %c0_28] : memref<128x128xf32, #tpu.memory_space<vmem>>, vector<128x128xf32>
    tpu.vector_store %arg11[%c0_27, %c0_28], %39 {strides = array<i32>} : memref<128x128xf32, #tpu.memory_space<vmem>>, vector<128x128xf32>,
    %c0_29 = arith.constant 0 : index
    %c0_30 = arith.constant 0 : index
    %41 = vector.load %arg7[%c0_29, %c0_30] : memref<128x128xbf16, #tpu.memory_space<vmem>>, vector<128x128xbf16>
    %cst_31 = arith.constant dense<0.000000e+00> : vector<128x128xf32>
    %42 = tpu.matmul %28, %41, %cst_31 {dimension_numbers = #tpu.dot_dimension_numbers<[1], [1], [0], [0], [0, 0, 1, 0], [], []>} : vector<128x128xbf16>, vector<128x128xbf16>, vector<128x128xf32> -> vector<128x128xf32>
    %43 = tpu.iota {dimensions = array<i32: 1>} : vector<128x128xi32>
    %c100_i32 = arith.constant 100 : i32
    %44 = vector.broadcast %c100_i32 : i32 to vector<128x128xi32>
    %45 = arith.cmpi slt, %43, %44 : vector<128x128xi32>
    %cst_32 = arith.constant 0xFF800000 : f32
    %46 = vector.broadcast %cst_32 : f32 to vector<128x128xf32>
    %47 = arith.select %45, %42, %46 : vector<128x128xi1>, vector<128x128xf32>
    %cst_33 = arith.constant dense<0xFF800000> : vector<128xf32>
    %48 = vector.multi_reduction <maximumf>, %47, %cst_33 [1] : vector<128x128xf32> to vector<128xf32>
    %49 = vector.shape_cast %48 : vector<128xf32> to vector<128x1xf32>
    %50 = vector.broadcast %49 : vector<128x1xf32> to vector<128x128xf32>
    %51 = arith.cmpf oeq, %47, %50 : vector<128x128xf32>
    %c128_i32 = arith.constant 128 : i32
    %52 = vector.broadcast %c128_i32 : i32 to vector<128x128xi32>
    %53 = arith.select %51, %43, %52 : vector<128x128xi1>, vector<128x128xi32>
    %cst_34 = arith.constant dense<2147483647> : vector<128xi32>
    %54 = vector.multi_reduction <minsi>, %53, %cst_34 [1] : vector<128x128xi32> to vector<128xi32>
    %55 = vector.shape_cast %54 : vector<128xi32> to vector<128x1xi32>
    %56 = vector.broadcast %55 : vector<128x1xi32> to vector<128x128xi32>
    %57 = arith.cmpi eq, %43, %56 : vector<128x128xi32>
    %58 = arith.extui %57 : vector<128x128xi1> to vector<128x128xi32>
    %59 = arith.sitofp %58 : vector<128x128xi32> to vector<128x128xf32>
    %60 = arith.truncf %59 : vector<128x128xf32> to vector<128x128xbf16>
    %cst_35 = arith.constant dense<0.000000e+00> : vector<128x128xf32>
    %61 = tpu.matmul %60, %41, %cst_35 {dimension_numbers = #tpu.dot_dimension_numbers<[1], [0], [0], [1], [0, 0, 1, 1], [], []>} : vector<128x128xbf16>, vector<128x128xbf16>, vector<128x128xf32> -> vector<128x128xf32>
    %c0_36 = arith.constant 0 : index
    %c0_37 = arith.constant 0 : index
    %62 = vector.load %arg8[%c0_36, %c0_37] : memref<128x256xbf16, #tpu.memory_space<vmem>>, vector<128x256xbf16>
    %cst_38 = arith.constant dense<0.000000e+00> : vector<128x256xf32>
    %63 = tpu.matmul %28, %62, %cst_38 {dimension_numbers = #tpu.dot_dimension_numbers<[1], [0], [0], [1], [0, 0, 1, 1], [], []>} : vector<128x128xbf16>, vector<128x256xbf16>, vector<128x256xf32> -> vector<128x256xf32>
    %64 = arith.truncf %61 : vector<128x128xf32> to vector<128x128xbf16>
    %c0_39 = arith.constant 0 : index
    %c0_40 = arith.constant 0 : index
    %65 = vector.load %arg9[%c0_39, %c0_40] : memref<128x256xbf16, #tpu.memory_space<vmem>>, vector<128x256xbf16>
    %cst_41 = arith.constant dense<0.000000e+00> : vector<128x256xf32>
    %66 = tpu.matmul %64, %65, %cst_41 {dimension_numbers = #tpu.dot_dimension_numbers<[1], [0], [0], [1], [0, 0, 1, 1], [], []>} : vector<128x128xbf16>, vector<128x256xbf16>, vector<128x256xf32> -> vector<128x256xf32>
    %67 = arith.addf %63, %66 : vector<128x256xf32>
    %68 = vector.broadcast %5 : vector<1x256xf32> to vector<128x256xf32>
    %69 = arith.addf %67, %68 : vector<128x256xf32>
    %cst_42 = arith.constant 0.000000e+00 : f32
    %70 = vector.broadcast %cst_42 : f32 to vector<128x256xf32>
    %71 = arith.maximumf %69, %70 : vector<128x256xf32>
    %72 = vector.broadcast %6 : vector<1x256xf32> to vector<128x256xf32>
    %73 = arith.mulf %71, %72 : vector<128x256xf32>
    %cst_43 = arith.constant dense<0.000000e+00> : vector<128xf32>
    %74 = vector.multi_reduction <add>, %73, %cst_43 [1] : vector<128x256xf32> to vector<128xf32>
    %75 = vector.shape_cast %74 : vector<128xf32> to vector<128x1xf32>
    %76 = vector.broadcast %75 : vector<128x1xf32> to vector<128x128xf32>
    %77 = vector.broadcast %7 : vector<1x128xf32> to vector<128x128xf32>
    %78 = arith.addf %76, %77 : vector<128x128xf32>
    %79 = arith.negf %78 : vector<128x128xf32>
    %80 = math.exp %79 : vector<128x128xf32>
    %cst_44 = arith.constant 1.000000e+00 : f32
    %81 = vector.broadcast %cst_44 : f32 to vector<128x128xf32>
    %82 = arith.addf %81, %80 : vector<128x128xf32>
    %83 = arith.divf %81, %82 : vector<128x128xf32>
    %c0_45 = arith.constant 0 : index
    %c0_46 = arith.constant 0 : index
    %84 = vector.load %arg12[%c0_45, %c0_46] : memref<128x128xf32, #tpu.memory_space<vmem>>, vector<128x128xf32>
    tpu.vector_store %arg12[%c0_45, %c0_46], %83 {strides = array<i32>} : memref<128x128xf32, #tpu.memory_space<vmem>>, vector<128x128xf32>,
    return
  }
  func.func @transform_0(%arg0: i32) -> (i32, i32) {
    %c0_i32 = arith.constant 0 : i32
    %c0_i32_0 = arith.constant 0 : i32
    return %arg0, %c0_i32 : i32, i32
  }
  func.func @transform_1(%arg0: i32) -> (i32, i32) {
    %c0_i32 = arith.constant 0 : i32
    %c0_i32_0 = arith.constant 0 : i32
    %c0_i32_1 = arith.constant 0 : i32
    return %c0_i32, %c0_i32_0 : i32, i32
  }
  func.func @transform_2(%arg0: i32) -> (i32, i32) {
    %c0_i32 = arith.constant 0 : i32
    %c0_i32_0 = arith.constant 0 : i32
    %c0_i32_1 = arith.constant 0 : i32
    return %c0_i32, %c0_i32_0 : i32, i32
  }
  func.func @transform_3(%arg0: i32) -> (i32, i32) {
    %c0_i32 = arith.constant 0 : i32
    %c0_i32_0 = arith.constant 0 : i32
    %c0_i32_1 = arith.constant 0 : i32
    return %c0_i32, %c0_i32_0 : i32, i32
  }
  func.func @transform_4(%arg0: i32) -> (i32, i32) {
    %c0_i32 = arith.constant 0 : i32
    %c0_i32_0 = arith.constant 0 : i32
    %c0_i32_1 = arith.constant 0 : i32
    return %c0_i32, %c0_i32_0 : i32, i32
  }
  func.func @transform_5(%arg0: i32) -> (i32, i32) {
    %c0_i32 = arith.constant 0 : i32
    %c0_i32_0 = arith.constant 0 : i32
    %c0_i32_1 = arith.constant 0 : i32
    return %c0_i32, %c0_i32_0 : i32, i32
  }
  func.func @transform_6(%arg0: i32) -> (i32, i32) {
    %c0_i32 = arith.constant 0 : i32
    %c0_i32_0 = arith.constant 0 : i32
    %c0_i32_1 = arith.constant 0 : i32
    return %c0_i32, %c0_i32_0 : i32, i32
  }
  func.func @transform_7(%arg0: i32) -> (i32, i32) {
    %c0_i32 = arith.constant 0 : i32
    %c0_i32_0 = arith.constant 0 : i32
    %c0_i32_1 = arith.constant 0 : i32
    return %c0_i32, %c0_i32_0 : i32, i32
  }
  func.func @transform_8(%arg0: i32) -> (i32, i32) {
    %c0_i32 = arith.constant 0 : i32
    %c0_i32_0 = arith.constant 0 : i32
    %c0_i32_1 = arith.constant 0 : i32
    return %c0_i32, %c0_i32_0 : i32, i32
  }
  func.func @transform_9(%arg0: i32) -> (i32, i32) {
    %c0_i32 = arith.constant 0 : i32
    %c0_i32_0 = arith.constant 0 : i32
    %c0_i32_1 = arith.constant 0 : i32
    return %c0_i32, %c0_i32_0 : i32, i32
  }
  func.func @transform_10(%arg0: i32) -> (i32, i32) {
    %c0_i32 = arith.constant 0 : i32
    %c0_i32_0 = arith.constant 0 : i32
    return %arg0, %c0_i32 : i32, i32
  }
  func.func @transform_11(%arg0: i32) -> (i32, i32) {
    %c0_i32 = arith.constant 0 : i32
    %c0_i32_0 = arith.constant 0 : i32
    return %arg0, %c0_i32 : i32, i32
  }
}

</mosaic_0001>

<bundles_post_ra>
// kernel: tpu_custom_call.1
= control target key start
LH: loop header
LB: loop body
LE: loop exit
PB: predicated region body
PF: predicated region fallthrough
CT: control target
= control target key end

     0   :  { %s7210_s0 = inlined_call_operand.hbm [shape: f32[256,512], index: 0, kind: input, shape index: {}]   ;;  %s7211_s1 = inlined_call_operand.hbm [shape: bf16[512,256], index: 1, kind: input, shape index: {}]   ;;  %s7212_s2 = inlined_call_operand.hbm [shape: bf16[256,256], index: 2, kind: input, shape index: {}]   ;;  %s7213_s3 = inlined_call_operand.hbm [shape: bf16[256,128], index: 3, kind: input, shape index: {}]   ;;  %s7214_s4 = inlined_call_operand.hbm [shape: bf16[128,256], index: 4, kind: input, shape index: {}]   ;;  %s7215_s5 = inlined_call_operand.hbm [shape: bf16[256,128], index: 5, kind: input, shape index: {}]   ;;  %s7216_s6 = inlined_call_operand.hbm [shape: bf16[128,128], index: 6, kind: input, shape index: {}]   ;;  %s7217_s7 = inlined_call_operand.hbm [shape: bf16[128,256], index: 7, kind: input, shape index: {}]   ;;  %s7218_s8 = inlined_call_operand.hbm [shape: bf16[128,256], index: 8, kind: input, shape index: {}]   ;;  %s7219_s9 = inlined_call_operand.hbm [shape: f32[1,1664], index: 9, kind: input, shape index: {}]   ;;  %s7220_s10 = inlined_call_operand.hbm [shape: f32[256,128], index: 10, kind: output, shape index: {0}]   ;;  %s7221_s11 = inlined_call_operand.hbm [shape: f32[256,128], index: 11, kind: output, shape index: {1}]  }
   0x1   :  { %7225 = sst [smem:[#allocation30_spill]] %s7211_s1 }
   0x2   :  { %7226 = sst [smem:[#allocation31_spill]] %s7212_s2 }
   0x3   :  { %7227 = sst [smem:[#allocation32_spill]] %s7213_s3 }
   0x4   :  { %7228 = sst [smem:[#allocation33_spill]] %s7214_s4 }
   0x5   :  { %7229 = sst [smem:[#allocation34_spill]] %s7215_s5 }
   0x6   :  { %7230 = sst [smem:[#allocation35_spill]] %s7216_s6 }
   0x7   :  { %17 = vsyncpa [#allocation3], 0 }
   0x8   :  { %19 = vsyncpa [#allocation3 + $0x1], 0 }
   0x9   :  { %20 = vsyncpa [#allocation6], 0 }
   0xa   :  { %21 = vsyncpa [#allocation9], 0 }
   0xb   :  { %22 = vsyncpa [#allocation12], 0 }
   0xc   :  { %23 = vsyncpa [#allocation15], 0 }
   0xd   :  { %24 = vsyncpa [#allocation18], 0 }
   0xe   :  { %25 = vsyncpa [#allocation4], 0 }
   0xf   :  { %27 = vsyncpa [#allocation4 + $0x1], 0 }
  0x10   :  { %28 = vsyncpa [#allocation21], 0 }
  0x11   :  { %30 = vsyncpa [#allocation21 + $0x1], 0  ;;  %s6041_s17 = smov 0   ;;  %s6043_s18 = smov 0  }
  0x12   :  { %s6045_s19 = smov 0   ;;  %s6047_s20 = smov 0  }
  0x13 LB: > { %s7231_s1 = sld [smem:[#allocation30_spill]]  ;;  %s6065_s24 = sadd.s32 4294967295, %s5961_s20   ;;  %s5961_s20 = sphi %s6047_s20, %s7250_s20   ;;  %s5957_s19 = sphi %s6045_s19, %s7249_s19   ;;  %s5953_s18 = sphi %s6043_s18, %s7248_s18   ;;  %s5949_s17 = sphi %s6041_s17, %s7247_s17  }
  0x14   : > { %p4317_p0 = scmp.ge.s32.totalorder %s5961_s20, 1  ;;  %p57_p1 = scmp.eq.s32.totalorder %s6065_s24, 0 }
  0x15   : > { %p308_p2 = scmp.lt.s32.totalorder %s5961_s20, 3  ;;  %s5963_s26 = smov [#allocation5]  }
  0x16   : > { %s321_s27 = sshll.u32 %s5963_s26, 4  ;;  %s7233_s3 = sld [smem:[#allocation32_spill]]  ;;  %s322_s27 = int_to_ptr.vmem [resolvable:$true] %s321_s27 }
  0x17   : > { %p6070_p3 = pnand %p4317_p0, %p308_p2  ;;  %s5964_s13 = smov [#allocation8]  }
  0x18   : > { %s349_s14 = sshll.u32 %s5964_s13, 4  ;;  %s7222_s15 = smov 128   ;;  %s350_s14 = int_to_ptr.vmem [resolvable:$true] %s349_s14 }
  0x19   : > { %s319_s23 = sshll.u32 %s7231_s1, 4  ;;  %p5367_p4 = pneg %p6070_p3  ;;  %s320_s23 = int_to_ptr.hbm [resolvable:$true] %s319_s23 }
  0x1a   : > { %s5966_s16 = smov 8   ;;  %s7224_s21 = smov 64  }
  0x1b   : > { %p6082_p6 = pnand %p5367_p4, %p57_p1  ;;  %s5968_s22 = smov 4  }
  0x1c   : > { %s347_s30 = sshll.u32 %s7233_s3, 4  ;;  %s7235_s5 = sld [smem:[#allocation34_spill]]  ;;  %s348_s30 = int_to_ptr.hbm [resolvable:$true] %s347_s30 }
  0x1d   : > { %5370 = dma.hbm_to_vmem [thread:$0]  (!%p6082_p6), %s320_s23, 8192, %s322_s27, [#allocation6], %s7222_s15, %s7222_s15, %s5966_s16  }
  0x1e   : > { %5376 = dma.hbm_to_vmem [thread:$0]  (!%p6082_p6), %s348_s30, 2048, %s350_s14, [#allocation9], %s7224_s21, %s7224_s21, %s5968_s22  }
  0x1f   : > { %s5969_s13 = smov [#allocation11]   ;;  %s403_s27 = sshll.u32 %s7217_s7, 4  ;;  %s404_s27 = int_to_ptr.hbm [resolvable:$true] %s403_s27 }
  0x20   : > { %s377_s1 = sshll.u32 %s5969_s13, 4  ;;  %s5970_s30 = smov [#allocation14]   ;;  %s378_s1 = int_to_ptr.vmem [resolvable:$true] %s377_s1 }
  0x21   : > { %s405_s14 = sshll.u32 %s5970_s30, 4  ;;  %s7236_s2 = sld [smem:[#allocation31_spill]]  ;;  %s406_s14 = int_to_ptr.vmem [resolvable:$true] %s405_s14 }
  0x22   : > { %s375_s29 = sshll.u32 %s7235_s5, 4  ;;  %s7237_s13 = smov 128   ;;  %s376_s29 = int_to_ptr.hbm [resolvable:$true] %s375_s29 }
  0x23   : > { %5382 = dma.hbm_to_vmem [thread:$0]  (!%p6082_p6), %s376_s29, 2048, %s378_s1, [#allocation12], %s7224_s21, %s7224_s21, %s5968_s22  }
  0x24   : > { %5388 = dma.hbm_to_vmem [thread:$0]  (!%p6082_p6), %s404_s27, 2048, %s406_s14, [#allocation15], %s7237_s13, %s7237_s13, %s5966_s16  }
  0x25   : > { %s7238_s4 = sld [smem:[#allocation33_spill]]  ;;  %s5971_s1 = smov [#allocation7]  }
  0x26   : > { %s335_s29 = sshll.u32 %s5971_s1, 4  ;;  %s5972_s15 = smov [#allocation10]   ;;  %s336_s29 = int_to_ptr.vmem [resolvable:$true] %s335_s29 }
  0x27   : > { %s333_s28 = sshll.u32 %s7236_s2, 4  ;;  %s363_s30 = sshll.u32 %s5972_s15, 4  ;;  %s334_s28 = int_to_ptr.hbm [resolvable:$true] %s333_s28  ;;  %s364_s30 = int_to_ptr.vmem [resolvable:$true] %s363_s30 }
  0x28   : > { %5373 = dma.hbm_to_vmem [thread:$0]  (!%p6082_p6), %s334_s28, 4096, %s336_s29, [#allocation6], %s7237_s13, %s7237_s13, %s5966_s16  }
  0x29   : > { %s7239_s6 = sld [smem:[#allocation35_spill]]  ;;  %s417_s23 = sshll.u32 %s7218_s8, 4  ;;  %s418_s23 = int_to_ptr.hbm [resolvable:$true] %s417_s23 }
  0x2a   : > { %s5973_s28 = smov [#allocation13]   ;;  %s7240_s21 = smov 64  }
  0x2b   : > { %s361_s5 = sshll.u32 %s7238_s4, 4  ;;  %s391_s1 = sshll.u32 %s5973_s28, 4  ;;  %s362_s5 = int_to_ptr.hbm [resolvable:$true] %s361_s5  ;;  %s392_s1 = int_to_ptr.vmem [resolvable:$true] %s391_s1 }
  0x2c   : > { %5379 = dma.hbm_to_vmem [thread:$0]  (!%p6082_p6), %s362_s5, 2048, %s364_s30, [#allocation9], %s7237_s13, %s7237_s13, %s5966_s16  }
  0x2d   : > { %s5974_s5 = smov [#allocation16]   ;;  %s432_s26 = sshll.u32 %s7219_s9, 4  ;;  %s433_s26 = int_to_ptr.hbm [resolvable:$true] %s432_s26 }
  0x2e   : > { %s419_s29 = sshll.u32 %s5974_s5, 4  ;;  %s4316_s14 = sadd.s32 4294967294, %s5961_s20   ;;  %s420_s29 = int_to_ptr.vmem [resolvable:$true] %s419_s29 }
  0x2f   : > { %s389_s27 = sshll.u32 %s7239_s6, 4  ;;  %s6151_s3 = sadd.s32 1, %s5961_s20   ;;  %s390_s27 = int_to_ptr.hbm [resolvable:$true] %s389_s27 }
  0x30   : > { %5385 = dma.hbm_to_vmem [thread:$0]  (!%p6082_p6), %s390_s27, 1024, %s392_s1, [#allocation12], %s7240_s21, %s7240_s21, %s5968_s22  }
  0x31   : > { %5391 = dma.hbm_to_vmem [thread:$0]  (!%p6082_p6), %s418_s23, 2048, %s420_s29, [#allocation15], %s7237_s13, %s7237_s13, %s5966_s16  }
  0x32   : > { %s5975_s22 = smov [#allocation17]   ;;  %s43_s28 = sadd.s32 1, %s5957_s19 }
  0x33   : > { %s434_s27 = sshll.u32 %s5975_s22, 4  ;;  %s40_s1 = ssub.s32 %s5961_s20, %s6151_s3  ;;  %s435_s27 = int_to_ptr.vmem [resolvable:$true] %s434_s27 }
  0x34   : > { %5394 = dma.hbm_to_vmem [thread:$0]  (!%p6082_p6), %s433_s26, 208, %s435_s27, [#allocation18]  }
  0x35   : > { %p50_p7 = scmp.ne.s32.totalorder %s5957_s19, %s5953_s18  ;;  %p41_p8 = scmp.eq.s32.totalorder %s40_s1, 0 }
  0x36   : > { %p51_p9 = scmp.eq.s32.totalorder %s5961_s20, 0  ;;  %p56_p10 = scmp.ne.s32.totalorder %s5953_s18, %s5949_s17 }
  0x37   : > { %p269_p11 = scmp.eq.s32.totalorder %s6065_s24, 1  ;;  %p275_p2 = scmp.eq.s32.totalorder %s4316_s14, 1 }
  0x38   : > { %s6163_s16 = scalar_select %p41_p8, %s5957_s19, %s43_s28  }
  0x39   : > { %p6165_p12 = por %p51_p9, %p50_p7  ;;  %p6171_p13 = por %p57_p1, %p56_p10 }
  0x3a   : > { %p6175_p0 = por %p269_p11, %p50_p7  ;;  %p5415_p4 = scmp.lt.s32.totalorder %s5961_s20, 2 }
  0x3b   : > { %s445_s21 = sand.u32 1, %s5957_s19   ;;  %p6181_p6 = por %p275_p2, %p56_p10 }
  0x3c   : > { %s4328_s29 = sshll.u32 %s445_s21, 9  ;;  %s5138_s15 = sshll.u32 %s5961_s20, 9 }
  0x3d   : > { %s455_s22 = scalar_lea.hbm %s7210_s0, %s5138_s15  ;;  %s449_s28 = scalar_lea.vmem [#allocation2], %s4328_s29 }
  0x3e   : > { %s456_s27 = sshll.u32 %s455_s22, 4  ;;  %s458_s1 = sshll.u32 %s449_s28, 4  ;;  %s457_s27 = int_to_ptr.hbm [resolvable:$true] %s456_s27  ;;  %s459_s1 = int_to_ptr.vmem [resolvable:$true] %s458_s1 }
  0x3f   : > { %p6191_p7 = pnand %p5415_p4, %p6165_p12  ;;  %s446_s2 = scalar_lea.sflag [#allocation3], %s445_s21 }
  0x40   : > { %s5813_s4 = sshra.s32 %s457_s27, 4  ;;  %s5820_s30 = scalar_lea.hbm %s7210_s0, 1024  ;;  %s5814_s4 = int_to_ptr.hbm [resolvable:$true] %s5813_s4 }
  0x41   : > { %s5815_s6 = scalar_lea.hbm %s5814_s4, 512  ;;  %p5817_p9 = pneg %p6191_p7 }
  0x42   : > { %p5816_p8 = scmp.ne.s32.totalorder %s5814_s4, %s5815_s6  ;;  %p5821_p12 = scmp.lt.s32.totalorder %s5814_s4, %s7210_s0 }
  0x43   : > { %p5822_p2 = scmp.lt.s32.totalorder %s5820_s30, %s5815_s6 }
  0x44   : > { %p5818_p10 = pnand %p5817_p9, %p5816_p8 }
  0x45   : > { %p5823_p4 = por %p5822_p2, %p5821_p12 }
  0x46   : > { %p5819_p11 = pneg %p5818_p10 }
  0x48   : > { %p5824_p5 = pnand %p5823_p4, %p5819_p11 }
  0x4a   : > { %5827 = shalt.err (!%p5824_p5)
}
  0x4b   : > { %s5976_s21 = smov 512   ;;  %s5977_s22 = smov 32  }
  0x4c   : > { %5398 = dma.hbm_to_vmem [thread:$0]  (!%p6191_p7), %s457_s27, 8192, %s459_s1, %s446_s2, %s5976_s21, %s5976_s21, %s5977_s22  }
  0x4d   : > { %470 = sbr.rel (%p6070_p3) target bundleno = 2019 (0x7e3), region = 60  ;;  %s6208_s28 = sand.u32 (!%p6070_p3), 1, %s5953_s18  }
  0x4e   : > { %s4333_s15 = sshll.u32 (!%p6070_p3), %s6208_s28, 9  ;;  %s473_s4 = scalar_lea.sflag (!%p6070_p3), [#allocation3], %s6208_s28 }
  0x4f   : > { %s6212_s6 = scalar_lea.vmem (!%p6070_p3), [#allocation2], %s4333_s15 }
  0x52   : > { %5916 = dma.done.wait (%p6171_p13), %s473_s4, 8192  }
  0x53   : > { %5918 = vsyncadd (%p6171_p13), %s473_s4, 4294959104 }
  0x54   : > { %5920 = dma.done.wait (%p57_p1), [#allocation6], 12288  }
  0x55   : > { %5922 = vsyncadd (%p57_p1), [#allocation6], 4294955008 }
  0x56   : > { %5924 = dma.done.wait (%p57_p1), [#allocation9], 4096  }
  0x57   : > { %5926 = vsyncadd (%p57_p1), [#allocation9], 4294963200 }
  0x58   : > { %5928 = dma.done.wait (%p57_p1), [#allocation12], 3072  }
  0x59   : > { %5930 = vsyncadd (%p57_p1), [#allocation12], 4294964224 }
  0x5a   : > { %5932 = dma.done.wait (%p57_p1), [#allocation15], 4096  }
  0x5b   : > { %5934 = vsyncadd (%p57_p1), [#allocation15], 4294963200 }
  0x5c   : > { %5936 = dma.done.wait (%p57_p1), [#allocation18], 208  }
  0x5d   : > { %5938 = vsyncadd (%p57_p1), [#allocation18], 4294967088  ;;  %v4403_v0 = vld [vmem:[#allocation5 + $0x70] sm:$0xf]  ;;  %v5154_v1 = vld [vmem:[#allocation5 + $0x74] sm:$0xf0] }
  0x5e   : > { %v4467_v2 = vld [vmem:[#allocation5 + $0xf0] sm:$0xf]  ;;  %v4404_v3 = vor.u32 %v5154_v1, %v4403_v0  ;;  %v5170_v4 = vld [vmem:[#allocation5 + $0xf4] sm:$0xf0]  ;;  %v4395_v11 = vld [vmem:[#allocation5 + $0x60] sm:$0xf] }
  0x5f   : > { %v4531_v5 = vld [vmem:[#allocation5 + $0x170] sm:$0xf]  ;;  %v5186_v6 = vld [vmem:[#allocation5 + $0x174] sm:$0xf0]  ;;  %v4468_v7 = vor.u32 %v5170_v4, %v4467_v2  ;;  %v5152_v13 = vld [vmem:[#allocation5 + $0x64] sm:$0xf0] }
  0x60   : > { %v4532_v8 = vor.u32 %v5186_v6, %v4531_v5  ;;  %v4595_v9 = vld [vmem:[#allocation5 + $0x1f0] sm:$0xf]  ;;  %v5202_v10 = vld [vmem:[#allocation5 + $0x1f4] sm:$0xf0]  ;;  %1062 = vmatpush.bf16.msra.mxu0 %v4404_v3  ;;  %v4459_v14 = vld [vmem:[#allocation5 + $0xe0] sm:$0xf]  ;;  %v4396_v16 = vor.u32 %v5152_v13, %v4395_v11 }
  0x61   : > { %v4596_v12 = vor.u32 %v5202_v10, %v4595_v9  ;;  %v5168_v15 = vld [vmem:[#allocation5 + $0xe4] sm:$0xf0]  ;;  %1111 = vmatpush.bf16.msra.mxu1 %v4468_v7  ;;  %v4523_v18 = vld [vmem:[#allocation5 + $0x160] sm:$0xf]  ;;  %v4387_v23 = vld [vmem:[#allocation5 + $0x50] sm:$0xf] }
  0x62   : > { %1160 = vmatpush.bf16.msra.mxu2 %v4532_v8  ;;  %v4460_v17 = vor.u32 %v5168_v15, %v4459_v14  ;;  %v5184_v19 = vld [vmem:[#allocation5 + $0x164] sm:$0xf0]  ;;  %v4587_v20 = vld [vmem:[#allocation5 + $0x1e0] sm:$0xf]  ;;  %v5150_v24 = vld [vmem:[#allocation5 + $0x54] sm:$0xf0] }
  0x63   : > { %1209 = vmatpush.bf16.msra.mxu3 %v4596_v12  ;;  %v4524_v21 = vor.u32 %v5184_v19, %v4523_v18  ;;  %v5200_v22 = vld [vmem:[#allocation5 + $0x1e4] sm:$0xf0]  ;;  %v4451_v26 = vld [vmem:[#allocation5 + $0xd0] sm:$0xf]  ;;  %v5166_v27 = vld [vmem:[#allocation5 + $0xd4] sm:$0xf0]  ;;  %v4388_v29 = vor.u32 %v5150_v24, %v4387_v23 }
  0x64   : > { %v4588_v25 = vor.u32 %v5200_v22, %v4587_v20  ;;  %v4515_v28 = vld [vmem:[#allocation5 + $0x150] sm:$0xf]  ;;  %1063 = vmatpush.bf16.msra.mxu0 %v4396_v16  ;;  %v5182_v30 = vld [vmem:[#allocation5 + $0x154] sm:$0xf0]  ;;  %v4452_v33 = vor.u32 %v5166_v27, %v4451_v26  ;;  %v4379_v35 = vld [vmem:[#allocation5 + $0x40] sm:$0xf] }
  0x65   : > { %v4579_v31 = vld [vmem:[#allocation5 + $0x1d0] sm:$0xf]  ;;  %v5198_v32 = vld [vmem:[#allocation5 + $0x1d4] sm:$0xf0]  ;;  %1112 = vmatpush.bf16.msra.mxu1 %v4460_v17  ;;  %v4516_v34 = vor.u32 %v5182_v30, %v4515_v28  ;;  %v5148_v36 = vld [vmem:[#allocation5 + $0x44] sm:$0xf0] }
  0x66   : > { %1161 = vmatpush.bf16.msra.mxu2 %v4524_v21  ;;  %v4443_v37 = vld [vmem:[#allocation5 + $0xc0] sm:$0xf]  ;;  %v4580_v38 = vor.u32 %v5198_v32, %v4579_v31  ;;  %v5164_v39 = vld [vmem:[#allocation5 + $0xc4] sm:$0xf0]  ;;  %v4380_v44 = vor.u32 %v5148_v36, %v4379_v35  ;;  %v4371_v47 = vld [vmem:[#allocation5 + $0x30] sm:$0xf] }
  0x67   : > { %1210 = vmatpush.bf16.msra.mxu3 %v4588_v25  ;;  %v4507_v40 = vld [vmem:[#allocation5 + $0x140] sm:$0xf]  ;;  %v5180_v41 = vld [vmem:[#allocation5 + $0x144] sm:$0xf0]  ;;  %v4444_v45 = vor.u32 %v5164_v39, %v4443_v37  ;;  %v5146_v48 = vld [vmem:[#allocation5 + $0x34] sm:$0xf0] }
  0x68   : > { %v4571_v42 = vld [vmem:[#allocation5 + $0x1c0] sm:$0xf]  ;;  %v5196_v43 = vld [vmem:[#allocation5 + $0x1c4] sm:$0xf0]  ;;  %1064 = vmatpush.bf16.msra.mxu0 %v4388_v29  ;;  %v4508_v46 = vor.u32 %v5180_v41, %v4507_v40  ;;  %v4435_v49 = vld [vmem:[#allocation5 + $0xb0] sm:$0xf]  ;;  %v4372_v56 = vor.u32 %v5146_v48, %v4371_v47 }
  0x69   : > { %1113 = vmatpush.bf16.msra.mxu1 %v4452_v33  ;;  %v4572_v50 = vor.u32 %v5196_v43, %v4571_v42  ;;  %v5162_v51 = vld [vmem:[#allocation5 + $0xb4] sm:$0xf0]  ;;  %v4499_v52 = vld [vmem:[#allocation5 + $0x130] sm:$0xf]  ;;  %v4363_v59 = vld [vmem:[#allocation5 + $0x20] sm:$0xf] }
  0x6a   : > { %1162 = vmatpush.bf16.msra.mxu2 %v4516_v34  ;;  %v5178_v53 = vld [vmem:[#allocation5 + $0x134] sm:$0xf0]  ;;  %v4563_v54 = vld [vmem:[#allocation5 + $0x1b0] sm:$0xf]  ;;  %v4436_v57 = vor.u32 %v5162_v51, %v4435_v49  ;;  %v5144_v60 = vld [vmem:[#allocation5 + $0x24] sm:$0xf0] }
  0x6b   : > { %1211 = vmatpush.bf16.msra.mxu3 %v4580_v38  ;;  %v5194_v55 = vld [vmem:[#allocation5 + $0x1b4] sm:$0xf0]  ;;  %v4500_v58 = vor.u32 %v5178_v53, %v4499_v52  ;;  %v4427_v61 = vld [vmem:[#allocation5 + $0xa0] sm:$0xf]  ;;  %v5160_v63 = vld [vmem:[#allocation5 + $0xa4] sm:$0xf0]  ;;  %v4364_v4 = vor.u32 %v5144_v60, %v4363_v59 }
  0x6c   : > { %1065 = vmatpush.bf16.msra.mxu0 %v4380_v44  ;;  %v4564_v62 = vor.u32 %v5194_v55, %v4563_v54  ;;  %v4491_v0 = vld [vmem:[#allocation5 + $0x120] sm:$0xf]  ;;  %v5176_v1 = vld [vmem:[#allocation5 + $0x124] sm:$0xf0]  ;;  %v4428_v5 = vor.u32 %v5160_v63, %v4427_v61  ;;  %v4355_v7 = vld [vmem:[#allocation5 + $0x10] sm:$0xf] }
  0x6d   : > { %1114 = vmatpush.bf16.msra.mxu1 %v4444_v45  ;;  %v4555_v2 = vld [vmem:[#allocation5 + $0x1a0] sm:$0xf]  ;;  %v5192_v3 = vld [vmem:[#allocation5 + $0x1a4] sm:$0xf0]  ;;  %v4492_v6 = vor.u32 %v5176_v1, %v4491_v0  ;;  %v5142_v8 = vld [vmem:[#allocation5 + $0x14] sm:$0xf0] }
  0x6e   : > { %1163 = vmatpush.bf16.msra.mxu2 %v4508_v46  ;;  %v4419_v9 = vld [vmem:[#allocation5 + $0x90] sm:$0xf]  ;;  %v4556_v10 = vor.u32 %v5192_v3, %v4555_v2  ;;  %v5158_v11 = vld [vmem:[#allocation5 + $0x94] sm:$0xf0]  ;;  %v4347_v16 = vld [vmem:[#allocation5] sm:$0xf]  ;;  %v4356_v17 = vor.u32 %v5142_v8, %v4355_v7 }
  0x6f   : > { %1212 = vmatpush.bf16.msra.mxu3 %v4572_v50  ;;  %v4483_v12 = vld [vmem:[#allocation5 + $0x110] sm:$0xf]  ;;  %v5174_v13 = vld [vmem:[#allocation5 + $0x114] sm:$0xf0]  ;;  %v5140_v18 = vld [vmem:[#allocation5 + $0x4] sm:$0xf0]  ;;  %v4420_v21 = vor.u32 %v5158_v11, %v4419_v9 }
  0x70   : > { %1066 = vmatpush.bf16.msra.mxu0 %v4372_v56  ;;  %v4547_v14 = vld [vmem:[#allocation5 + $0x190] sm:$0xf]  ;;  %v5190_v15 = vld [vmem:[#allocation5 + $0x194] sm:$0xf0]  ;;  %v4411_v19 = vld [vmem:[#allocation5 + $0x80] sm:$0xf]  ;;  %v4484_v22 = vor.u32 %v5174_v13, %v4483_v12  ;;  %v4348_v34 = vor.u32 %v5140_v18, %v4347_v16 }
  0x71   : > { %1115 = vmatpush.bf16.msra.mxu1 %v4436_v57  ;;  %v5156_v20 = vld [vmem:[#allocation5 + $0x84] sm:$0xf0]  ;;  %v4475_v23 = vld [vmem:[#allocation5 + $0x100] sm:$0xf]  ;;  %v4548_v26 = vor.u32 %v5190_v15, %v4547_v14  ;;  %v5185_v32 = vld [vmem:[#allocation5 + $0x174] sm:$0xf] }
  0x72   : > { %1164 = vmatpush.bf16.msra.mxu2 %v4500_v58  ;;  %v5172_v24 = vld [vmem:[#allocation5 + $0x104] sm:$0xf0]  ;;  %v4539_v25 = vld [vmem:[#allocation5 + $0x180] sm:$0xf]  ;;  %v4533_v33 = vld [vmem:[#allocation5 + $0x178] sm:$0xf0]  ;;  %v4412_v38 = vor.u32 %v5156_v20, %v4411_v19 }
  0x73   : > { %1213 = vmatpush.bf16.msra.mxu3 %v4564_v62  ;;  %v5188_v27 = vld [vmem:[#allocation5 + $0x184] sm:$0xf0]  ;;  %v577_v28 = vld [vmem:[%s6212_s6] sm:$0xff]  ;;  %v579_v35 = vld [vmem:[%s6212_s6 + $0x10] sm:$0xff]  ;;  %v4476_v39 = vor.u32 %v5172_v24, %v4475_v23  ;;  %v4536_v44 = vor.u32 %v5185_v32, %v4533_v33  ;;  %s4343_s2 = sshll.u32 %s6208_s28, 7  ;;  %s5323_s12 = sshll.u32 %s6065_s24, 7 }
  0x74   : > { %1067 = vmatpush.bf16.msra.mxu0 %v4364_v4  ;;  %v581_v29 = vld [vmem:[%s6212_s6 + $0x20] sm:$0xff]  ;;  %v578_v30 = vld [vmem:[%s6212_s6 + $0x8] sm:$0xff]  ;;  %v5201_v36 = vld [vmem:[#allocation5 + $0x1f4] sm:$0xf]  ;;  %v4540_v43 = vor.u32 %v5188_v27, %v4539_v25  ;;  %s6653_s25 = scalar_lea.vmem [#allocation19], %s4343_s2  ;;  %s4103_s14 = scalar_lea.hbm %s7220_s10, %s5323_s12 }
  0x75   : > { %1116 = vmatpush.bf16.msra.mxu1 %v4428_v5  ;;  %v582_v31 = vld [vmem:[%s6212_s6 + $0x28] sm:$0xff]  ;;  %v4597_v37 = vld [vmem:[#allocation5 + $0x1f8] sm:$0xf0]  ;;  %v583_v40 = vld [vmem:[%s6212_s6 + $0x30] sm:$0xff]  ;;  %v6246_v48 = vpack.c.bf16 %v581_v29, %v577_v28  ;;  %s7114_s29 = scalar_lea.vmem [#allocation20], %s4343_s2  ;;  %s4104_s30 = sshll.u32 %s6653_s25, 4  ;;  %s7119_s30 = int_to_ptr.vmem [resolvable:$true] %s4104_s30 }
  0x76   : > { %1165 = vmatpush.bf16.msra.mxu2 %v4492_v6  ;;  %v580_v41 = vld [vmem:[%s6212_s6 + $0x18] sm:$0xff]  ;;  %v5153_v45 = vld [vmem:[#allocation5 + $0x74] sm:$0xf]  ;;  %v4600_v49 = vor.u32 %v5201_v36, %v4597_v37  ;;  %v5183_v51 = vld [vmem:[#allocation5 + $0x164] sm:$0xf]  ;;  %v6248_v53 = vpack.c.bf16 %v582_v31, %v578_v30  ;;  %v6250_v54 = vpack.c.bf16 %v583_v40, %v579_v35  ;;  %s4106_s26 = sshll.u32 %s4103_s14, 4  ;;  %s4107_s26 = int_to_ptr.hbm [resolvable:$true] %s4106_s26 }
  0x77   : > { %1214 = vmatpush.bf16.msra.mxu3 %v4556_v10  ;;  %v584_v42 = vld [vmem:[%s6212_s6 + $0x38] sm:$0xff]  ;;  %v5169_v47 = vld [vmem:[#allocation5 + $0xf4] sm:$0xf]  ;;  %v4525_v52 = vld [vmem:[#allocation5 + $0x168] sm:$0xf0]  ;;  %s4087_s13 = scalar_lea.sflag [#allocation4], %s6208_s28 }
  0x78   : > { %1068 = vmatpush.bf16.msra.mxu0 %v4356_v17  ;;  %v4405_v46 = vld [vmem:[#allocation5 + $0x78] sm:$0xf0]  ;;  %v5199_v55 = vld [vmem:[#allocation5 + $0x1e4] sm:$0xf]  ;;  %v4589_v56 = vld [vmem:[#allocation5 + $0x1e8] sm:$0xf0]  ;;  %v6252_v57 = vpack.c.bf16 %v584_v42, %v580_v41  ;;  %v4528_v60 = vor.u32 %v5183_v51, %v4525_v52 }
  0x79   : > { %1117 = vmatpush.bf16.msra.mxu1 %v4420_v21  ;;  %v4469_v50 = vld [vmem:[#allocation5 + $0xf8] sm:$0xf0]  ;;  %v4408_v58 = vor.u32 %v5153_v45, %v4405_v46  ;;  %v5151_v61 = vld [vmem:[#allocation5 + $0x64] sm:$0xf]  ;;  %v4397_v62 = vld [vmem:[#allocation5 + $0x68] sm:$0xf0]  ;;  %v4592_v63 = vor.u32 %v5199_v55, %v4589_v56 }
  0x7a   : > { %1166 = vmatpush.bf16.msra.mxu2 %v4484_v22  ;;  %v4472_v59 = vor.u32 %v5169_v47, %v4469_v50  ;;  %v5167_v0 = vld [vmem:[#allocation5 + $0xe4] sm:$0xf]  ;;  %v4461_v1 = vld [vmem:[#allocation5 + $0xe8] sm:$0xf0]  ;;  %v4400_v2 = vor.u32 %v5151_v61, %v4397_v62  ;;  %v5181_v3 = vld [vmem:[#allocation5 + $0x154] sm:$0xf] }
  0x7b   : > { %1215 = vmatpush.bf16.msra.mxu3 %v4548_v26  ;;  %v4517_v4 = vld [vmem:[#allocation5 + $0x158] sm:$0xf0]  ;;  %v5149_v5 = vld [vmem:[#allocation5 + $0x54] sm:$0xf]  ;;  %v4464_v6 = vor.u32 %v5167_v0, %v4461_v1  ;;  %v585_v16 = vld [vmem:[%s6212_s6 + $0x40] sm:$0xff]  ;;  %s5857_s21 = sshra.s32 %s4107_s26, 4  ;;  %s5858_s21 = int_to_ptr.hbm [resolvable:$true] %s5857_s21 }
  0x7c   : > { %1069 = vmatpush.bf16.msra.mxu0 %v4348_v34  ;;  %v4520_v7 = vor.u32 %v5181_v3, %v4517_v4  ;;  %v4389_v8 = vld [vmem:[#allocation5 + $0x58] sm:$0xf0]  ;;  %v5197_v9 = vld [vmem:[#allocation5 + $0x1d4] sm:$0xf]  ;;  %v589_v17 = vld [vmem:[%s6212_s6 + $0x60] sm:$0xff]  ;;  %s5859_s22 = scalar_lea.hbm %s5858_s21, 128  ;;  %p5864_p13 = scmp.lt.s32.totalorder %s5858_s21, %s7220_s10 }
  0x7d   : > { %1118 = vmatpush.bf16.msra.mxu1 %v4412_v38  ;;  %v4581_v10 = vld [vmem:[#allocation5 + $0x1d8] sm:$0xf0]  ;;  %v5165_v12 = vld [vmem:[#allocation5 + $0xd4] sm:$0xf]  ;;  %v4392_v14 = vor.u32 %v5149_v5, %v4389_v8  ;;  %v586_v18 = vld [vmem:[%s6212_s6 + $0x48] sm:$0xff]  ;;  %v6266_v24 = vpack.c.bf16 %v589_v17, %v585_v16  ;;  %p5860_p1 = scmp.ne.s32.totalorder %s5858_s21, %s5859_s22 }
  0x7e   : > { %1167 = vmatpush.bf16.msra.mxu2 %v4476_v39  ;;  %v4584_v11 = vor.u32 %v5197_v9, %v4581_v10  ;;  %v4453_v13 = vld [vmem:[#allocation5 + $0xd8] sm:$0xf0]  ;;  %v590_v19 = vld [vmem:[%s6212_s6 + $0x68] sm:$0xff]  ;;  %v587_v20 = vld [vmem:[%s6212_s6 + $0x50] sm:$0xff] }
  0x7f   : > { %1216 = vmatpush.bf16.msra.mxu3 %v4540_v43  ;;  %1070 = vmatmul.bf16.vlgmr.msra.gmra.mxu0 %v6246_v48  ;;  %v4456_v15 = vor.u32 %v5165_v12, %v4453_v13  ;;  %v591_v21 = vld [vmem:[%s6212_s6 + $0x70] sm:$0xff]  ;;  %v588_v22 = vld [vmem:[%s6212_s6 + $0x58] sm:$0xff]  ;;  %v6268_v25 = vpack.c.bf16 %v590_v19, %v586_v18  ;;  %v5179_v28 = vld [vmem:[#allocation5 + $0x144] sm:$0xf]  ;;  %p5861_p3 = pnand %p5860_p1, %p6175_p0 }
  0x80   : > { %1119 = vmatmul.bf16.vlgmr.msra.gmra.mxu1 %v6248_v53  ;;  %1258 = vmatpush.bf16.msrb.mxu0 %v4408_v58  ;;  %v592_v23 = vld [vmem:[%s6212_s6 + $0x78] sm:$0xff]  ;;  %v6270_v26 = vpack.c.bf16 %v591_v21, %v587_v20  ;;  %v4509_v29 = vld [vmem:[#allocation5 + $0x148] sm:$0xf0]  ;;  %v5147_v30 = vld [vmem:[#allocation5 + $0x44] sm:$0xf] }
  0x81   : > { %1168 = vmatmul.bf16.vlgmr.msra.gmra.mxu2 %v6250_v54  ;;  %1307 = vmatpush.bf16.msrb.mxu1 %v4472_v59  ;;  %v6272_v27 = vpack.c.bf16 %v592_v23, %v588_v22  ;;  %v4512_v31 = vor.u32 %v5179_v28, %v4509_v29  ;;  %v4381_v32 = vld [vmem:[#allocation5 + $0x48] sm:$0xf0]  ;;  %v5195_v33 = vld [vmem:[#allocation5 + $0x1c4] sm:$0xf]  ;;  %v599_v45 = vld [vmem:[%s6212_s6 + $0xb0] sm:$0xff]  ;;  %p5862_p5 = pneg %p5861_p3 }
  0x82   : > { %1356 = vmatpush.bf16.msrb.mxu2 %v4536_v44  ;;  %1217 = vmatmul.bf16.vlgmr.msra.gmra.mxu3 %v6252_v57  ;;  %v4573_v34 = vld [vmem:[#allocation5 + $0x1c8] sm:$0xf0]  ;;  %v4384_v35 = vor.u32 %v5147_v30, %v4381_v32  ;;  %v5163_v37 = vld [vmem:[#allocation5 + $0xc4] sm:$0xf]  ;;  %v595_v44 = vld [vmem:[%s6212_s6 + $0x90] sm:$0xff] }
  0x83   : > { %1405 = vmatpush.bf16.msrb.mxu3 %v4600_v49  ;;  %v4576_v36 = vor.u32 %v5195_v33, %v4573_v34  ;;  %v4445_v38 = vld [vmem:[#allocation5 + $0xc8] sm:$0xf0]  ;;  %v593_v40 = vld [vmem:[%s6212_s6 + $0x80] sm:$0xff]  ;;  %v596_v46 = vld [vmem:[%s6212_s6 + $0x98] sm:$0xff]  ;;  %v6290_v51 = vpack.c.bf16 %v599_v45, %v595_v44 }
  0x84   : > { %1259 = vmatpush.bf16.msrb.mxu0 %v4400_v2  ;;  %v4448_v39 = vor.u32 %v5163_v37, %v4445_v38  ;;  %v597_v41 = vld [vmem:[%s6212_s6 + $0xa0] sm:$0xff]  ;;  %v594_v42 = vld [vmem:[%s6212_s6 + $0x88] sm:$0xff]  ;;  %v600_v47 = vld [vmem:[%s6212_s6 + $0xb8] sm:$0xff] }
  0x85   : > { %1308 = vmatpush.bf16.msrb.mxu1 %v4464_v6  ;;  %v598_v43 = vld [vmem:[%s6212_s6 + $0xa8] sm:$0xff]  ;;  %v6286_v49 = vpack.c.bf16 %v597_v41, %v593_v40  ;;  %v6292_v52 = vpack.c.bf16 %v600_v47, %v596_v46  ;;  %v5177_v55 = vld [vmem:[#allocation5 + $0x134] sm:$0xf]  ;;  %v4501_v56 = vld [vmem:[#allocation5 + $0x138] sm:$0xf0] }
  0x86   : > { %1357 = vmatpush.bf16.msrb.mxu2 %v4528_v60  ;;  %v6288_v50 = vpack.c.bf16 %v598_v43, %v594_v42  ;;  %v5145_v58 = vld [vmem:[#allocation5 + $0x34] sm:$0xf]  ;;  %v4504_v59 = vor.u32 %v5177_v55, %v4501_v56  ;;  %v4373_v60 = vld [vmem:[#allocation5 + $0x38] sm:$0xf0]  ;;  %v601_v4 = vld [vmem:[%s6212_s6 + $0xc0] sm:$0xff] }
  0x87   : > { %1406 = vmatpush.bf16.msrb.mxu3 %v4592_v63  ;;  %v5193_v61 = vld [vmem:[#allocation5 + $0x1b4] sm:$0xf]  ;;  %v4565_v62 = vld [vmem:[#allocation5 + $0x1b8] sm:$0xf0]  ;;  %v4376_v63 = vor.u32 %v5145_v58, %v4373_v60  ;;  %v605_v5 = vld [vmem:[%s6212_s6 + $0xe0] sm:$0xff] }
  0x88   : > { %1260 = vmatpush.bf16.msrb.mxu0 %v4392_v14  ;;  %v4568_v0 = vor.u32 %v5193_v61, %v4565_v62  ;;  %v5161_v1 = vld [vmem:[#allocation5 + $0xb4] sm:$0xf]  ;;  %v4437_v2 = vld [vmem:[#allocation5 + $0xb8] sm:$0xf0]  ;;  %v602_v6 = vld [vmem:[%s6212_s6 + $0xc8] sm:$0xff]  ;;  %v6306_v12 = vpack.c.bf16 %v605_v5, %v601_v4 }
  0x89   : > { %1309 = vmatpush.bf16.msrb.mxu1 %v4456_v15  ;;  %v4440_v3 = vor.u32 %v5161_v1, %v4437_v2  ;;  %v603_v8 = vld [vmem:[%s6212_s6 + $0xd0] sm:$0xff]  ;;  %v604_v10 = vld [vmem:[%s6212_s6 + $0xd8] sm:$0xff]  ;;  %v5175_v16 = vld [vmem:[#allocation5 + $0x124] sm:$0xf] }
  0x8a   : > { %1358 = vmatpush.bf16.msrb.mxu2 %v4520_v7  ;;  %v606_v7 = vld [vmem:[%s6212_s6 + $0xe8] sm:$0xff]  ;;  %v607_v9 = vld [vmem:[%s6212_s6 + $0xf0] sm:$0xff]  ;;  %v5143_v18 = vld [vmem:[#allocation5 + $0x24] sm:$0xf] }
  0x8b   : > { %1407 = vmatpush.bf16.msrb.mxu3 %v4584_v11  ;;  %v608_v11 = vld [vmem:[%s6212_s6 + $0xf8] sm:$0xff]  ;;  %v6308_v13 = vpack.c.bf16 %v606_v7, %v602_v6  ;;  %v6310_v14 = vpack.c.bf16 %v607_v9, %v603_v8  ;;  %v4493_v17 = vld [vmem:[#allocation5 + $0x128] sm:$0xf0]  ;;  %v5191_v21 = vld [vmem:[#allocation5 + $0x1a4] sm:$0xf] }
  0x8c   : > { %1261 = vmatpush.bf16.msrb.mxu0 %v4384_v35  ;;  %v6312_v15 = vpack.c.bf16 %v608_v11, %v604_v10  ;;  %v4496_v19 = vor.u32 %v5175_v16, %v4493_v17  ;;  %v4365_v20 = vld [vmem:[#allocation5 + $0x28] sm:$0xf0]  ;;  %v5159_v29 = vld [vmem:[#allocation5 + $0xa4] sm:$0xf]  ;;  %v615_v37 = vld [vmem:[%s6212_s6 + $0x130] sm:$0xff] }
  0x8d   : > { %1310 = vmatpush.bf16.msrb.mxu1 %v4448_v39  ;;  %v4557_v22 = vld [vmem:[#allocation5 + $0x1a8] sm:$0xf0]  ;;  %v4368_v23 = vor.u32 %v5143_v18, %v4365_v20  ;;  %v609_v32 = vld [vmem:[%s6212_s6 + $0x100] sm:$0xff]  ;;  %v612_v38 = vld [vmem:[%s6212_s6 + $0x118] sm:$0xff] }
  0x8e   : > { %1359 = vmatpush.bf16.msrb.mxu2 %v4512_v31  ;;  %v4560_v28 = vor.u32 %v5191_v21, %v4557_v22  ;;  %v4429_v30 = vld [vmem:[#allocation5 + $0xa8] sm:$0xf0]  ;;  %v613_v33 = vld [vmem:[%s6212_s6 + $0x120] sm:$0xff]  ;;  %v616_v39 = vld [vmem:[%s6212_s6 + $0x138] sm:$0xff] }
  0x8f   : > { %1075 = vmatmul.bf16.gmra.mxu0 %v6266_v24  ;;  %1408 = vmatpush.bf16.msrb.mxu3 %v4576_v36  ;;  %v4432_v31 = vor.u32 %v5159_v29, %v4429_v30  ;;  %v610_v34 = vld [vmem:[%s6212_s6 + $0x108] sm:$0xff]  ;;  %v611_v36 = vld [vmem:[%s6212_s6 + $0x110] sm:$0xff]  ;;  %v6326_v40 = vpack.c.bf16 %v613_v33, %v609_v32  ;;  %v6332_v43 = vpack.c.bf16 %v616_v39, %v612_v38  ;;  %v4485_v45 = vld [vmem:[#allocation5 + $0x118] sm:$0xf0] }
  0x90   : > { %1124 = vmatmul.bf16.gmra.mxu1 %v6268_v25  ;;  %1262 = vmatpush.bf16.msrb.mxu0 %v4376_v63  ;;  %v614_v35 = vld [vmem:[%s6212_s6 + $0x128] sm:$0xff]  ;;  %v6330_v42 = vpack.c.bf16 %v615_v37, %v611_v36  ;;  %v5173_v44 = vld [vmem:[#allocation5 + $0x114] sm:$0xf]  ;;  %v4357_v55 = vld [vmem:[#allocation5 + $0x18] sm:$0xf0] }
  0x91   : > { %1173 = vmatmul.bf16.gmra.mxu2 %v6270_v26  ;;  %1311 = vmatpush.bf16.msrb.mxu1 %v4440_v3  ;;  %v6328_v41 = vpack.c.bf16 %v614_v35, %v610_v34  ;;  %v5141_v46 = vld [vmem:[#allocation5 + $0x14] sm:$0xf]  ;;  %v4488_v47 = vor.u32 %v5173_v44, %v4485_v45  ;;  %v4549_v58 = vld [vmem:[#allocation5 + $0x198] sm:$0xf0]  ;;  %v621_v1 = vld [vmem:[%s6212_s6 + $0x160] sm:$0xff] }
  0x92   : > { %1222 = vmatmul.bf16.gmra.mxu3 %v6272_v27  ;;  %1360 = vmatpush.bf16.msrb.mxu2 %v4504_v59  ;;  %v5189_v56 = vld [vmem:[#allocation5 + $0x194] sm:$0xf]  ;;  %v4360_v59 = vor.u32 %v5141_v46, %v4357_v55  ;;  %v4421_v62 = vld [vmem:[#allocation5 + $0x98] sm:$0xf0]  ;;  %v618_v2 = vld [vmem:[%s6212_s6 + $0x148] sm:$0xff] }
  0x93   : > { %1409 = vmatpush.bf16.msrb.mxu3 %v4568_v0  ;;  %v4552_v60 = vor.u32 %v5189_v56, %v4549_v58  ;;  %v5157_v61 = vld [vmem:[#allocation5 + $0x94] sm:$0xf]  ;;  %v617_v0 = vld [vmem:[%s6212_s6 + $0x140] sm:$0xff]  ;;  %v622_v3 = vld [vmem:[%s6212_s6 + $0x168] sm:$0xff] }
  0x94   : > { %1263 = vmatpush.bf16.msrb.mxu0 %v4368_v23  ;;  %v4424_v63 = vor.u32 %v5157_v61, %v4421_v62  ;;  %v619_v4 = vld [vmem:[%s6212_s6 + $0x150] sm:$0xff]  ;;  %v620_v6 = vld [vmem:[%s6212_s6 + $0x158] sm:$0xff]  ;;  %v6346_v8 = vpack.c.bf16 %v621_v1, %v617_v0  ;;  %v6348_v9 = vpack.c.bf16 %v622_v3, %v618_v2  ;;  %v5171_v16 = vld [vmem:[#allocation5 + $0x104] sm:$0xf] }
  0x95   : > { %1312 = vmatpush.bf16.msrb.mxu1 %v4432_v31  ;;  %v623_v5 = vld [vmem:[%s6212_s6 + $0x170] sm:$0xff]  ;;  %v624_v7 = vld [vmem:[%s6212_s6 + $0x178] sm:$0xff]  ;;  %v4477_v17 = vld [vmem:[#allocation5 + $0x108] sm:$0xf0] }
  0x96   : > { %1361 = vmatpush.bf16.msrb.mxu2 %v4496_v19  ;;  %v6350_v10 = vpack.c.bf16 %v623_v5, %v619_v4  ;;  %v6352_v11 = vpack.c.bf16 %v624_v7, %v620_v6  ;;  %v5139_v18 = vld [vmem:[#allocation5 + $0x4] sm:$0xf]  ;;  %v4480_v19 = vor.u32 %v5171_v16, %v4477_v17  ;;  %v4349_v20 = vld [vmem:[#allocation5 + $0x8] sm:$0xf0]  ;;  %v627_v36 = vld [vmem:[%s6212_s6 + $0x190] sm:$0xff] }
  0x97   : > { %1410 = vmatpush.bf16.msrb.mxu3 %v4560_v28  ;;  %v5187_v21 = vld [vmem:[#allocation5 + $0x184] sm:$0xf]  ;;  %v4541_v22 = vld [vmem:[#allocation5 + $0x188] sm:$0xf0]  ;;  %v4352_v23 = vor.u32 %v5139_v18, %v4349_v20  ;;  %v631_v37 = vld [vmem:[%s6212_s6 + $0x1b0] sm:$0xff] }
  0x98   : > { %1264 = vmatpush.bf16.msrb.mxu0 %v4360_v59  ;;  %v4544_v28 = vor.u32 %v5187_v21, %v4541_v22  ;;  %v5155_v29 = vld [vmem:[#allocation5 + $0x84] sm:$0xf]  ;;  %v4413_v30 = vld [vmem:[#allocation5 + $0x88] sm:$0xf0]  ;;  %v628_v38 = vld [vmem:[%s6212_s6 + $0x198] sm:$0xff]  ;;  %v6370_v46 = vpack.c.bf16 %v631_v37, %v627_v36 }
  0x99   : > { %1313 = vmatpush.bf16.msrb.mxu1 %v4424_v63  ;;  %v4416_v31 = vor.u32 %v5155_v29, %v4413_v30  ;;  %v625_v32 = vld [vmem:[%s6212_s6 + $0x180] sm:$0xff]  ;;  %v626_v34 = vld [vmem:[%s6212_s6 + $0x188] sm:$0xff]  ;;  %v632_v39 = vld [vmem:[%s6212_s6 + $0x1b8] sm:$0xff] }
  0x9a   : > { %1362 = vmatpush.bf16.msrb.mxu2 %v4488_v47  ;;  %v629_v33 = vld [vmem:[%s6212_s6 + $0x1a0] sm:$0xff]  ;;  %v630_v35 = vld [vmem:[%s6212_s6 + $0x1a8] sm:$0xff]  ;;  %v6372_v47 = vpack.c.bf16 %v632_v39, %v628_v38  ;;  %v639_v61 = vld [vmem:[%s6212_s6 + $0x1f0] sm:$0xff] }
  0x9b   : > { %1411 = vmatpush.bf16.msrb.mxu3 %v4552_v60  ;;  %v6366_v44 = vpack.c.bf16 %v629_v33, %v625_v32  ;;  %v6368_v45 = vpack.c.bf16 %v630_v35, %v626_v34  ;;  %v633_v55 = vld [vmem:[%s6212_s6 + $0x1c0] sm:$0xff]  ;;  %v634_v58 = vld [vmem:[%s6212_s6 + $0x1c8] sm:$0xff]  ;;  %v635_v60 = vld [vmem:[%s6212_s6 + $0x1d0] sm:$0xff] }
  0x9c   : > { %1265 = vmatpush.bf16.msrb.mxu0 %v4352_v23  ;;  %v637_v56 = vld [vmem:[%s6212_s6 + $0x1e0] sm:$0xff]  ;;  %v638_v59 = vld [vmem:[%s6212_s6 + $0x1e8] sm:$0xff]  ;;  %v636_v62 = vld [vmem:[%s6212_s6 + $0x1d8] sm:$0xff]  ;;  %v6390_v2 = vpack.c.bf16 %v639_v61, %v635_v60 }
  0x9d   : > { %1314 = vmatpush.bf16.msrb.mxu1 %v4416_v31  ;;  %v640_v63 = vld [vmem:[%s6212_s6 + $0x1f8] sm:$0xff]  ;;  %v6386_v0 = vpack.c.bf16 %v637_v56, %v633_v55  ;;  %v6388_v1 = vpack.c.bf16 %v638_v59, %v634_v58  ;;  %v5217_v4 = vld [vmem:[#allocation7 + $0x74] sm:$0xf]  ;;  %v6398_v7 = vld [vmem:[#allocation17] sm:$0x3]  ;;  %s5863_s6 = scalar_lea.hbm %s7220_s10, 256 }
  0x9e   : > { %1363 = vmatpush.bf16.msrb.mxu2 %v4480_v19  ;;  %v6392_v3 = vpack.c.bf16 %v640_v63, %v636_v62  ;;  %v4661_v5 = vld [vmem:[#allocation7 + $0x78] sm:$0xf0]  ;;  %v6401_v16 = vperm.slane %v6398_v7, 0  ;;  %v5233_v17 = vld [vmem:[#allocation7 + $0xf4] sm:$0xf]  ;;  %p5865_p7 = scmp.lt.s32.totalorder %s5863_s6, %s5859_s22 }
  0x9f   : > { %1080 = vmatmul.bf16.gmra.mxu0 %v6286_v49  ;;  %1412 = vmatpush.bf16.msrb.mxu3 %v4544_v28  ;;  %v4664_v6 = vor.u32 %v5217_v4, %v4661_v5  ;;  %v4725_v18 = vld [vmem:[#allocation7 + $0xf8] sm:$0xf0]  ;;  %v4659_v19 = vld [vmem:[#allocation7 + $0x70] sm:$0xf]  ;;  %v5218_v21 = vld [vmem:[#allocation7 + $0x74] sm:$0xf0] }
  0xa0   : > { %1129 = vmatmul.bf16.gmra.mxu1 %v6288_v50  ;;  %v4728_v20 = vor.u32 %v5233_v17, %v4725_v18  ;;  %v4723_v22 = vld [vmem:[#allocation7 + $0xf0] sm:$0xf]  ;;  %v5234_v23 = vld [vmem:[#allocation7 + $0xf4] sm:$0xf0]  ;;  %v4660_v28 = vor.u32 %v5218_v21, %v4659_v19  ;;  %v5215_v34 = vld [vmem:[#allocation7 + $0x64] sm:$0xf]  ;;  %p5866_p8 = por %p5865_p7, %p5864_p13 }
  0xa1   : > { %1178 = vmatmul.bf16.gmra.mxu2 %v6290_v51  ;;  %v4724_v29 = vor.u32 %v5234_v23, %v4723_v22  ;;  %v4653_v35 = vld [vmem:[#allocation7 + $0x68] sm:$0xf0]  ;;  %v4651_v62 = vld [vmem:[#allocation7 + $0x60] sm:$0xf]  ;;  %v5232_v4 = vld [vmem:[#allocation7 + $0xe4] sm:$0xf0] }
  0xa2   : > { %1227 = vmatmul.bf16.gmra.mxu3 %v6292_v52  ;;  %1797 = vmatpush.bf16.msra.mxu2 %v4664_v6  ;;  %v4656_v36 = vor.u32 %v5215_v34, %v4653_v35  ;;  %v4717_v61 = vld [vmem:[#allocation7 + $0xe8] sm:$0xf0]  ;;  %v4715_v63 = vld [vmem:[#allocation7 + $0xe0] sm:$0xf]  ;;  %p5867_p9 = pnand %p5866_p8, %p5862_p5 }
  0xa3   : > { %1846 = vmatpush.bf16.msra.mxu3 %v4728_v20  ;;  %1699 = vmatpush.bf16.msra.mxu0 %v4660_v28  ;;  %v4716_v6 = vor.u32 %v5232_v4, %v4715_v63 }
  0xa4   : > { %1748 = vmatpush.bf16.msra.mxu1 %v4724_v29 }
  0xa6   : > { %1798 = vmatpush.bf16.msra.mxu2 %v4656_v36 }
  0xa8   : > { %1749 = vmatpush.bf16.msra.mxu1 %v4716_v6 }
  0xaf   : > { %1085 = vmatmul.bf16.gmra.mxu0 %v6306_v12 }
  0xb0   : > { %1134 = vmatmul.bf16.gmra.mxu1 %v6308_v13 }
  0xb1   : > { %1183 = vmatmul.bf16.gmra.mxu2 %v6310_v14 }
  0xb2   : > { %1232 = vmatmul.bf16.gmra.mxu3 %v6312_v15 }
  0xbf   : > { %1090 = vmatmul.bf16.gmra.mxu0 %v6326_v40 }
  0xc0   : > { %1139 = vmatmul.bf16.gmra.mxu1 %v6328_v41 }
  0xc1   : > { %1188 = vmatmul.bf16.gmra.mxu2 %v6330_v42 }
  0xc2   : > { %1237 = vmatmul.bf16.gmra.mxu3 %v6332_v43 }
  0xcf   : > { %1095 = vmatmul.bf16.gmra.mxu0 %v6346_v8 }
  0xd0   : > { %1144 = vmatmul.bf16.gmra.mxu1 %v6348_v9 }
  0xd1   : > { %1193 = vmatmul.bf16.gmra.mxu2 %v6350_v10 }
  0xd2   : > { %1242 = vmatmul.bf16.gmra.mxu3 %v6352_v11 }
  0xdf   : > { %1100 = vmatmul.bf16.gmra.mxu0 %v6366_v44 }
  0xe0   : > { %1149 = vmatmul.bf16.gmra.mxu1 %v6368_v45 }
  0xe1   : > { %1198 = vmatmul.bf16.gmra.mxu2 %v6370_v46 }
  0xe2   : > { %1247 = vmatmul.bf16.gmra.mxu3 %v6372_v47 }
  0xef   : > { %1105 = vmatmul.bf16.gmra.mxu0 %v6386_v0 }
  0xf0   : > { %1154 = vmatmul.bf16.gmra.mxu1 %v6388_v1 }
  0xf1   : > { %1203 = vmatmul.bf16.gmra.mxu2 %v6390_v2 }
  0xf2   : > { %1252 = vmatmul.bf16.gmra.mxu3 %v6392_v3 }
  0xfc   : > { %v1071_v30 = vpop.f32.mrf.mxu0 }
  0xfd   : > { %v1072_v31 = vadd.f32 %v1071_v30, %v6401_v16  ;;  %v1120_v32 = vpop.f32.mrf.mxu1  ;;  %v5213_v30 = vld [vmem:[#allocation7 + $0x54] sm:$0xf] }
  0xff   : > { %v1121_v33 = vadd.f32 %v1120_v32, %v1072_v31  ;;  %1266 = vmatmul.bf16.vlgmr.msrb.gmra.mxu0 %v6246_v48  ;;  %v5231_v48 = vld [vmem:[#allocation7 + $0xe4] sm:$0xf]  ;;  %v4645_v31 = vld [vmem:[#allocation7 + $0x58] sm:$0xf0] }
 0x100   : > { %1315 = vmatmul.bf16.vlgmr.msrb.gmra.mxu1 %v6248_v53  ;;  %v4720_v53 = vor.u32 %v5231_v48, %v4717_v61  ;;  %v5230_v48 = vld [vmem:[#allocation7 + $0xd4] sm:$0xf0] }
 0x101   : > { %1364 = vmatmul.bf16.vlgmr.msrb.gmra.mxu2 %v6250_v54  ;;  %v5216_v54 = vld [vmem:[#allocation7 + $0x64] sm:$0xf0] }
 0x102   : > { %1413 = vmatmul.bf16.vlgmr.msrb.gmra.mxu3 %v6252_v57  ;;  %v4652_v57 = vor.u32 %v5216_v54, %v4651_v62 }
 0x103   : > { %1847 = vmatpush.bf16.msra.mxu3 %v4720_v53 }
 0x104   : > { %v1169_v37 = vpop.f32.mrf.mxu2  ;;  %v1073_v55 = vpop.f32.mrf.mxu0  ;;  %1700 = vmatpush.bf16.msra.mxu0 %v4652_v57 }
 0x105   : > { %v1170_v38 = vadd.f32 %v1169_v37, %v1121_v33  ;;  %v1218_v39 = vpop.f32.mrf.mxu3  ;;  %v1074_v56 = vadd.f32 %v1073_v55, %v6401_v16  ;;  %v1122_v58 = vpop.f32.mrf.mxu1  ;;  %v4648_v33 = vor.u32 %v5213_v30, %v4645_v31 }
 0x107   : > { %v1219_v59 = vadd.f32 %v1218_v39, %v1170_v38  ;;  %v1123_v60 = vadd.f32 %v1122_v58, %v1074_v56  ;;  %1799 = vmatpush.bf16.msra.mxu2 %v4648_v33  ;;  %v4709_v56 = vld [vmem:[#allocation7 + $0xd8] sm:$0xf0]  ;;  %v4643_v58 = vld [vmem:[#allocation7 + $0x50] sm:$0xf] }
 0x109   : > { %v1454_v28 = vmax.f32 %v1219_v59, 0.0  ;;  %v4707_v59 = vld [vmem:[#allocation7 + $0xd0] sm:$0xf] }
 0x10a   : > { %v4708_v53 = vor.u32 %v5230_v48, %v4707_v59 }
 0x10c   : > { %v1171_v5 = vpop.f32.mrf.mxu2  ;;  %v1076_v19 = vpop.f32.mrf.mxu0  ;;  %1750 = vmatpush.bf16.msra.mxu1 %v4708_v53  ;;  %v5209_v53 = vld [vmem:[#allocation7 + $0x34] sm:$0xf] }
 0x10d   : > { %v1172_v17 = vadd.f32 %v1171_v5, %v1123_v60  ;;  %v1220_v18 = vpop.f32.mrf.mxu3  ;;  %v1077_v20 = vadd.f32 %v1076_v19, %v6401_v16  ;;  %v1125_v21 = vpop.f32.mrf.mxu1  ;;  %v5211_v19 = vld [vmem:[#allocation7 + $0x44] sm:$0xf] }
 0x10f   : > { %v1221_v22 = vadd.f32 %v1220_v18, %v1172_v17  ;;  %v1126_v23 = vadd.f32 %v1125_v21, %v1077_v20  ;;  %1271 = vmatmul.bf16.gmra.mxu0 %v6266_v24  ;;  %v4637_v20 = vld [vmem:[#allocation7 + $0x48] sm:$0xf0] }
 0x110   : > { %1320 = vmatmul.bf16.gmra.mxu1 %v6268_v25  ;;  %v5229_v25 = vld [vmem:[#allocation7 + $0xd4] sm:$0xf]  ;;  %v4640_v21 = vor.u32 %v5211_v19, %v4637_v20  ;;  %v4693_v20 = vld [vmem:[#allocation7 + $0xb8] sm:$0xf0] }
 0x111   : > { %v1456_v29 = vmax.f32 %v1221_v22, 0.0  ;;  %1369 = vmatmul.bf16.gmra.mxu2 %v6270_v26  ;;  %v4712_v26 = vor.u32 %v5229_v25, %v4709_v56 }
 0x112   : > { %1418 = vmatmul.bf16.gmra.mxu3 %v6272_v27  ;;  %v5214_v27 = vld [vmem:[#allocation7 + $0x54] sm:$0xf0]  ;;  %1800 = vmatpush.bf16.msra.mxu2 %v4640_v21  ;;  %v4627_v21 = vld [vmem:[#allocation7 + $0x30] sm:$0xf] }
 0x113   : > { %v6414_v32 = vpack.c.bf16 %v1456_v29, %v1454_v28  ;;  %v4644_v60 = vor.u32 %v5214_v27, %v4643_v58  ;;  %1848 = vmatpush.bf16.msra.mxu3 %v4712_v26 }
 0x114   : > { %v1174_v34 = vpop.f32.mrf.mxu2  ;;  %v1078_v37 = vpop.f32.mrf.mxu0 }
 0x115   : > { %v1175_v35 = vadd.f32 %v1174_v34, %v1126_v23  ;;  %v1223_v36 = vpop.f32.mrf.mxu3  ;;  %v1079_v24 = vadd.f32 %v1078_v37, %v6401_v16  ;;  %v1127_v38 = vpop.f32.mrf.mxu1  ;;  %1701 = vmatpush.bf16.msra.mxu0 %v4644_v60  ;;  %v4699_v37 = vld [vmem:[#allocation7 + $0xc0] sm:$0xf] }
 0x117   : > { %v1224_v39 = vadd.f32 %v1223_v36, %v1175_v35  ;;  %v1128_v55 = vadd.f32 %v1127_v38, %v1079_v24  ;;  %v4701_v35 = vld [vmem:[#allocation7 + $0xc8] sm:$0xf0]  ;;  %v4635_v36 = vld [vmem:[#allocation7 + $0x40] sm:$0xf]  ;;  %v5228_v38 = vld [vmem:[#allocation7 + $0xc4] sm:$0xf0] }
 0x119   : > { %v1458_v17 = vmax.f32 %v1224_v39, 0.0 }
 0x11c   : > { %v1176_v61 = vpop.f32.mrf.mxu2  ;;  %v1081_v63 = vpop.f32.mrf.mxu0 }
 0x11d   : > { %v1177_v62 = vadd.f32 %v1176_v61, %v1128_v55  ;;  %v1225_v54 = vpop.f32.mrf.mxu3  ;;  %v1082_v57 = vadd.f32 %v1081_v63, %v6401_v16  ;;  %v1130_v4 = vpop.f32.mrf.mxu1  ;;  %v4700_v55 = vor.u32 %v5228_v38, %v4699_v37  ;;  %v4621_v38 = vld [vmem:[#allocation7 + $0x28] sm:$0xf0] }
 0x11f   : > { %v1226_v5 = vadd.f32 %v1225_v54, %v1177_v62  ;;  %v1131_v6 = vadd.f32 %v1130_v4, %v1082_v57  ;;  %1276 = vmatmul.bf16.gmra.mxu0 %v6286_v49  ;;  %1751 = vmatpush.bf16.msra.mxu1 %v4700_v55  ;;  %v4629_v62 = vld [vmem:[#allocation7 + $0x38] sm:$0xf0] }
 0x120   : > { %1325 = vmatmul.bf16.gmra.mxu1 %v6288_v50  ;;  %v5227_v50 = vld [vmem:[#allocation7 + $0xc4] sm:$0xf]  ;;  %v4632_v54 = vor.u32 %v5209_v53, %v4629_v62 }
 0x121   : > { %v1460_v18 = vmax.f32 %v1226_v5, 0.0  ;;  %1374 = vmatmul.bf16.gmra.mxu2 %v6290_v51  ;;  %v4704_v51 = vor.u32 %v5227_v50, %v4701_v35 }
 0x122   : > { %1423 = vmatmul.bf16.gmra.mxu3 %v6292_v52  ;;  %v5212_v52 = vld [vmem:[#allocation7 + $0x44] sm:$0xf0]  ;;  %1801 = vmatpush.bf16.msra.mxu2 %v4632_v54 }
 0x123   : > { %v6422_v22 = vpack.c.bf16 %v1460_v18, %v1458_v17  ;;  %v4636_v24 = vor.u32 %v5212_v52, %v4635_v36  ;;  %1849 = vmatpush.bf16.msra.mxu3 %v4704_v51  ;;  %v5224_v54 = vld [vmem:[#allocation7 + $0xa4] sm:$0xf0] }
 0x124   : > { %v1179_v23 = vpop.f32.mrf.mxu2  ;;  %v1083_v30 = vpop.f32.mrf.mxu0 }
 0x125   : > { %v1180_v28 = vadd.f32 %v1179_v23, %v1131_v6  ;;  %v1228_v29 = vpop.f32.mrf.mxu3  ;;  %v1084_v49 = vadd.f32 %v1083_v30, %v6401_v16  ;;  %v1132_v31 = vpop.f32.mrf.mxu1  ;;  %1702 = vmatpush.bf16.msra.mxu0 %v4636_v24  ;;  %v4691_v23 = vld [vmem:[#allocation7 + $0xb0] sm:$0xf]  ;;  %v5207_v24 = vld [vmem:[#allocation7 + $0x24] sm:$0xf] }
 0x127   : > { %v1229_v33 = vadd.f32 %v1228_v29, %v1180_v28  ;;  %v1133_v34 = vadd.f32 %v1132_v31, %v1084_v49  ;;  %v5226_v29 = vld [vmem:[#allocation7 + $0xb4] sm:$0xf0] }
 0x128   : > { %v4692_v49 = vor.u32 %v5226_v29, %v4691_v23 }
 0x129   : > { %v1462_v48 = vmax.f32 %v1229_v33, 0.0 }
 0x12a   : > { %1752 = vmatpush.bf16.msra.mxu1 %v4692_v49 }
 0x12c   : > { %v1181_v39 = vpop.f32.mrf.mxu2  ;;  %v1086_v26 = vpop.f32.mrf.mxu0 }
 0x12d   : > { %v1182_v25 = vadd.f32 %v1181_v39, %v1133_v34  ;;  %v1230_v56 = vpop.f32.mrf.mxu3  ;;  %v1087_v58 = vadd.f32 %v1086_v26, %v6401_v16  ;;  %v1135_v27 = vpop.f32.mrf.mxu1  ;;  %v4624_v39 = vor.u32 %v5207_v24, %v4621_v38 }
 0x12f   : > { %v1231_v59 = vadd.f32 %v1230_v56, %v1182_v25  ;;  %v1136_v60 = vadd.f32 %v1135_v27, %v1087_v58  ;;  %1281 = vmatmul.bf16.gmra.mxu0 %v6306_v12  ;;  %1802 = vmatpush.bf16.msra.mxu2 %v4624_v39  ;;  %v4603_v39 = vld [vmem:[#allocation7] sm:$0xf] }
 0x130   : > { %1330 = vmatmul.bf16.gmra.mxu1 %v6308_v13  ;;  %v5225_v13 = vld [vmem:[#allocation7 + $0xb4] sm:$0xf] }
 0x131   : > { %v1464_v61 = vmax.f32 %v1231_v59, 0.0  ;;  %1379 = vmatmul.bf16.gmra.mxu2 %v6310_v14  ;;  %v4696_v14 = vor.u32 %v5225_v13, %v4693_v20 }
 0x132   : > { %1428 = vmatmul.bf16.gmra.mxu3 %v6312_v15  ;;  %v5210_v15 = vld [vmem:[#allocation7 + $0x34] sm:$0xf0] }
 0x133   : > { %v6430_v63 = vpack.c.bf16 %v1464_v61, %v1462_v48  ;;  %v4628_v28 = vor.u32 %v5210_v15, %v4627_v21  ;;  %1850 = vmatpush.bf16.msra.mxu3 %v4696_v14  ;;  %v5208_v61 = vld [vmem:[#allocation7 + $0x24] sm:$0xf0]  ;;  %v5205_v21 = vld [vmem:[#allocation7 + $0x14] sm:$0xf]  ;;  %v4613_v15 = vld [vmem:[#allocation7 + $0x18] sm:$0xf0] }
 0x134   : > { %v1184_v57 = vpop.f32.mrf.mxu2  ;;  %v1088_v6 = vpop.f32.mrf.mxu0  ;;  %v4616_v23 = vor.u32 %v5205_v21, %v4613_v15 }
 0x135   : > { %v1185_v4 = vadd.f32 %v1184_v57, %v1136_v60  ;;  %v1233_v5 = vpop.f32.mrf.mxu3  ;;  %v1089_v12 = vadd.f32 %v1088_v6, %v6401_v16  ;;  %v1137_v17 = vpop.f32.mrf.mxu1  ;;  %1703 = vmatpush.bf16.msra.mxu0 %v4628_v28  ;;  %v5223_v60 = vld [vmem:[#allocation7 + $0xa4] sm:$0xf] }
 0x136   : > { %1803 = vmatpush.bf16.msra.mxu2 %v4616_v23 }
 0x137   : > { %v1234_v18 = vadd.f32 %v1233_v5, %v1185_v4  ;;  %v1138_v19 = vadd.f32 %v1137_v17, %v1089_v12 }
 0x139   : > { %v1466_v52 = vmax.f32 %v1234_v18, 0.0 }
 0x13c   : > { %v1186_v30 = vpop.f32.mrf.mxu2  ;;  %v1091_v34 = vpop.f32.mrf.mxu0 }
 0x13d   : > { %v1187_v31 = vadd.f32 %v1186_v30, %v1138_v19  ;;  %v1235_v33 = vpop.f32.mrf.mxu3  ;;  %v1092_v50 = vadd.f32 %v1091_v34, %v6401_v16  ;;  %v1140_v35 = vpop.f32.mrf.mxu1 }
 0x13f   : > { %v1236_v51 = vadd.f32 %v1235_v33, %v1187_v31  ;;  %v1141_v36 = vadd.f32 %v1140_v35, %v1092_v50  ;;  %1286 = vmatmul.bf16.gmra.mxu0 %v6326_v40  ;;  %v4611_v50 = vld [vmem:[#allocation7 + $0x10] sm:$0xf]  ;;  %v5221_v35 = vld [vmem:[#allocation7 + $0x94] sm:$0xf] }
 0x140   : > { %1335 = vmatmul.bf16.gmra.mxu1 %v6328_v41  ;;  %v4685_v41 = vld [vmem:[#allocation7 + $0xa8] sm:$0xf0] }
 0x141   : > { %v1468_v37 = vmax.f32 %v1236_v51, 0.0  ;;  %1384 = vmatmul.bf16.gmra.mxu2 %v6330_v42  ;;  %v4688_v48 = vor.u32 %v5223_v60, %v4685_v41  ;;  %v4619_v42 = vld [vmem:[#allocation7 + $0x20] sm:$0xf] }
 0x142   : > { %1433 = vmatmul.bf16.gmra.mxu3 %v6332_v43  ;;  %v4683_v43 = vld [vmem:[#allocation7 + $0xa0] sm:$0xf]  ;;  %v4620_v62 = vor.u32 %v5208_v61, %v4619_v42 }
 0x143   : > { %v6438_v55 = vpack.c.bf16 %v1468_v37, %v1466_v52  ;;  %1851 = vmatpush.bf16.msra.mxu3 %v4688_v48  ;;  %v4684_v4 = vor.u32 %v5224_v54, %v4683_v43  ;;  %v5222_v52 = vld [vmem:[#allocation7 + $0x94] sm:$0xf0] }
 0x144   : > { %v1189_v25 = vpop.f32.mrf.mxu2  ;;  %v1093_v58 = vpop.f32.mrf.mxu0  ;;  %1704 = vmatpush.bf16.msra.mxu0 %v4620_v62 }
 0x145   : > { %v1190_v56 = vadd.f32 %v1189_v25, %v1141_v36  ;;  %v1238_v26 = vpop.f32.mrf.mxu3  ;;  %v1142_v27 = vpop.f32.mrf.mxu1  ;;  %v1094_v59 = vadd.f32 %v1093_v58, %v6401_v16  ;;  %1753 = vmatpush.bf16.msra.mxu1 %v4684_v4  ;;  %v4675_v36 = vld [vmem:[#allocation7 + $0x90] sm:$0xf]  ;;  %v5204_v25 = vld [vmem:[#allocation7 + $0x4] sm:$0xf0] }
 0x146   : > { %v4676_v24 = vor.u32 %v5222_v52, %v4675_v36 }
 0x147   : > { %v1239_v40 = vadd.f32 %v1238_v26, %v1190_v56  ;;  %v1143_v53 = vadd.f32 %v1142_v27, %v1094_v59  ;;  %v5203_v56 = vld [vmem:[#allocation7 + $0x4] sm:$0xf]  ;;  %v4605_v59 = vld [vmem:[#allocation7 + $0x8] sm:$0xf0] }
 0x148   : > { %v4608_v48 = vor.u32 %v5203_v56, %v4605_v59 }
 0x149   : > { %v1470_v20 = vmax.f32 %v1239_v40, 0.0  ;;  %1754 = vmatpush.bf16.msra.mxu1 %v4676_v24  ;;  %v4604_v40 = vor.u32 %v5204_v25, %v4603_v39 }
 0x14a   : > { %1804 = vmatpush.bf16.msra.mxu2 %v4608_v48 }
 0x14c   : > { %v1191_v57 = vpop.f32.mrf.mxu2  ;;  %v1096_v12 = vpop.f32.mrf.mxu0 }
 0x14d   : > { %v1192_v5 = vadd.f32 %v1191_v57, %v1143_v53  ;;  %v1240_v6 = vpop.f32.mrf.mxu3  ;;  %v1097_v17 = vadd.f32 %v1096_v12, %v6401_v16  ;;  %v1145_v18 = vpop.f32.mrf.mxu1 }
 0x14f   : > { %v1241_v19 = vadd.f32 %v1240_v6, %v1192_v5  ;;  %v1146_v13 = vadd.f32 %v1145_v18, %v1097_v17  ;;  %1291 = vmatmul.bf16.gmra.mxu0 %v6346_v8  ;;  %v4669_v18 = vld [vmem:[#allocation7 + $0x88] sm:$0xf0] }
 0x150   : > { %1340 = vmatmul.bf16.gmra.mxu1 %v6348_v9  ;;  %v5206_v9 = vld [vmem:[#allocation7 + $0x14] sm:$0xf0] }
 0x151   : > { %v1472_v14 = vmax.f32 %v1241_v19, 0.0  ;;  %1389 = vmatmul.bf16.gmra.mxu2 %v6350_v10  ;;  %v4677_v10 = vld [vmem:[#allocation7 + $0x98] sm:$0xf0]  ;;  %v4612_v51 = vor.u32 %v5206_v9, %v4611_v50 }
 0x152   : > { %1438 = vmatmul.bf16.gmra.mxu3 %v6352_v11  ;;  %v4680_v11 = vor.u32 %v5221_v35, %v4677_v10 }
 0x153   : > { %v6446_v28 = vpack.c.bf16 %v1472_v14, %v1470_v20  ;;  %1705 = vmatpush.bf16.msra.mxu0 %v4612_v51  ;;  %v5220_v20 = vld [vmem:[#allocation7 + $0x84] sm:$0xf0] }
 0x154   : > { %v1194_v29 = vpop.f32.mrf.mxu2  ;;  %v1098_v31 = vpop.f32.mrf.mxu0  ;;  %1852 = vmatpush.bf16.msra.mxu3 %v4680_v11 }
 0x155   : > { %v1195_v30 = vadd.f32 %v1194_v29, %v1146_v13  ;;  %v1243_v49 = vpop.f32.mrf.mxu3  ;;  %v1147_v33 = vpop.f32.mrf.mxu1  ;;  %v1099_v34 = vadd.f32 %v1098_v31, %v6401_v16  ;;  %v4667_v13 = vld [vmem:[#allocation7 + $0x80] sm:$0xf] }
 0x156   : > { %v4668_v14 = vor.u32 %v5220_v20, %v4667_v13 }
 0x157   : > { %v1244_v8 = vadd.f32 %v1243_v49, %v1195_v30  ;;  %v1148_v37 = vadd.f32 %v1147_v33, %v1099_v34  ;;  %1706 = vmatpush.bf16.msra.mxu0 %v4604_v40 }
 0x158   : > { %1755 = vmatpush.bf16.msra.mxu1 %v4668_v14  ;;  %v5241_v14 = vld [vmem:[#allocation8 + $0x30] sm:$0xff] }
 0x159   : > { %v1474_v43 = vmax.f32 %v1244_v8, 0.0 }
 0x15c   : > { %v1196_v38 = vpop.f32.mrf.mxu2  ;;  %v1101_v27 = vpop.f32.mrf.mxu0 }
 0x15d   : > { %v1197_v26 = vadd.f32 %v1196_v38, %v1148_v37  ;;  %v1245_v58 = vpop.f32.mrf.mxu3  ;;  %v1102_v60 = vadd.f32 %v1101_v27, %v6401_v16  ;;  %v1150_v41 = vpop.f32.mrf.mxu1 }
 0x15f   : > { %v1246_v42 = vadd.f32 %v1245_v58, %v1197_v26  ;;  %v1151_v61 = vadd.f32 %v1150_v41, %v1102_v60  ;;  %1296 = vmatmul.bf16.gmra.mxu0 %v6366_v44  ;;  %v5219_v44 = vld [vmem:[#allocation7 + $0x84] sm:$0xf]  ;;  %v5242_v60 = vld [vmem:[#allocation8 + $0x38] sm:$0xff] }
 0x160   : > { %1345 = vmatmul.bf16.gmra.mxu1 %v6368_v45  ;;  %v4672_v19 = vor.u32 %v5219_v44, %v4669_v18  ;;  %v5250_v41 = vld [vmem:[#allocation8 + $0x78] sm:$0xff]  ;;  %2074 = vmatpush.bf16.msrb.mxu0 %v5242_v60 }
 0x161   : > { %v1476_v53 = vmax.f32 %v1246_v42, 0.0  ;;  %1394 = vmatmul.bf16.gmra.mxu2 %v6370_v46  ;;  %2123 = vmatpush.bf16.msrb.mxu1 %v5250_v41 }
 0x162   : > { %1443 = vmatmul.bf16.gmra.mxu3 %v6372_v47 }
 0x163   : > { %v6454_v62 = vpack.c.bf16 %v1476_v53, %v1474_v43  ;;  %1853 = vmatpush.bf16.msra.mxu3 %v4672_v19 }
 0x164   : > { %v1199_v54 = vpop.f32.mrf.mxu2  ;;  %v1103_v5 = vpop.f32.mrf.mxu0  ;;  %2075 = vmatpush.bf16.msrb.mxu0 %v5241_v14 }
 0x165   : > { %v1200_v57 = vadd.f32 %v1199_v54, %v1151_v61  ;;  %v1248_v4 = vpop.f32.mrf.mxu3  ;;  %v1152_v6 = vpop.f32.mrf.mxu1  ;;  %v1104_v17 = vadd.f32 %v1103_v5, %v6401_v16 }
 0x167   : > { %v1249_v12 = vadd.f32 %v1248_v4, %v1200_v57  ;;  %v1153_v45 = vadd.f32 %v1152_v6, %v1104_v17 }
 0x169   : > { %v1478_v31 = vmax.f32 %v1249_v12, 0.0 }
 0x16c   : > { %v1201_v46 = vpop.f32.mrf.mxu2  ;;  %v1106_v15 = vpop.f32.mrf.mxu0 }
 0x16d   : > { %v1202_v47 = vadd.f32 %v1201_v46, %v1153_v45  ;;  %v1250_v21 = vpop.f32.mrf.mxu3  ;;  %v1107_v23 = vadd.f32 %v1106_v15, %v6401_v16  ;;  %v1155_v29 = vpop.f32.mrf.mxu1  ;;  %v5249_v46 = vld [vmem:[#allocation8 + $0x70] sm:$0xff] }
 0x16e   : > { %2124 = vmatpush.bf16.msrb.mxu1 %v5249_v46 }
 0x16f   : > { %v1251_v30 = vadd.f32 %v1250_v21, %v1202_v47  ;;  %v1156_v49 = vadd.f32 %v1155_v29, %v1107_v23  ;;  %1301 = vmatmul.bf16.gmra.mxu0 %v6386_v0 }
 0x170   : > { %1350 = vmatmul.bf16.gmra.mxu1 %v6388_v1  ;;  %v6466_v1 = vperm.slane %v6398_v7, 1 }
 0x171   : > { %v1480_v33 = vmax.f32 %v1251_v30, 0.0  ;;  %1399 = vmatmul.bf16.gmra.mxu2 %v6390_v2 }
 0x172   : > { %1448 = vmatmul.bf16.gmra.mxu3 %v6392_v3 }
 0x173   : > { %v6462_v8 = vpack.c.bf16 %v1480_v33, %v1478_v31 }
 0x174   : > { %v1204_v34 = vpop.f32.mrf.mxu2  ;;  %v1108_v35 = vpop.f32.mrf.mxu0 }
 0x175   : > { %v1205_v50 = vadd.f32 %v1204_v34, %v1156_v49  ;;  %v1253_v9 = vpop.f32.mrf.mxu3  ;;  %v1157_v10 = vpop.f32.mrf.mxu1  ;;  %v1109_v11 = vadd.f32 %v1108_v35, %v6401_v16 }
 0x177   : > { %v1254_v51 = vadd.f32 %v1253_v9, %v1205_v50  ;;  %v1158_v36 = vadd.f32 %v1157_v10, %v1109_v11 }
 0x179   : > { %v1482_v38 = vmax.f32 %v1254_v51, 0.0 }
 0x17c   : > { %v1206_v0 = vpop.f32.mrf.mxu2  ;;  %v1267_v2 = vpop.f32.mrf.mxu0 }
 0x17d   : > { %v1207_v52 = vadd.f32 %v1206_v0, %v1158_v36  ;;  %v1255_v37 = vpop.f32.mrf.mxu3  ;;  %v1316_v24 = vpop.f32.mrf.mxu1  ;;  %v1268_v25 = vadd.f32 %v1267_v2, %v6466_v1 }
 0x17f   : > { %v1256_v3 = vadd.f32 %v1255_v37, %v1207_v52  ;;  %1707 = vmatmul.bf16.vlgmr.msra.gmra.mxu0 %v6414_v32  ;;  %v1317_v26 = vadd.f32 %v1316_v24, %v1268_v25  ;;  %v5240_v52 = vld [vmem:[#allocation8 + $0x28] sm:$0xff] }
 0x180   : > { %v5248_v37 = vld [vmem:[#allocation8 + $0x68] sm:$0xff]  ;;  %2076 = vmatpush.bf16.msrb.mxu0 %v5240_v52 }
 0x181   : > { %v1484_v39 = vmax.f32 %v1256_v3, 0.0  ;;  %1805 = vmatmul.bf16.vlgmr.msra.gmra.mxu2 %v6414_v32  ;;  %2125 = vmatpush.bf16.msrb.mxu1 %v5248_v37 }
 0x183   : > { %v6471_v56 = vpack.c.bf16 %v1484_v39, %v1482_v38 }
 0x184   : > { %v1365_v16 = vpop.f32.mrf.mxu2  ;;  %v1269_v27 = vpop.f32.mrf.mxu0 }
 0x185   : > { %v1414_v58 = vpop.f32.mrf.mxu3  ;;  %v1318_v40 = vpop.f32.mrf.mxu1  ;;  %v1270_v7 = vadd.f32 %v1269_v27, %v6466_v1  ;;  %v1366_v59 = vadd.f32 %v1365_v16, %v1317_v26 }
 0x187   : > { %v1319_v48 = vadd.f32 %v1318_v40, %v1270_v7  ;;  %v1415_v61 = vadd.f32 %v1414_v58, %v1366_v59 }
 0x189   : > { %v1455_v4 = vmax.f32 %v1415_v61, 0.0 }
 0x18c   : > { %v1367_v42 = vpop.f32.mrf.mxu2  ;;  %v1272_v32 = vpop.f32.mrf.mxu0 }
 0x18d   : > { %v1368_v43 = vadd.f32 %v1367_v42, %v1319_v48  ;;  %v1416_v53 = vpop.f32.mrf.mxu3  ;;  %v1321_v54 = vpop.f32.mrf.mxu1  ;;  %v1273_v6 = vadd.f32 %v1272_v32, %v6466_v1 }
 0x18f   : > { %v1417_v57 = vadd.f32 %v1416_v53, %v1368_v43  ;;  %1712 = vmatmul.bf16.gmra.mxu0 %v6422_v22  ;;  %v1322_v44 = vadd.f32 %v1321_v54, %v1273_v6  ;;  %v5239_v43 = vld [vmem:[#allocation8 + $0x20] sm:$0xff] }
 0x190   : > { %v5247_v53 = vld [vmem:[#allocation8 + $0x60] sm:$0xff]  ;;  %2077 = vmatpush.bf16.msrb.mxu0 %v5239_v43 }
 0x191   : > { %v1457_v5 = vmax.f32 %v1417_v57, 0.0  ;;  %1810 = vmatmul.bf16.gmra.mxu2 %v6422_v22  ;;  %2126 = vmatpush.bf16.msrb.mxu1 %v5247_v53  ;;  %v5244_v53 = vld [vmem:[#allocation8 + $0x48] sm:$0xff] }
 0x193   : > { %v1487_v12 = vpack.c.bf16 %v1457_v5, %v1455_v4 }
 0x194   : > { %v1370_v17 = vpop.f32.mrf.mxu2  ;;  %v1274_v19 = vpop.f32.mrf.mxu0 }
 0x195   : > { %v1419_v18 = vpop.f32.mrf.mxu3  ;;  %1756 = vmatmul.bf16.vlgmr.msra.gmra.mxu1 %v1487_v12  ;;  %1854 = vmatmul.bf16.vlgmr.msra.gmra.mxu3 %v1487_v12  ;;  %v1323_v13 = vpop.f32.mrf.mxu1  ;;  %v1275_v20 = vadd.f32 %v1274_v19, %v6466_v1  ;;  %v1371_v45 = vadd.f32 %v1370_v17, %v1322_v44 }
 0x197   : > { %v1324_v47 = vadd.f32 %v1323_v13, %v1275_v20  ;;  %v1420_v15 = vadd.f32 %v1419_v18, %v1371_v45 }
 0x199   : > { %v1459_v31 = vmax.f32 %v1420_v15, 0.0  ;;  %v5238_v15 = vld [vmem:[#allocation8 + $0x18] sm:$0xff] }
 0x19a   : > { %2078 = vmatpush.bf16.msrb.mxu0 %v5238_v15 }
 0x19c   : > { %v1372_v21 = vpop.f32.mrf.mxu2  ;;  %v1277_v29 = vpop.f32.mrf.mxu0 }
 0x19d   : > { %v1373_v23 = vadd.f32 %v1372_v21, %v1324_v47  ;;  %v1421_v22 = vpop.f32.mrf.mxu3  ;;  %v1326_v30 = vpop.f32.mrf.mxu1  ;;  %v1278_v34 = vadd.f32 %v1277_v29, %v6466_v1 }
 0x19f   : > { %v1422_v49 = vadd.f32 %v1421_v22, %v1373_v23  ;;  %1717 = vmatmul.bf16.gmra.mxu0 %v6430_v63  ;;  %v1327_v35 = vadd.f32 %v1326_v30, %v1278_v34  ;;  %v5246_v23 = vld [vmem:[#allocation8 + $0x58] sm:$0xff] }
 0x1a0   : > { %2127 = vmatpush.bf16.msrb.mxu1 %v5246_v23 }
 0x1a1   : > { %v1461_v33 = vmax.f32 %v1422_v49, 0.0  ;;  %1815 = vmatmul.bf16.gmra.mxu2 %v6430_v63 }
 0x1a3   : > { %v1489_v50 = vpack.c.bf16 %v1461_v33, %v1459_v31 }
 0x1a4   : > { %v1375_v9 = vpop.f32.mrf.mxu2  ;;  %v1279_v51 = vpop.f32.mrf.mxu0 }
 0x1a5   : > { %v1424_v10 = vpop.f32.mrf.mxu3  ;;  %1761 = vmatmul.bf16.gmra.mxu1 %v1489_v50  ;;  %1859 = vmatmul.bf16.gmra.mxu3 %v1489_v50  ;;  %v1328_v11 = vpop.f32.mrf.mxu1  ;;  %v1280_v36 = vadd.f32 %v1279_v51, %v6466_v1  ;;  %v1376_v0 = vadd.f32 %v1375_v9, %v1327_v35 }
 0x1a7   : > { %v1329_v2 = vadd.f32 %v1328_v11, %v1280_v36  ;;  %v1425_v3 = vadd.f32 %v1424_v10, %v1376_v0 }
 0x1a9   : > { %v1463_v26 = vmax.f32 %v1425_v3, 0.0  ;;  %v5245_v3 = vld [vmem:[#allocation8 + $0x50] sm:$0xff] }
 0x1aa   : > { %2128 = vmatpush.bf16.msrb.mxu1 %v5245_v3 }
 0x1ac   : > { %v1377_v24 = vpop.f32.mrf.mxu2  ;;  %v1282_v39 = vpop.f32.mrf.mxu0 }
 0x1ad   : > { %v1378_v38 = vadd.f32 %v1377_v24, %v1329_v2  ;;  %v1426_v63 = vpop.f32.mrf.mxu3  ;;  %v1331_v25 = vpop.f32.mrf.mxu1  ;;  %v1283_v27 = vadd.f32 %v1282_v39, %v6466_v1  ;;  %v5237_v24 = vld [vmem:[#allocation8 + $0x10] sm:$0xff] }
 0x1ae   : > { %2079 = vmatpush.bf16.msrb.mxu0 %v5237_v24  ;;  %2129 = vmatpush.bf16.msrb.mxu1 %v5244_v53 }
 0x1af   : > { %v1427_v16 = vadd.f32 %v1426_v63, %v1378_v38  ;;  %1722 = vmatmul.bf16.gmra.mxu0 %v6438_v55  ;;  %v1332_v59 = vadd.f32 %v1331_v25, %v1283_v27 }
 0x1b1   : > { %v1465_v58 = vmax.f32 %v1427_v16, 0.0  ;;  %1820 = vmatmul.bf16.gmra.mxu2 %v6438_v55 }
 0x1b3   : > { %v1491_v40 = vpack.c.bf16 %v1465_v58, %v1463_v26 }
 0x1b4   : > { %v1380_v7 = vpop.f32.mrf.mxu2  ;;  %v1284_v41 = vpop.f32.mrf.mxu0 }
 0x1b5   : > { %v1429_v60 = vpop.f32.mrf.mxu3  ;;  %1766 = vmatmul.bf16.gmra.mxu1 %v1491_v40  ;;  %1864 = vmatmul.bf16.gmra.mxu3 %v1491_v40  ;;  %v1333_v48 = vpop.f32.mrf.mxu1  ;;  %v1285_v42 = vadd.f32 %v1284_v41, %v6466_v1  ;;  %v1381_v61 = vadd.f32 %v1380_v7, %v1332_v59 }
 0x1b7   : > { %v1334_v32 = vadd.f32 %v1333_v48, %v1285_v42  ;;  %v1430_v57 = vadd.f32 %v1429_v60, %v1381_v61  ;;  %v5236_v61 = vld [vmem:[#allocation8 + $0x8] sm:$0xff] }
 0x1b8   : > { %2080 = vmatpush.bf16.msrb.mxu0 %v5236_v61 }
 0x1b9   : > { %v1467_v17 = vmax.f32 %v1430_v57, 0.0 }
 0x1bc   : > { %v1382_v54 = vpop.f32.mrf.mxu2  ;;  %v1287_v5 = vpop.f32.mrf.mxu0 }
 0x1bd   : > { %v1383_v4 = vadd.f32 %v1382_v54, %v1334_v32  ;;  %v1431_v55 = vpop.f32.mrf.mxu3  ;;  %v1336_v6 = vpop.f32.mrf.mxu1  ;;  %v1288_v18 = vadd.f32 %v1287_v5, %v6466_v1 }
 0x1bf   : > { %v1432_v12 = vadd.f32 %v1431_v55, %v1383_v4  ;;  %1727 = vmatmul.bf16.gmra.mxu0 %v6446_v28  ;;  %v1337_v20 = vadd.f32 %v1336_v6, %v1288_v18 }
 0x1c1   : > { %v1469_v44 = vmax.f32 %v1432_v12, 0.0  ;;  %1825 = vmatmul.bf16.gmra.mxu2 %v6446_v28 }
 0x1c3   : > { %v1493_v19 = vpack.c.bf16 %v1469_v44, %v1467_v17 }
 0x1c4   : > { %v1385_v13 = vpop.f32.mrf.mxu2  ;;  %v1289_v14 = vpop.f32.mrf.mxu0 }
 0x1c5   : > { %v1434_v45 = vpop.f32.mrf.mxu3  ;;  %1771 = vmatmul.bf16.gmra.mxu1 %v1493_v19  ;;  %1869 = vmatmul.bf16.gmra.mxu3 %v1493_v19  ;;  %v1338_v46 = vpop.f32.mrf.mxu1  ;;  %v1290_v47 = vadd.f32 %v1289_v14, %v6466_v1  ;;  %v1386_v21 = vadd.f32 %v1385_v13, %v1337_v20 }
 0x1c7   : > { %v1339_v22 = vadd.f32 %v1338_v46, %v1290_v47  ;;  %v1435_v30 = vadd.f32 %v1434_v45, %v1386_v21  ;;  %v5235_v47 = vld [vmem:[#allocation8] sm:$0xff] }
 0x1c8   : > { %v5243_v21 = vld [vmem:[#allocation8 + $0x40] sm:$0xff]  ;;  %2081 = vmatpush.bf16.msrb.mxu0 %v5235_v47 }
 0x1c9   : > { %v1471_v50 = vmax.f32 %v1435_v30, 0.0  ;;  %2130 = vmatpush.bf16.msrb.mxu1 %v5243_v21 }
 0x1cc   : > { %v1387_v29 = vpop.f32.mrf.mxu2  ;;  %v1292_v31 = vpop.f32.mrf.mxu0 }
 0x1cd   : > { %v1388_v49 = vadd.f32 %v1387_v29, %v1339_v22  ;;  %v1436_v28 = vpop.f32.mrf.mxu3  ;;  %v1341_v33 = vpop.f32.mrf.mxu1  ;;  %v1293_v35 = vadd.f32 %v1292_v31, %v6466_v1 }
 0x1cf   : > { %v1437_v34 = vadd.f32 %v1436_v28, %v1388_v49  ;;  %1732 = vmatmul.bf16.gmra.mxu0 %v6454_v62  ;;  %v1342_v11 = vadd.f32 %v1341_v33, %v1293_v35 }
 0x1d1   : > { %v1473_v9 = vmax.f32 %v1437_v34, 0.0  ;;  %1830 = vmatmul.bf16.gmra.mxu2 %v6454_v62 }
 0x1d3   : > { %v1495_v10 = vpack.c.bf16 %v1473_v9, %v1471_v50 }
 0x1d4   : > { %v1390_v51 = vpop.f32.mrf.mxu2  ;;  %v1294_v0 = vpop.f32.mrf.mxu0 }
 0x1d5   : > { %v1439_v36 = vpop.f32.mrf.mxu3  ;;  %1776 = vmatmul.bf16.gmra.mxu1 %v1495_v10  ;;  %1874 = vmatmul.bf16.gmra.mxu3 %v1495_v10  ;;  %v1343_v52 = vpop.f32.mrf.mxu1  ;;  %v1295_v37 = vadd.f32 %v1294_v0, %v6466_v1  ;;  %v1391_v2 = vadd.f32 %v1390_v51, %v1342_v11  ;;  %v570_v11 = vld [vmem:[#allocation17 + $0x2] sm:$0x3] }
 0x1d6   : > { %v6502_v0 = vperm.slane %v570_v11, 0 }
 0x1d7   : > { %v1344_v38 = vadd.f32 %v1343_v52, %v1295_v37  ;;  %v1440_v39 = vadd.f32 %v1439_v36, %v1391_v2  ;;  %v4851_v52 = vld [vmem:[#allocation10 + $0x70] sm:$0xf]  ;;  %v5266_v37 = vld [vmem:[#allocation10 + $0x74] sm:$0xf0] }
 0x1d8   : > { %v4852_v24 = vor.u32 %v5266_v37, %v4851_v52 }
 0x1d9   : > { %v1475_v27 = vmax.f32 %v1440_v39, 0.0  ;;  %v6505_v39 = vperm.slane %v570_v11, 1 }
 0x1da   : > { %2281 = vmatpush.bf16.msrb.mxu2 %v4852_v24 }
 0x1dc   : > { %v1392_v63 = vpop.f32.mrf.mxu2  ;;  %v1297_v16 = vpop.f32.mrf.mxu0 }
 0x1dd   : > { %v1393_v25 = vadd.f32 %v1392_v63, %v1344_v38  ;;  %v1441_v62 = vpop.f32.mrf.mxu3  ;;  %v1346_v26 = vpop.f32.mrf.mxu1  ;;  %v1298_v7 = vadd.f32 %v1297_v16, %v6466_v1 }
 0x1df   : > { %v1442_v58 = vadd.f32 %v1441_v62, %v1393_v25  ;;  %1737 = vmatmul.bf16.gmra.mxu0 %v6462_v8  ;;  %v1347_v41 = vadd.f32 %v1346_v26, %v1298_v7 }
 0x1e1   : > { %v1477_v40 = vmax.f32 %v1442_v58, 0.0  ;;  %1835 = vmatmul.bf16.gmra.mxu2 %v6462_v8 }
 0x1e3   : > { %v1497_v59 = vpack.c.bf16 %v1477_v40, %v1475_v27 }
 0x1e4   : > { %v1395_v60 = vpop.f32.mrf.mxu2  ;;  %v1299_v42 = vpop.f32.mrf.mxu0 }
 0x1e5   : > { %v1444_v48 = vpop.f32.mrf.mxu3  ;;  %1781 = vmatmul.bf16.gmra.mxu1 %v1497_v59  ;;  %1879 = vmatmul.bf16.gmra.mxu3 %v1497_v59  ;;  %v1348_v43 = vpop.f32.mrf.mxu1  ;;  %v1300_v32 = vadd.f32 %v1299_v42, %v6466_v1  ;;  %v1396_v54 = vadd.f32 %v1395_v60, %v1347_v41 }
 0x1e7   : > { %v1349_v57 = vadd.f32 %v1348_v43, %v1300_v32  ;;  %v1445_v55 = vadd.f32 %v1444_v48, %v1396_v54  ;;  %v4843_v54 = vld [vmem:[#allocation10 + $0x60] sm:$0xf] }
 0x1e9   : > { %v1479_v44 = vmax.f32 %v1445_v55, 0.0 }
 0x1ec   : > { %v1397_v4 = vpop.f32.mrf.mxu2  ;;  %v1302_v6 = vpop.f32.mrf.mxu0 }
 0x1ed   : > { %v1398_v5 = vadd.f32 %v1397_v4, %v1349_v57  ;;  %v1446_v8 = vpop.f32.mrf.mxu3  ;;  %v1351_v17 = vpop.f32.mrf.mxu1  ;;  %v1303_v19 = vadd.f32 %v1302_v6, %v6466_v1  ;;  %v5264_v57 = vld [vmem:[#allocation10 + $0x64] sm:$0xf0] }
 0x1ee   : > { %v4844_v55 = vor.u32 %v5264_v57, %v4843_v54 }
 0x1ef   : > { %v1447_v12 = vadd.f32 %v1446_v8, %v1398_v5  ;;  %1742 = vmatmul.bf16.gmra.mxu0 %v6471_v56  ;;  %v1352_v45 = vadd.f32 %v1351_v17, %v1303_v19 }
 0x1f0   : > { %2282 = vmatpush.bf16.msrb.mxu2 %v4844_v55 }
 0x1f1   : > { %v1481_v18 = vmax.f32 %v1447_v12, 0.0  ;;  %1840 = vmatmul.bf16.gmra.mxu2 %v6471_v56 }
 0x1f3   : > { %v1499_v13 = vpack.c.bf16 %v1481_v18, %v1479_v44 }
 0x1f4   : > { %v1400_v20 = vpop.f32.mrf.mxu2  ;;  %v1304_v46 = vpop.f32.mrf.mxu0 }
 0x1f5   : > { %v1449_v14 = vpop.f32.mrf.mxu3  ;;  %1786 = vmatmul.bf16.gmra.mxu1 %v1499_v13  ;;  %1884 = vmatmul.bf16.gmra.mxu3 %v1499_v13  ;;  %v1305_v15 = vadd.f32 %v1304_v46, %v6466_v1  ;;  %v1401_v23 = vadd.f32 %v1400_v20, %v1352_v45  ;;  %v1353_v22 = vpop.f32.mrf.mxu1 }
 0x1f7   : > { %v1354_v29 = vadd.f32 %v1353_v22, %v1305_v15  ;;  %v1450_v49 = vadd.f32 %v1449_v14, %v1401_v23 }
 0x1f9   : > { %v1483_v34 = vmax.f32 %v1450_v49, 0.0 }
 0x1fc   : > { %v1402_v30 = vpop.f32.mrf.mxu2  ;;  %v1708_v56 = vpop.f32.mrf.mxu0 }
 0x1fd   : > { %v1403_v28 = vadd.f32 %v1402_v30, %v1354_v29  ;;  %v1451_v31 = vpop.f32.mrf.mxu3  ;;  %v1709_v38 = vadd.f32 %v1708_v56, %v6502_v0  ;;  %v5262_v56 = vld [vmem:[#allocation10 + $0x54] sm:$0xf0] }
 0x1ff   : > { %v1452_v33 = vadd.f32 %v1451_v31, %v1403_v28  ;;  %v4835_v28 = vld [vmem:[#allocation10 + $0x50] sm:$0xf] }
 0x201   : > { %v1485_v50 = vmax.f32 %v1452_v33, 0.0  ;;  %v4836_v33 = vor.u32 %v5262_v56, %v4835_v28 }
 0x203   : > { %v1501_v9 = vpack.c.bf16 %v1485_v50, %v1483_v34  ;;  %2283 = vmatpush.bf16.msrb.mxu2 %v4836_v33 }
 0x204   : > { %v1806_v35 = vpop.f32.mrf.mxu2  ;;  %v1710_v10 = vpop.f32.mrf.mxu0 }
 0x205   : > { %1791 = vmatmul.bf16.gmra.mxu1 %v1501_v9  ;;  %1889 = vmatmul.bf16.gmra.mxu3 %v1501_v9  ;;  %v1711_v25 = vadd.f32 %v1710_v10, %v6502_v0  ;;  %v1807_v27 = vadd.f32 %v1806_v35, %v6505_v39 }
 0x20c   : > { %v1808_v51 = vpop.f32.mrf.mxu2  ;;  %v1713_v1 = vpop.f32.mrf.mxu0 }
 0x20d   : > { %v1809_v60 = vadd.f32 %v1808_v51, %v6505_v39  ;;  %v1714_v6 = vadd.f32 %v1713_v1, %v6502_v0 }
 0x212   : > { %v1757_v36 = vpop.f32.mrf.mxu1 }
 0x213   : > { %v1758_v62 = vadd.f32 %v1757_v36, %v1709_v38 }
 0x214   : > { %v1811_v2 = vpop.f32.mrf.mxu2  ;;  %v1715_v3 = vpop.f32.mrf.mxu0 }
 0x215   : > { %v1895_v40 = vmax.f32 %v1758_v62, 0.0  ;;  %v1716_v17 = vadd.f32 %v1715_v3, %v6502_v0  ;;  %v1812_v20 = vadd.f32 %v1811_v2, %v6505_v39 }
 0x218   : > { %v1855_v63 = vpop.f32.mrf.mxu3 }
 0x219   : > { %v1856_v41 = vadd.f32 %v1855_v63, %v1807_v27  ;;  %v4827_v27 = vld [vmem:[#allocation10 + $0x40] sm:$0xf] }
 0x21a   : > { %v1759_v16 = vpop.f32.mrf.mxu1 }
 0x21b   : > { %v1760_v26 = vadd.f32 %v1759_v16, %v1711_v25  ;;  %v1896_v53 = vmax.f32 %v1856_v41, 0.0 }
 0x21c   : > { %v1813_v58 = vpop.f32.mrf.mxu2  ;;  %v1718_v59 = vpop.f32.mrf.mxu0 }
 0x21d   : > { %v1897_v7 = vmax.f32 %v1760_v26, 0.0  ;;  %v1814_v47 = vadd.f32 %v1813_v58, %v6505_v39  ;;  %v1719_v9 = vadd.f32 %v1718_v59, %v6502_v0 }
 0x21f   : > { %v1927_v48 = vpack.c.bf16 %v1897_v7, %v1895_v40  ;;  %v5260_v40 = vld [vmem:[#allocation10 + $0x44] sm:$0xf0] }
 0x220   : > { %v1857_v42 = vpop.f32.mrf.mxu3  ;;  %v4828_v7 = vor.u32 %v5260_v40, %v4827_v27 }
 0x221   : > { %v1858_v61 = vadd.f32 %v1857_v42, %v1809_v60  ;;  %2082 = vmatmul.bf16.vlgmr.msrb.gmra.mxu0 %v1927_v48 }
 0x222   : > { %v1762_v43 = vpop.f32.mrf.mxu1  ;;  %2284 = vmatpush.bf16.msrb.mxu2 %v4828_v7 }
 0x223   : > { %v1898_v32 = vmax.f32 %v1858_v61, 0.0  ;;  %v1763_v44 = vadd.f32 %v1762_v43, %v1714_v6 }
 0x224   : > { %v1816_v4 = vpop.f32.mrf.mxu2  ;;  %v1720_v8 = vpop.f32.mrf.mxu0 }
 0x225   : > { %v1928_v5 = vpack.c.bf16 %v1898_v32, %v1896_v53  ;;  %v1899_v45 = vmax.f32 %v1763_v44, 0.0  ;;  %v1721_v10 = vadd.f32 %v1720_v8, %v6502_v0  ;;  %v1817_v52 = vadd.f32 %v1816_v4, %v6505_v39 }
 0x227   : > { %2131 = vmatmul.bf16.vlgmr.msrb.gmra.mxu1 %v1928_v5 }
 0x228   : > { %v1860_v12 = vpop.f32.mrf.mxu3 }
 0x229   : > { %v1861_v21 = vadd.f32 %v1860_v12, %v1812_v20  ;;  %v5258_v20 = vld [vmem:[#allocation10 + $0x34] sm:$0xf0] }
 0x22a   : > { %v1764_v18 = vpop.f32.mrf.mxu1 }
 0x22b   : > { %v1765_v19 = vadd.f32 %v1764_v18, %v1716_v17  ;;  %v1900_v30 = vmax.f32 %v1861_v21, 0.0 }
 0x22c   : > { %v1818_v13 = vpop.f32.mrf.mxu2  ;;  %v1723_v46 = vpop.f32.mrf.mxu0 }
 0x22d   : > { %v1901_v14 = vmax.f32 %v1765_v19, 0.0  ;;  %v1819_v24 = vadd.f32 %v1818_v13, %v6505_v39  ;;  %v1724_v41 = vadd.f32 %v1723_v46, %v6502_v0  ;;  %v4819_v13 = vld [vmem:[#allocation10 + $0x30] sm:$0xf] }
 0x22f   : > { %v1929_v15 = vpack.c.bf16 %v1901_v14, %v1899_v45  ;;  %v4820_v14 = vor.u32 %v5258_v20, %v4819_v13 }
 0x230   : > { %v1862_v23 = vpop.f32.mrf.mxu3 }
 0x231   : > { %v1863_v22 = vadd.f32 %v1862_v23, %v1814_v47  ;;  %2087 = vmatmul.bf16.gmra.mxu0 %v1929_v15  ;;  %2285 = vmatpush.bf16.msrb.mxu2 %v4820_v14 }
 0x232   : > { %v1767_v29 = vpop.f32.mrf.mxu1 }
 0x233   : > { %v1902_v49 = vmax.f32 %v1863_v22, 0.0  ;;  %v1768_v51 = vadd.f32 %v1767_v29, %v1719_v9 }
 0x234   : > { %v1821_v31 = vpop.f32.mrf.mxu2  ;;  %v1725_v50 = vpop.f32.mrf.mxu0 }
 0x235   : > { %v1930_v34 = vpack.c.bf16 %v1902_v49, %v1900_v30  ;;  %v1903_v37 = vmax.f32 %v1768_v51, 0.0  ;;  %v1726_v42 = vadd.f32 %v1725_v50, %v6502_v0  ;;  %v1822_v54 = vadd.f32 %v1821_v31, %v6505_v39 }
 0x237   : > { %2136 = vmatmul.bf16.gmra.mxu1 %v1930_v34 }
 0x238   : > { %v1865_v35 = vpop.f32.mrf.mxu3 }
 0x239   : > { %v1866_v3 = vadd.f32 %v1865_v35, %v1817_v52 }
 0x23a   : > { %v1769_v1 = vpop.f32.mrf.mxu1 }
 0x23b   : > { %v1770_v11 = vadd.f32 %v1769_v1, %v1721_v10  ;;  %v1904_v26 = vmax.f32 %v1866_v3, 0.0 }
 0x23c   : > { %v1823_v36 = vpop.f32.mrf.mxu2  ;;  %v1728_v63 = vpop.f32.mrf.mxu0 }
 0x23d   : > { %v1905_v2 = vmax.f32 %v1770_v11, 0.0  ;;  %v1824_v55 = vadd.f32 %v1823_v36, %v6505_v39  ;;  %v1729_v47 = vadd.f32 %v1728_v63, %v6502_v0  ;;  %v4811_v11 = vld [vmem:[#allocation10 + $0x20] sm:$0xf]  ;;  %v5256_v36 = vld [vmem:[#allocation10 + $0x24] sm:$0xf0] }
 0x23f   : > { %v1931_v38 = vpack.c.bf16 %v1905_v2, %v1903_v37  ;;  %v4812_v37 = vor.u32 %v5256_v36, %v4811_v11 }
 0x240   : > { %v1867_v25 = vpop.f32.mrf.mxu3 }
 0x241   : > { %v1868_v62 = vadd.f32 %v1867_v25, %v1819_v24  ;;  %2092 = vmatmul.bf16.gmra.mxu0 %v1931_v38  ;;  %2286 = vmatpush.bf16.msrb.mxu2 %v4812_v37 }
 0x242   : > { %v1772_v16 = vpop.f32.mrf.mxu1 }
 0x243   : > { %v1906_v58 = vmax.f32 %v1868_v62, 0.0  ;;  %v1773_v61 = vadd.f32 %v1772_v16, %v1724_v41 }
 0x244   : > { %v1826_v60 = vpop.f32.mrf.mxu2  ;;  %v1730_v43 = vpop.f32.mrf.mxu0 }
 0x245   : > { %v1932_v59 = vpack.c.bf16 %v1906_v58, %v1904_v26  ;;  %v1907_v57 = vmax.f32 %v1773_v61, 0.0  ;;  %v1731_v15 = vadd.f32 %v1730_v43, %v6502_v0  ;;  %v1827_v49 = vadd.f32 %v1826_v60, %v6505_v39 }
 0x247   : > { %2141 = vmatmul.bf16.gmra.mxu1 %v1932_v59 }
 0x248   : > { %v1870_v48 = vpop.f32.mrf.mxu3 }
 0x249   : > { %v1871_v5 = vadd.f32 %v1870_v48, %v1822_v54  ;;  %v5265_v48 = vld [vmem:[#allocation10 + $0x74] sm:$0xf] }
 0x24a   : > { %v1774_v53 = vpop.f32.mrf.mxu1 }
 0x24b   : > { %v1775_v32 = vadd.f32 %v1774_v53, %v1726_v42  ;;  %v1908_v18 = vmax.f32 %v1871_v5, 0.0  ;;  %v4853_v42 = vld [vmem:[#allocation10 + $0x78] sm:$0xf0] }
 0x24c   : > { %v1828_v6 = vpop.f32.mrf.mxu2  ;;  %v1733_v45 = vpop.f32.mrf.mxu0  ;;  %v4856_v43 = vor.u32 %v5265_v48, %v4853_v42  ;;  %v5251_v48 = vld [vmem:[#allocation10 + $0x4] sm:$0xf]  ;;  %v4797_v42 = vld [vmem:[#allocation10 + $0x8] sm:$0xf0] }
 0x24d   : > { %v1909_v4 = vmax.f32 %v1775_v32, 0.0  ;;  %v1829_v33 = vadd.f32 %v1828_v6, %v6505_v39  ;;  %v1734_v24 = vadd.f32 %v1733_v45, %v6502_v0  ;;  %v4845_v6 = vld [vmem:[#allocation10 + $0x68] sm:$0xf0] }
 0x24e   : > { %2330 = vmatpush.bf16.msrb.mxu3 %v4856_v43 }
 0x24f   : > { %v1933_v8 = vpack.c.bf16 %v1909_v4, %v1907_v57  ;;  %v4803_v4 = vld [vmem:[#allocation10 + $0x10] sm:$0xf] }
 0x250   : > { %v1872_v12 = vpop.f32.mrf.mxu3 }
 0x251   : > { %v1873_v17 = vadd.f32 %v1872_v12, %v1824_v55  ;;  %2097 = vmatmul.bf16.gmra.mxu0 %v1933_v8  ;;  %v5254_v55 = vld [vmem:[#allocation10 + $0x14] sm:$0xf0]  ;;  %v5263_v8 = vld [vmem:[#allocation10 + $0x64] sm:$0xf] }
 0x252   : > { %v1777_v44 = vpop.f32.mrf.mxu1  ;;  %v4804_v5 = vor.u32 %v5254_v55, %v4803_v4 }
 0x253   : > { %v1910_v19 = vmax.f32 %v1873_v17, 0.0  ;;  %v1778_v23 = vadd.f32 %v1777_v44, %v1729_v47  ;;  %v4848_v17 = vor.u32 %v5263_v8, %v4845_v6 }
 0x254   : > { %v1831_v22 = vpop.f32.mrf.mxu2  ;;  %v1735_v31 = vpop.f32.mrf.mxu0  ;;  %2287 = vmatpush.bf16.msrb.mxu2 %v4804_v5 }
 0x255   : > { %v1934_v46 = vpack.c.bf16 %v1910_v19, %v1908_v18  ;;  %v1911_v28 = vmax.f32 %v1778_v23, 0.0  ;;  %v1736_v63 = vadd.f32 %v1735_v31, %v6502_v0  ;;  %v1832_v26 = vadd.f32 %v1831_v22, %v6505_v39  ;;  %2331 = vmatpush.bf16.msrb.mxu3 %v4848_v17  ;;  %v5261_v18 = vld [vmem:[#allocation10 + $0x54] sm:$0xf]  ;;  %v4837_v19 = vld [vmem:[#allocation10 + $0x58] sm:$0xf0] }
 0x256   : > { %v4840_v45 = vor.u32 %v5261_v18, %v4837_v19  ;;  %v5259_v23 = vld [vmem:[#allocation10 + $0x44] sm:$0xf]  ;;  %v4829_v22 = vld [vmem:[#allocation10 + $0x48] sm:$0xf0] }
 0x257   : > { %2146 = vmatmul.bf16.gmra.mxu1 %v1934_v46 }
 0x258   : > { %v1875_v21 = vpop.f32.mrf.mxu3 }
 0x259   : > { %v1876_v34 = vadd.f32 %v1875_v21, %v1827_v49  ;;  %2332 = vmatpush.bf16.msrb.mxu3 %v4840_v45 }
 0x25a   : > { %v1779_v29 = vpop.f32.mrf.mxu1 }
 0x25b   : > { %v1780_v30 = vadd.f32 %v1779_v29, %v1731_v15  ;;  %v1912_v51 = vmax.f32 %v1876_v34, 0.0  ;;  %v4795_v34 = vld [vmem:[#allocation10] sm:$0xf] }
 0x25c   : > { %v1833_v52 = vpop.f32.mrf.mxu2  ;;  %v1738_v3 = vpop.f32.mrf.mxu0 }
 0x25d   : > { %v1913_v56 = vmax.f32 %v1780_v30, 0.0  ;;  %v1834_v7 = vadd.f32 %v1833_v52, %v6505_v39  ;;  %v1739_v44 = vadd.f32 %v1738_v3, %v6502_v0  ;;  %v4813_v3 = vld [vmem:[#allocation10 + $0x28] sm:$0xf0] }
 0x25f   : > { %v1935_v50 = vpack.c.bf16 %v1913_v56, %v1911_v28  ;;  %v4832_v28 = vor.u32 %v5259_v23, %v4829_v22 }
 0x260   : > { %v1877_v9 = vpop.f32.mrf.mxu3 }
 0x261   : > { %v1878_v35 = vadd.f32 %v1877_v9, %v1829_v33  ;;  %2102 = vmatmul.bf16.gmra.mxu0 %v1935_v50  ;;  %2333 = vmatpush.bf16.msrb.mxu3 %v4832_v28  ;;  %v5252_v50 = vld [vmem:[#allocation10 + $0x4] sm:$0xf0]  ;;  %v5257_v9 = vld [vmem:[#allocation10 + $0x34] sm:$0xf] }
 0x262   : > { %v1782_v10 = vpop.f32.mrf.mxu1 }
 0x263   : > { %v1914_v1 = vmax.f32 %v1878_v35, 0.0  ;;  %v1783_v25 = vadd.f32 %v1782_v10, %v1734_v24  ;;  %v4796_v10 = vor.u32 %v5252_v50, %v4795_v34  ;;  %v5255_v24 = vld [vmem:[#allocation10 + $0x24] sm:$0xf] }
 0x264   : > { %v1836_v40 = vpop.f32.mrf.mxu2  ;;  %v1740_v53 = vpop.f32.mrf.mxu0  ;;  %v5287_v34 = vld [vmem:[#allocation13 + $0x20] sm:$0xff] }
 0x265   : > { %v1936_v2 = vpack.c.bf16 %v1914_v1, %v1912_v51  ;;  %v1915_v58 = vmax.f32 %v1783_v25, 0.0  ;;  %v1741_v14 = vadd.f32 %v1740_v53, %v6502_v0  ;;  %v1837_v29 = vadd.f32 %v1836_v40, %v6505_v39  ;;  %v4821_v51 = vld [vmem:[#allocation10 + $0x38] sm:$0xf0]  ;;  %2288 = vmatpush.bf16.msrb.mxu2 %v4796_v10 }
 0x266   : > { %v4824_v11 = vor.u32 %v5257_v9, %v4821_v51 }
 0x267   : > { %2151 = vmatmul.bf16.gmra.mxu1 %v1936_v2 }
 0x268   : > { %v1880_v38 = vpop.f32.mrf.mxu3  ;;  %2334 = vmatpush.bf16.msrb.mxu3 %v4824_v11 }
 0x269   : > { %v1881_v59 = vadd.f32 %v1880_v38, %v1832_v26  ;;  %v4805_v26 = vld [vmem:[#allocation10 + $0x18] sm:$0xf0] }
 0x26a   : > { %v1784_v62 = vpop.f32.mrf.mxu1 }
 0x26b   : > { %v1785_v16 = vadd.f32 %v1784_v62, %v1736_v63  ;;  %v1916_v54 = vmax.f32 %v1881_v59, 0.0  ;;  %v4816_v63 = vor.u32 %v5255_v24, %v4813_v3 }
 0x26c   : > { %v1838_v13 = vpop.f32.mrf.mxu2  ;;  %v1743_v15 = vpop.f32.mrf.mxu0 }
 0x26d   : > { %v1917_v27 = vmax.f32 %v1785_v16, 0.0  ;;  %v1839_v56 = vadd.f32 %v1838_v13, %v6505_v39  ;;  %v1744_v62 = vadd.f32 %v1743_v15, %v6502_v0  ;;  %2335 = vmatpush.bf16.msrb.mxu3 %v4816_v63  ;;  %v5253_v16 = vld [vmem:[#allocation10 + $0x14] sm:$0xf]  ;;  %v5288_v15 = vld [vmem:[#allocation13 + $0x28] sm:$0xff] }
 0x26f   : > { %v1937_v60 = vpack.c.bf16 %v1917_v27, %v1915_v58  ;;  %v4808_v27 = vor.u32 %v5253_v16, %v4805_v26 }
 0x270   : > { %v1882_v41 = vpop.f32.mrf.mxu3 }
 0x271   : > { %v1883_v61 = vadd.f32 %v1882_v41, %v1834_v7  ;;  %2107 = vmatmul.bf16.gmra.mxu0 %v1937_v60  ;;  %2336 = vmatpush.bf16.msrb.mxu3 %v4808_v27 }
 0x272   : > { %v1787_v32 = vpop.f32.mrf.mxu1 }
 0x273   : > { %v1918_v57 = vmax.f32 %v1883_v61, 0.0  ;;  %v1788_v46 = vadd.f32 %v1787_v32, %v1739_v44  ;;  %v4800_v32 = vor.u32 %v5251_v48, %v4797_v42  ;;  %v5289_v44 = vld [vmem:[#allocation13 + $0x30] sm:$0xff] }
 0x274   : > { %v1841_v36 = vpop.f32.mrf.mxu2  ;;  %v1745_v25 = vpop.f32.mrf.mxu0 }
 0x275   : > { %v1938_v12 = vpack.c.bf16 %v1918_v57, %v1916_v54  ;;  %v1919_v30 = vmax.f32 %v1788_v46, 0.0  ;;  %v1746_v40 = vadd.f32 %v1745_v25, %v6502_v0  ;;  %v1842_v61 = vadd.f32 %v1841_v36, %v6505_v39  ;;  %2337 = vmatpush.bf16.msrb.mxu3 %v4800_v32  ;;  %v5290_v0 = vld [vmem:[#allocation13 + $0x38] sm:$0xff] }
 0x276   : > { %2736 = vmatpush.bf16.xpose.msra.mxu2 %v5290_v0 }
 0x277   : > { %2156 = vmatmul.bf16.gmra.mxu1 %v1938_v12 }
 0x278   : > { %v1885_v20 = vpop.f32.mrf.mxu3 }
 0x279   : > { %v1886_v31 = vadd.f32 %v1885_v20, %v1837_v29  ;;  %3148 = vmatpush.bf16.msra.mxu3 %v5290_v0 }
 0x27a   : > { %v1789_v47 = vpop.f32.mrf.mxu1 }
 0x27b   : > { %v1790_v21 = vadd.f32 %v1789_v47, %v1741_v14  ;;  %v1920_v37 = vmax.f32 %v1886_v31, 0.0 }
 0x27c   : > { %v1843_v41 = vpop.f32.mrf.mxu2 }
 0x27d   : > { %v1921_v49 = vmax.f32 %v1790_v21, 0.0  ;;  %v1844_v54 = vadd.f32 %v1843_v41, %v6505_v39  ;;  %3149 = vmatpush.bf16.msra.mxu3 %v5289_v44  ;;  %v6538_v39 = vld [vmem:[#allocation17 + $0x4] ss:$0 sm:$0xff] }
 0x27e   : > { %2737 = vmatpush.bf16.xpose.msra.mxu2 %v5289_v44  ;;  %v5273_v44 = vld [vmem:[#allocation11 + $0x30] sm:$0xff] }
 0x27f   : > { %v1939_v33 = vpack.c.bf16 %v1921_v49, %v1919_v30 }
 0x280   : > { %v1887_v35 = vpop.f32.mrf.mxu3 }
 0x281   : > { %v1888_v1 = vadd.f32 %v1887_v35, %v1839_v56  ;;  %2112 = vmatmul.bf16.gmra.mxu0 %v1939_v33  ;;  %3150 = vmatpush.bf16.msra.mxu3 %v5288_v15 }
 0x282   : > { %v1792_v52 = vpop.f32.mrf.mxu1 }
 0x283   : > { %v1922_v2 = vmax.f32 %v1888_v1, 0.0  ;;  %v1793_v7 = vadd.f32 %v1792_v52, %v1744_v62 }
 0x285   : > { %v1940_v38 = vpack.c.bf16 %v1922_v2, %v1920_v37  ;;  %v1923_v43 = vmax.f32 %v1793_v7, 0.0  ;;  %3151 = vmatpush.bf16.msra.mxu3 %v5287_v34  ;;  %v5286_v37 = vld [vmem:[#allocation13 + $0x18] sm:$0xff] }
 0x286   : > { %2738 = vmatpush.bf16.xpose.msra.mxu2 %v5288_v15 }
 0x287   : > { %2161 = vmatmul.bf16.gmra.mxu1 %v1940_v38 }
 0x288   : > { %v1890_v58 = vpop.f32.mrf.mxu3 }
 0x289   : > { %v1891_v57 = vadd.f32 %v1890_v58, %v1842_v61  ;;  %3152 = vmatpush.bf16.msra.mxu3 %v5286_v37  ;;  %v5285_v58 = vld [vmem:[#allocation13 + $0x10] sm:$0xff] }
 0x28a   : > { %v1794_v59 = vpop.f32.mrf.mxu1 }
 0x28b   : > { %v1795_v60 = vadd.f32 %v1794_v59, %v1746_v40  ;;  %v1924_v8 = vmax.f32 %v1891_v57, 0.0 }
 0x28d   : > { %v1925_v53 = vmax.f32 %v1795_v60, 0.0  ;;  %3153 = vmatpush.bf16.msra.mxu3 %v5285_v58 }
 0x28e   : > { %2739 = vmatpush.bf16.xpose.msra.mxu2 %v5287_v34  ;;  %v5269_v34 = vld [vmem:[#allocation11 + $0x10] sm:$0xff] }
 0x28f   : > { %v1941_v4 = vpack.c.bf16 %v1925_v53, %v1923_v43  ;;  %v5284_v43 = vld [vmem:[#allocation13 + $0x8] sm:$0xff] }
 0x290   : > { %v1892_v55 = vpop.f32.mrf.mxu3 }
 0x291   : > { %v1893_v5 = vadd.f32 %v1892_v55, %v1844_v54  ;;  %2117 = vmatmul.bf16.gmra.mxu0 %v1941_v4  ;;  %3154 = vmatpush.bf16.msra.mxu3 %v5284_v43 }
 0x293   : > { %v1926_v6 = vmax.f32 %v1893_v5, 0.0 }
 0x295   : > { %v1942_v12 = vpack.c.bf16 %v1926_v6, %v1924_v8  ;;  %v5283_v6 = vld [vmem:[#allocation13] sm:$0xff] }
 0x296   : > { %2740 = vmatpush.bf16.xpose.msra.mxu2 %v5286_v37  ;;  %3155 = vmatpush.bf16.msra.mxu3 %v5283_v6 }
 0x297   : > { %2166 = vmatmul.bf16.gmra.mxu1 %v1942_v12  ;;  %v5274_v12 = vld [vmem:[#allocation11 + $0x38] sm:$0xff] }
 0x298   : > { %2558 = vmatpush.bf16.msra.mxu0 %v5274_v12 }
 0x29c   : > { %2559 = vmatpush.bf16.msra.mxu0 %v5273_v44 }
 0x29e   : > { %v2083_v17 = vpop.f32.mrf.mxu0  ;;  %2741 = vmatpush.bf16.xpose.msra.mxu2 %v5285_v58 }
 0x29f   : > { %v2084_v13 = vadd.f32 %v6538_v39, %v2083_v17  ;;  %v5282_v17 = vld [vmem:[#allocation11 + $0x78] sm:$0xff] }
 0x2a0   : > { %2607 = vmatpush.bf16.msra.mxu1 %v5282_v17 }
 0x2a4   : > { %v2132_v18 = vpop.f32.mrf.mxu1 }
 0x2a5   : > { %v2133_v14 = vadd.f32 %v2132_v18, %v2084_v13 }
 0x2a6   : > { %v2085_v19 = vpop.f32.mrf.mxu0  ;;  %2742 = vmatpush.bf16.xpose.msra.mxu2 %v5284_v43 }
 0x2a7   : > { %v2086_v20 = vadd.f32 %v6538_v39, %v2085_v19  ;;  %v5281_v19 = vld [vmem:[#allocation11 + $0x70] sm:$0xff] }
 0x2a8   : > { %2608 = vmatpush.bf16.msra.mxu1 %v5281_v19 }
 0x2ac   : > { %v2134_v45 = vpop.f32.mrf.mxu1 }
 0x2ad   : > { %v2135_v46 = vadd.f32 %v2134_v45, %v2086_v20  ;;  %v5272_v20 = vld [vmem:[#allocation11 + $0x28] sm:$0xff] }
 0x2ae   : > { %v2088_v47 = vpop.f32.mrf.mxu0  ;;  %2743 = vmatpush.bf16.xpose.msra.mxu2 %v5283_v6  ;;  %v5280_v45 = vld [vmem:[#allocation11 + $0x68] sm:$0xff]  ;;  %2560 = vmatpush.bf16.msra.mxu0 %v5272_v20 }
 0x2af   : > { %v6542_v21 = vpack.c.bf16 %v2135_v46, %v2133_v14  ;;  %v2089_v29 = vadd.f32 %v6538_v39, %v2088_v47  ;;  %v5271_v47 = vld [vmem:[#allocation11 + $0x20] sm:$0xff]  ;;  %2609 = vmatpush.bf16.msra.mxu1 %v5280_v45 }
 0x2b1   : > { %2289 = vmatmul.bf16.vlgmr.msrb.gmra.mxu2 %v6542_v21  ;;  %2338 = vmatmul.bf16.vlgmr.msrb.gmra.mxu3 %v6542_v21 }
 0x2b2   : > { %2561 = vmatpush.bf16.msra.mxu0 %v5271_v47 }
 0x2b4   : > { %v2137_v23 = vpop.f32.mrf.mxu1 }
 0x2b5   : > { %v2138_v28 = vadd.f32 %v2137_v23, %v2089_v29  ;;  %v5279_v23 = vld [vmem:[#allocation11 + $0x60] sm:$0xff] }
 0x2b6   : > { %v2090_v22 = vpop.f32.mrf.mxu0  ;;  %2610 = vmatpush.bf16.msra.mxu1 %v5279_v23 }
 0x2b7   : > { %v2091_v30 = vadd.f32 %v6538_v39, %v2090_v22 }
 0x2bc   : > { %v2139_v49 = vpop.f32.mrf.mxu1 }
 0x2bd   : > { %v2140_v56 = vadd.f32 %v2139_v49, %v2091_v30 }
 0x2be   : > { %v2093_v31 = vpop.f32.mrf.mxu0 }
 0x2bf   : > { %v6548_v33 = vpack.c.bf16 %v2140_v56, %v2138_v28  ;;  %v2094_v35 = vadd.f32 %v6538_v39, %v2093_v31  ;;  %v5270_v28 = vld [vmem:[#allocation11 + $0x18] sm:$0xff] }
 0x2c0   : > { %v5278_v56 = vld [vmem:[#allocation11 + $0x58] sm:$0xff]  ;;  %2562 = vmatpush.bf16.msra.mxu0 %v5270_v28 }
 0x2c1   : > { %2294 = vmatmul.bf16.gmra.mxu2 %v6548_v33  ;;  %2343 = vmatmul.bf16.gmra.mxu3 %v6548_v33 }
 0x2c2   : > { %2611 = vmatpush.bf16.msra.mxu1 %v5278_v56 }
 0x2c4   : > { %v2142_v50 = vpop.f32.mrf.mxu1  ;;  %2563 = vmatpush.bf16.msra.mxu0 %v5269_v34 }
 0x2c5   : > { %v2143_v1 = vadd.f32 %v2142_v50, %v2094_v35  ;;  %v5277_v50 = vld [vmem:[#allocation11 + $0x50] sm:$0xff] }
 0x2c6   : > { %v2095_v9 = vpop.f32.mrf.mxu0  ;;  %2612 = vmatpush.bf16.msra.mxu1 %v5277_v50 }
 0x2c7   : > { %v2096_v10 = vadd.f32 %v6538_v39, %v2095_v9 }
 0x2cc   : > { %v2144_v51 = vpop.f32.mrf.mxu1 }
 0x2cd   : > { %v2145_v11 = vadd.f32 %v2144_v51, %v2096_v10  ;;  %v5268_v51 = vld [vmem:[#allocation11 + $0x8] sm:$0xff] }
 0x2ce   : > { %v2098_v36 = vpop.f32.mrf.mxu0  ;;  %2564 = vmatpush.bf16.msra.mxu0 %v5268_v51 }
 0x2cf   : > { %v6554_v52 = vpack.c.bf16 %v2145_v11, %v2143_v1  ;;  %v2099_v3 = vadd.f32 %v6538_v39, %v2098_v36  ;;  %v5276_v1 = vld [vmem:[#allocation11 + $0x48] sm:$0xff] }
 0x2d0   : > { %2613 = vmatpush.bf16.msra.mxu1 %v5276_v1 }
 0x2d1   : > { %2299 = vmatmul.bf16.gmra.mxu2 %v6554_v52  ;;  %2348 = vmatmul.bf16.gmra.mxu3 %v6554_v52 }
 0x2d4   : > { %v2147_v2 = vpop.f32.mrf.mxu1 }
 0x2d5   : > { %v2148_v25 = vadd.f32 %v2147_v2, %v2099_v3  ;;  %v5275_v3 = vld [vmem:[#allocation11 + $0x40] sm:$0xff] }
 0x2d6   : > { %v2100_v24 = vpop.f32.mrf.mxu0  ;;  %2614 = vmatpush.bf16.msra.mxu1 %v5275_v3 }
 0x2d7   : > { %v2101_v38 = vadd.f32 %v6538_v39, %v2100_v24  ;;  %v5267_v24 = vld [vmem:[#allocation11] sm:$0xff] }
 0x2d8   : > { %2565 = vmatpush.bf16.msra.mxu0 %v5267_v24 }
 0x2dc   : > { %v2149_v63 = vpop.f32.mrf.mxu1 }
 0x2dd   : > { %v2150_v62 = vadd.f32 %v2149_v63, %v2101_v38 }
 0x2de   : > { %v2103_v16 = vpop.f32.mrf.mxu0 }
 0x2df   : > { %v6560_v26 = vpack.c.bf16 %v2150_v62, %v2148_v25  ;;  %v2104_v7 = vadd.f32 %v6538_v39, %v2103_v16 }
 0x2e1   : > { %2304 = vmatmul.bf16.gmra.mxu2 %v6560_v26  ;;  %2353 = vmatmul.bf16.gmra.mxu3 %v6560_v26 }
 0x2e4   : > { %v2152_v27 = vpop.f32.mrf.mxu1 }
 0x2e5   : > { %v2153_v41 = vadd.f32 %v2152_v27, %v2104_v7 }
 0x2e6   : > { %v2105_v40 = vpop.f32.mrf.mxu0 }
 0x2e7   : > { %v2106_v59 = vadd.f32 %v6538_v39, %v2105_v40 }
 0x2ec   : > { %v2154_v60 = vpop.f32.mrf.mxu1 }
 0x2ed   : > { %v2155_v48 = vadd.f32 %v2154_v60, %v2106_v59 }
 0x2ee   : > { %v2108_v42 = vpop.f32.mrf.mxu0 }
 0x2ef   : > { %v6566_v61 = vpack.c.bf16 %v2155_v48, %v2153_v41  ;;  %v2109_v54 = vadd.f32 %v6538_v39, %v2108_v42 }
 0x2f1   : > { %2309 = vmatmul.bf16.gmra.mxu2 %v6566_v61  ;;  %2358 = vmatmul.bf16.gmra.mxu3 %v6566_v61 }
 0x2f4   : > { %v2157_v53 = vpop.f32.mrf.mxu1 }
 0x2f5   : > { %v2158_v55 = vadd.f32 %v2157_v53, %v2109_v54 }
 0x2f6   : > { %v2110_v32 = vpop.f32.mrf.mxu0 }
 0x2f7   : > { %v2111_v57 = vadd.f32 %v6538_v39, %v2110_v32 }
 0x2fc   : > { %v2159_v4 = vpop.f32.mrf.mxu1 }
 0x2fd   : > { %v2160_v5 = vadd.f32 %v2159_v4, %v2111_v57 }
 0x2fe   : > { %v2113_v0 = vpop.f32.mrf.mxu0 }
 0x2ff   : > { %v6572_v8 = vpack.c.bf16 %v2160_v5, %v2158_v55  ;;  %v2114_v14 = vadd.f32 %v6538_v39, %v2113_v0 }
 0x301   : > { %2314 = vmatmul.bf16.gmra.mxu2 %v6572_v8  ;;  %2363 = vmatmul.bf16.gmra.mxu3 %v6572_v8 }
 0x304   : > { %v2162_v18 = vpop.f32.mrf.mxu1 }
 0x305   : > { %v2163_v22 = vadd.f32 %v2162_v18, %v2114_v14 }
 0x306   : > { %v2115_v13 = vpop.f32.mrf.mxu0 }
 0x307   : > { %v2116_v46 = vadd.f32 %v6538_v39, %v2115_v13 }
 0x30c   : > { %v2164_v15 = vpop.f32.mrf.mxu1 }
 0x30d   : > { %v2165_v29 = vadd.f32 %v2164_v15, %v2116_v46 }
 0x30e   : > { %v2118_v30 = vpop.f32.mrf.mxu0 }
 0x30f   : > { %v6578_v49 = vpack.c.bf16 %v2165_v29, %v2163_v22  ;;  %v2119_v35 = vadd.f32 %v6538_v39, %v2118_v30 }
 0x311   : > { %2319 = vmatmul.bf16.gmra.mxu2 %v6578_v49  ;;  %2368 = vmatmul.bf16.gmra.mxu3 %v6578_v49 }
 0x314   : > { %v2167_v31 = vpop.f32.mrf.mxu1 }
 0x315   : > { %v2168_v36 = vadd.f32 %v2167_v31, %v2119_v35 }
 0x316   : > { %v2120_v9 = vpop.f32.mrf.mxu0 }
 0x317   : > { %v2121_v10 = vadd.f32 %v6538_v39, %v2120_v9  ;;  %v572_v39 = vld [vmem:[#allocation17 + $0x5] sm:$0x3] }
 0x318   : > { %v6589_v25 = vperm.slane %v572_v39, 0  ;;  %v6591_v62 = vperm.slane %v572_v39, 1 }
 0x31c   : > { %v2169_v11 = vpop.f32.mrf.mxu1 }
 0x31d   : > { %v2170_v37 = vadd.f32 %v2169_v11, %v2121_v10 }
 0x31f   : > { %v6584_v2 = vpack.c.bf16 %v2170_v37, %v2168_v36 }
 0x321   : > { %2324 = vmatmul.bf16.gmra.mxu2 %v6584_v2  ;;  %2373 = vmatmul.bf16.gmra.mxu3 %v6584_v2 }
 0x331   : > { %2744 = vmatmul.bf16.vlgmr.msra.gmra.mxu2 %v6542_v21 }
 0x334   : > { %v2290_v38 = vpop.f32.mrf.mxu2  ;;  %v2339_v63 = vpop.f32.mrf.mxu3 }
 0x335   : > { %v2291_v16 = vadd.f32 %v2290_v38, %v6589_v25  ;;  %v2340_v58 = vadd.f32 %v2339_v63, %v6591_v62  ;;  %v5107_v38 = vld [vmem:[#allocation14 + $0x70] sm:$0xf]  ;;  %v5306_v63 = vld [vmem:[#allocation14 + $0x74] sm:$0xf0] }
 0x337   : > { %v2379_v60 = vmax.f32 %v2291_v16, 0.0  ;;  %v2380_v41 = vmax.f32 %v2340_v58, 0.0 }
 0x33c   : > { %v2292_v27 = vpop.f32.mrf.mxu2  ;;  %v2341_v40 = vpop.f32.mrf.mxu3 }
 0x33d   : > { %v2293_v7 = vadd.f32 %v2292_v27, %v6589_v25  ;;  %v2342_v59 = vadd.f32 %v2341_v40, %v6591_v62  ;;  %v5108_v27 = vor.u32 %v5306_v63, %v5107_v38 }
 0x33f   : > { %v2381_v48 = vmax.f32 %v2293_v7, 0.0  ;;  %v2382_v42 = vmax.f32 %v2342_v59, 0.0  ;;  %3495 = vmatpush.bf16.msrb.mxu2 %v5108_v27  ;;  %v5099_v59 = vld [vmem:[#allocation14 + $0x60] sm:$0xf] }
 0x341   : > { %v2411_v43 = vpack.c.bf16 %v2381_v48, %v2379_v60  ;;  %v2412_v53 = vpack.c.bf16 %v2382_v42, %v2380_v41  ;;  %2749 = vmatmul.bf16.gmra.mxu2 %v6548_v33  ;;  %v5304_v60 = vld [vmem:[#allocation14 + $0x64] sm:$0xf0]  ;;  %v5091_v48 = vld [vmem:[#allocation14 + $0x50] sm:$0xf]  ;;  %v5302_v42 = vld [vmem:[#allocation14 + $0x54] sm:$0xf0] }
 0x342   : > { %v5100_v41 = vor.u32 %v5304_v60, %v5099_v59 }
 0x343   : > { %2566 = vmatmul.bf16.vlgmr.msra.gmra.mxu0 %v2411_v43  ;;  %2615 = vmatmul.bf16.vlgmr.msra.gmra.mxu1 %v2412_v53  ;;  %v5092_v43 = vor.u32 %v5302_v42, %v5091_v48 }
 0x344   : > { %v2295_v32 = vpop.f32.mrf.mxu2  ;;  %v2344_v54 = vpop.f32.mrf.mxu3  ;;  %3496 = vmatpush.bf16.msrb.mxu2 %v5100_v41 }
 0x345   : > { %v2296_v57 = vadd.f32 %v2295_v32, %v6589_v25  ;;  %v2345_v4 = vadd.f32 %v2344_v54, %v6591_v62 }
 0x347   : > { %v2383_v12 = vmax.f32 %v2296_v57, 0.0  ;;  %v2384_v17 = vmax.f32 %v2345_v4, 0.0  ;;  %v5083_v4 = vld [vmem:[#allocation14 + $0x40] sm:$0xf] }
 0x348   : > { %3497 = vmatpush.bf16.msrb.mxu2 %v5092_v43 }
 0x34c   : > { %v2297_v55 = vpop.f32.mrf.mxu2  ;;  %v2346_v5 = vpop.f32.mrf.mxu3 }
 0x34d   : > { %v2298_v0 = vadd.f32 %v2297_v55, %v6589_v25  ;;  %v2347_v6 = vadd.f32 %v2346_v5, %v6591_v62  ;;  %v5300_v55 = vld [vmem:[#allocation14 + $0x44] sm:$0xf0] }
 0x34f   : > { %v2385_v44 = vmax.f32 %v2298_v0, 0.0  ;;  %v2386_v18 = vmax.f32 %v2347_v6, 0.0  ;;  %v5084_v6 = vor.u32 %v5300_v55, %v5083_v4 }
 0x351   : > { %2754 = vmatmul.bf16.gmra.mxu2 %v6554_v52  ;;  %v2413_v19 = vpack.c.bf16 %v2385_v44, %v2383_v12  ;;  %v2414_v13 = vpack.c.bf16 %v2386_v18, %v2384_v17 }
 0x352   : > { %3498 = vmatpush.bf16.msrb.mxu2 %v5084_v6 }
 0x353   : > { %2571 = vmatmul.bf16.gmra.mxu0 %v2413_v19  ;;  %2620 = vmatmul.bf16.gmra.mxu1 %v2414_v13  ;;  %v5075_v19 = vld [vmem:[#allocation14 + $0x30] sm:$0xf]  ;;  %v5298_v13 = vld [vmem:[#allocation14 + $0x34] sm:$0xf0] }
 0x354   : > { %v2300_v20 = vpop.f32.mrf.mxu2  ;;  %v2349_v45 = vpop.f32.mrf.mxu3 }
 0x355   : > { %v2301_v14 = vadd.f32 %v2300_v20, %v6589_v25  ;;  %v2350_v46 = vadd.f32 %v2349_v45, %v6591_v62 }
 0x357   : > { %v2387_v29 = vmax.f32 %v2301_v14, 0.0  ;;  %v2388_v30 = vmax.f32 %v2350_v46, 0.0  ;;  %v5076_v14 = vor.u32 %v5298_v13, %v5075_v19 }
 0x359   : > { %3499 = vmatpush.bf16.msrb.mxu2 %v5076_v14 }
 0x35c   : > { %v2302_v47 = vpop.f32.mrf.mxu2  ;;  %v2351_v15 = vpop.f32.mrf.mxu3 }
 0x35d   : > { %v2303_v23 = vadd.f32 %v2302_v47, %v6589_v25  ;;  %v2352_v22 = vadd.f32 %v2351_v15, %v6591_v62  ;;  %v5067_v15 = vld [vmem:[#allocation14 + $0x20] sm:$0xf] }
 0x35f   : > { %v2389_v28 = vmax.f32 %v2303_v23, 0.0  ;;  %v2390_v56 = vmax.f32 %v2352_v22, 0.0  ;;  %v5296_v23 = vld [vmem:[#allocation14 + $0x24] sm:$0xf0] }
 0x360   : > { %v5068_v22 = vor.u32 %v5296_v23, %v5067_v15 }
 0x361   : > { %2759 = vmatmul.bf16.gmra.mxu2 %v6560_v26  ;;  %v2415_v31 = vpack.c.bf16 %v2389_v28, %v2387_v29  ;;  %v2416_v34 = vpack.c.bf16 %v2390_v56, %v2388_v30  ;;  %v5059_v29 = vld [vmem:[#allocation14 + $0x10] sm:$0xf]  ;;  %v5294_v30 = vld [vmem:[#allocation14 + $0x14] sm:$0xf0] }
 0x362   : > { %3500 = vmatpush.bf16.msrb.mxu2 %v5068_v22  ;;  %v5060_v28 = vor.u32 %v5294_v30, %v5059_v29 }
 0x363   : > { %2576 = vmatmul.bf16.gmra.mxu0 %v2415_v31  ;;  %2625 = vmatmul.bf16.gmra.mxu1 %v2416_v34 }
 0x364   : > { %v2305_v50 = vpop.f32.mrf.mxu2  ;;  %v2354_v9 = vpop.f32.mrf.mxu3 }
 0x365   : > { %v2306_v35 = vadd.f32 %v2305_v50, %v6589_v25  ;;  %v2355_v10 = vadd.f32 %v2354_v9, %v6591_v62  ;;  %v5051_v9 = vld [vmem:[#allocation14] sm:$0xf] }
 0x366   : > { %3501 = vmatpush.bf16.msrb.mxu2 %v5060_v28 }
 0x367   : > { %v2391_v37 = vmax.f32 %v2306_v35, 0.0  ;;  %v2392_v24 = vmax.f32 %v2355_v10, 0.0  ;;  %v5292_v35 = vld [vmem:[#allocation14 + $0x4] sm:$0xf0] }
 0x36c   : > { %v2307_v51 = vpop.f32.mrf.mxu2  ;;  %v2356_v1 = vpop.f32.mrf.mxu3 }
 0x36d   : > { %v2308_v11 = vadd.f32 %v2307_v51, %v6589_v25  ;;  %v2357_v36 = vadd.f32 %v2356_v1, %v6591_v62  ;;  %v5052_v1 = vor.u32 %v5292_v35, %v5051_v9 }
 0x36f   : > { %v2393_v3 = vmax.f32 %v2308_v11, 0.0  ;;  %v2394_v39 = vmax.f32 %v2357_v36, 0.0  ;;  %3502 = vmatpush.bf16.msrb.mxu2 %v5052_v1 }
 0x371   : > { %2764 = vmatmul.bf16.gmra.mxu2 %v6566_v61  ;;  %v2417_v16 = vpack.c.bf16 %v2393_v3, %v2391_v37  ;;  %v2418_v58 = vpack.c.bf16 %v2394_v39, %v2392_v24 }
 0x373   : > { %2581 = vmatmul.bf16.gmra.mxu0 %v2417_v16  ;;  %2630 = vmatmul.bf16.gmra.mxu1 %v2418_v58 }
 0x374   : > { %v2310_v40 = vpop.f32.mrf.mxu2  ;;  %v2359_v7 = vpop.f32.mrf.mxu3 }
 0x375   : > { %v2311_v53 = vadd.f32 %v2310_v40, %v6589_v25  ;;  %v2360_v32 = vadd.f32 %v2359_v7, %v6591_v62 }
 0x377   : > { %v2395_v12 = vmax.f32 %v2311_v53, 0.0  ;;  %v2396_v17 = vmax.f32 %v2360_v32, 0.0 }
 0x37c   : > { %v2312_v54 = vpop.f32.mrf.mxu2  ;;  %v2361_v57 = vpop.f32.mrf.mxu3 }
 0x37d   : > { %v2313_v5 = vadd.f32 %v2312_v54, %v6589_v25  ;;  %v2362_v0 = vadd.f32 %v2361_v57, %v6591_v62  ;;  %v2785_v57 = vlaneseq }
 0x37f   : > { %v2397_v44 = vmax.f32 %v2313_v5, 0.0  ;;  %v2398_v18 = vmax.f32 %v2362_v0, 0.0 }
 0x381   : > { %2769 = vmatmul.bf16.gmra.mxu2 %v6572_v8  ;;  %v2419_v20 = vpack.c.bf16 %v2397_v44, %v2395_v12  ;;  %v2420_v45 = vpack.c.bf16 %v2398_v18, %v2396_v17  ;;  %v6632_v17 = vand.u32 127, %v2785_v57 }
 0x383   : > { %2586 = vmatmul.bf16.gmra.mxu0 %v2419_v20  ;;  %2635 = vmatmul.bf16.gmra.mxu1 %v2420_v45  ;;  %vm2787_vm0 = vcmp.lt.s32.totalorder %v6632_v17, 100 }
 0x384   : > { %v2315_v46 = vpop.f32.mrf.mxu2  ;;  %v2364_v47 = vpop.f32.mrf.mxu3 }
 0x385   : > { %v2316_v56 = vadd.f32 %v2315_v46, %v6589_v25  ;;  %v2365_v31 = vadd.f32 %v2364_v47, %v6591_v62  ;;  %v6645_v47 = vld [vmem:[#allocation17 + $0x7] ss:$0 sm:$0xff] }
 0x387   : > { %v2399_v11 = vmax.f32 %v2316_v56, 0.0  ;;  %v2400_v36 = vmax.f32 %v2365_v31, 0.0 }
 0x38c   : > { %v2317_v34 = vpop.f32.mrf.mxu2  ;;  %v2366_v50 = vpop.f32.mrf.mxu3 }
 0x38d   : > { %v2318_v10 = vadd.f32 %v2317_v34, %v6589_v25  ;;  %v2367_v51 = vadd.f32 %v2366_v50, %v6591_v62 }
 0x38f   : > { %v2401_v37 = vmax.f32 %v2318_v10, 0.0  ;;  %v2402_v24 = vmax.f32 %v2367_v51, 0.0 }
 0x391   : > { %2774 = vmatmul.bf16.gmra.mxu2 %v6578_v49  ;;  %v2421_v3 = vpack.c.bf16 %v2401_v37, %v2399_v11  ;;  %v2422_v39 = vpack.c.bf16 %v2402_v24, %v2400_v36 }
 0x393   : > { %2591 = vmatmul.bf16.gmra.mxu0 %v2421_v3  ;;  %2640 = vmatmul.bf16.gmra.mxu1 %v2422_v39 }
 0x394   : > { %v2320_v38 = vpop.f32.mrf.mxu2  ;;  %v2369_v63 = vpop.f32.mrf.mxu3 }
 0x395   : > { %v2321_v16 = vadd.f32 %v2320_v38, %v6589_v25  ;;  %v2370_v58 = vadd.f32 %v2369_v63, %v6591_v62 }
 0x397   : > { %v2403_v60 = vmax.f32 %v2321_v16, 0.0  ;;  %v2404_v41 = vmax.f32 %v2370_v58, 0.0 }
 0x39c   : > { %v2322_v27 = vpop.f32.mrf.mxu2  ;;  %v2371_v40 = vpop.f32.mrf.mxu3 }
 0x39d   : > { %v2323_v7 = vadd.f32 %v2322_v27, %v6589_v25  ;;  %v2372_v59 = vadd.f32 %v2371_v40, %v6591_v62 }
 0x39f   : > { %v2405_v48 = vmax.f32 %v2323_v7, 0.0  ;;  %v2406_v42 = vmax.f32 %v2372_v59, 0.0 }
 0x3a1   : > { %2779 = vmatmul.bf16.gmra.mxu2 %v6584_v2  ;;  %v2423_v43 = vpack.c.bf16 %v2405_v48, %v2403_v60  ;;  %v2424_v53 = vpack.c.bf16 %v2406_v42, %v2404_v41 }
 0x3a3   : > { %2596 = vmatmul.bf16.gmra.mxu0 %v2423_v43  ;;  %2645 = vmatmul.bf16.gmra.mxu1 %v2424_v53 }
 0x3a4   : > { %v2325_v32 = vpop.f32.mrf.mxu2  ;;  %v2374_v54 = vpop.f32.mrf.mxu3 }
 0x3a5   : > { %v2326_v4 = vadd.f32 %v2325_v32, %v6589_v25  ;;  %v2375_v55 = vadd.f32 %v2374_v54, %v6591_v62 }
 0x3a7   : > { %v2407_v44 = vmax.f32 %v2326_v4, 0.0  ;;  %v2408_v18 = vmax.f32 %v2375_v55, 0.0 }
 0x3ac   : > { %v2327_v5 = vpop.f32.mrf.mxu2  ;;  %v2376_v0 = vpop.f32.mrf.mxu3 }
 0x3ad   : > { %v2328_v6 = vadd.f32 %v2327_v5, %v6589_v25  ;;  %v2377_v12 = vadd.f32 %v2376_v0, %v6591_v62 }
 0x3af   : > { %v2409_v19 = vmax.f32 %v2328_v6, 0.0  ;;  %v2410_v13 = vmax.f32 %v2377_v12, 0.0 }
 0x3b1   : > { %3503 = vmatmul.bf16.vlgmr.msrb.gmra.mxu2 %v6542_v21  ;;  %v2425_v20 = vpack.c.bf16 %v2409_v19, %v2407_v44  ;;  %v2426_v45 = vpack.c.bf16 %v2410_v13, %v2408_v18 }
 0x3b3   : > { %2601 = vmatmul.bf16.gmra.mxu0 %v2425_v20  ;;  %2650 = vmatmul.bf16.gmra.mxu1 %v2426_v45 }
 0x3b4   : > { %v2745_v14 = vpop.f32.mrf.mxu2 }
 0x3b5   : > { %v6638_v25 = vsel %vm2787_vm0, %v2745_v14, -inf }
 0x3b6   : > { %2804 = vmax.xlane.f32.xlu0 %v6638_v25 }
 0x3bc   : > { %v2747_v62 = vpop.f32.mrf.mxu2 }
 0x3bd   : > { %v6643_v46 = vsel %vm2787_vm0, %v2747_v62, -inf }
 0x3be   : > { %2806 = vmax.xlane.f32.xlu0 %v6643_v46 }
 0x3c0   : > { %v2567_v15 = vpop.f32.mrf.mxu0  ;;  %v2616_v23 = vpop.f32.mrf.mxu1 }
 0x3c1   : > { %v2568_v22 = vadd.f32 %v6645_v47, %v2567_v15  ;;  %3508 = vmatmul.bf16.gmra.mxu2 %v6548_v33 }
 0x3c3   : > { %v2617_v29 = vadd.f32 %v2616_v23, %v2568_v22 }
 0x3c4   : > { %v2750_v30 = vpop.f32.mrf.mxu2 }
 0x3c5   : > { %2656 = vst [vmem:[%s6653_s25] sm:$0xff] %v2617_v29  ;;  %v6658_v28 = vsel %vm2787_vm0, %v2750_v30, -inf }
 0x3c6   : > { %2808 = vmax.xlane.f32.xlu1 %v6658_v28 }
 0x3c8   : > { %v2569_v56 = vpop.f32.mrf.mxu0  ;;  %v2618_v31 = vpop.f32.mrf.mxu1 }
 0x3c9   : > { %v2570_v34 = vadd.f32 %v6645_v47, %v2569_v56 }
 0x3cb   : > { %v2619_v50 = vadd.f32 %v2618_v31, %v2570_v34 }
 0x3cc   : > { %v2752_v9 = vpop.f32.mrf.mxu2 }
 0x3cd   : > { %2657 = vst [vmem:[%s6653_s25 + $0x8] sm:$0xff] %v2619_v50  ;;  %v6665_v35 = vsel %vm2787_vm0, %v2752_v9, -inf }
 0x3ce   : > { %2810 = vmax.xlane.f32.xlu1 %v6665_v35 }
 0x3d0   : > { %v2572_v10 = vpop.f32.mrf.mxu0  ;;  %v2621_v51 = vpop.f32.mrf.mxu1 }
 0x3d1   : > { %v2573_v1 = vadd.f32 %v6645_v47, %v2572_v10  ;;  %3513 = vmatmul.bf16.gmra.mxu2 %v6554_v52 }
 0x3d3   : > { %v2622_v11 = vadd.f32 %v2621_v51, %v2573_v1 }
 0x3d4   : > { %v2755_v36 = vpop.f32.mrf.mxu2 }
 0x3d5   : > { %2658 = vst [vmem:[%s6653_s25 + $0x10] sm:$0xff] %v2622_v11  ;;  %v6673_v37 = vsel %vm2787_vm0, %v2755_v36, -inf }
 0x3d6   : > { %2812 = vmax.xlane.f32.xlu2 %v6673_v37 }
 0x3d8   : > { %v2574_v24 = vpop.f32.mrf.mxu0  ;;  %v2623_v3 = vpop.f32.mrf.mxu1 }
 0x3d9   : > { %v2575_v39 = vadd.f32 %v6645_v47, %v2574_v24 }
 0x3db   : > { %v2624_v38 = vadd.f32 %v2623_v3, %v2575_v39 }
 0x3dc   : > { %v2757_v63 = vpop.f32.mrf.mxu2 }
 0x3dd   : > { %2659 = vst [vmem:[%s6653_s25 + $0x18] sm:$0xff] %v2624_v38  ;;  %v6680_v16 = vsel %vm2787_vm0, %v2757_v63, -inf }
 0x3de   : > { %2814 = vmax.xlane.f32.xlu2 %v6680_v16 }
 0x3e0   : > { %v2577_v58 = vpop.f32.mrf.mxu0  ;;  %v2626_v27 = vpop.f32.mrf.mxu1 }
 0x3e1   : > { %v2578_v40 = vadd.f32 %v6645_v47, %v2577_v58  ;;  %3518 = vmatmul.bf16.gmra.mxu2 %v6560_v26 }
 0x3e3   : > { %v2627_v7 = vadd.f32 %v2626_v27, %v2578_v40 }
 0x3e4   : > { %v2760_v59 = vpop.f32.mrf.mxu2 }
 0x3e5   : > { %2660 = vst [vmem:[%s6653_s25 + $0x20] sm:$0xff] %v2627_v7  ;;  %v6688_v60 = vsel %vm2787_vm0, %v2760_v59, -inf }
 0x3e6   : > { %2816 = vmax.xlane.f32.xlu2 %v6688_v60 }
 0x3e8   : > { %v2579_v41 = vpop.f32.mrf.mxu0  ;;  %v2628_v48 = vpop.f32.mrf.mxu1 }
 0x3e9   : > { %v2580_v42 = vadd.f32 %v6645_v47, %v2579_v41 }
 0x3eb   : > { %v2629_v43 = vadd.f32 %v2628_v48, %v2580_v42 }
 0x3ec   : > { %v2762_v50 = vpop.f32.mrf.mxu2 }
 0x3ed   : > { %2661 = vst [vmem:[%s6653_s25 + $0x28] sm:$0xff] %v2629_v43  ;;  %v6732_v42 = vsel %vm2787_vm0, %v2762_v50, -inf }
 0x3f0   : > { %v2582_v53 = vpop.f32.mrf.mxu0  ;;  %v2631_v32 = vpop.f32.mrf.mxu1 }
 0x3f1   : > { %v2583_v54 = vadd.f32 %v6645_v47, %v2582_v53  ;;  %3523 = vmatmul.bf16.gmra.mxu2 %v6566_v61 }
 0x3f3   : > { %v2632_v57 = vadd.f32 %v2631_v32, %v2583_v54 }
 0x3f4   : > { %v2765_v7 = vpop.f32.mrf.mxu2 }
 0x3f5   : > { %2662 = vst [vmem:[%s6653_s25 + $0x30] sm:$0xff] %v2632_v57 }
 0x3f8   : > { %v2584_v4 = vpop.f32.mrf.mxu0  ;;  %v2633_v55 = vpop.f32.mrf.mxu1 }
 0x3f9   : > { %v2585_v5 = vadd.f32 %v6645_v47, %v2584_v4 }
 0x3fb   : > { %v2634_v0 = vadd.f32 %v2633_v55, %v2585_v5 }
 0x3fc   : > { %v2767_v4 = vpop.f32.mrf.mxu2 }
 0x3fd   : > { %2663 = vst [vmem:[%s6653_s25 + $0x38] sm:$0xff] %v2634_v0  ;;  %v6747_v0 = vsel %vm2787_vm0, %v2765_v7, -inf }
 0x400   : > { %v2587_v6 = vpop.f32.mrf.mxu0  ;;  %v2636_v12 = vpop.f32.mrf.mxu1 }
 0x401   : > { %v2588_v44 = vadd.f32 %v6645_v47, %v2587_v6  ;;  %3528 = vmatmul.bf16.gmra.mxu2 %v6572_v8 }
 0x403   : > { %v2637_v18 = vadd.f32 %v2636_v12, %v2588_v44 }
 0x404   : > { %v2770_v12 = vpop.f32.mrf.mxu2 }
 0x405   : > { %2664 = vst [vmem:[%s6653_s25 + $0x40] sm:$0xff] %v2637_v18  ;;  %v6760_v18 = vsel %vm2787_vm0, %v2767_v4, -inf }
 0x408   : > { %v2589_v19 = vpop.f32.mrf.mxu0  ;;  %v2638_v13 = vpop.f32.mrf.mxu1 }
 0x409   : > { %v2590_v20 = vadd.f32 %v6645_v47, %v2589_v19 }
 0x40b   : > { %v2639_v45 = vadd.f32 %v2638_v13, %v2590_v20 }
 0x40d   : > { %2665 = vst [vmem:[%s6653_s25 + $0x48] sm:$0xff] %v2639_v45  ;;  %v6773_v45 = vsel %vm2787_vm0, %v2770_v12, -inf }
 0x410   : > { %v2592_v14 = vpop.f32.mrf.mxu0  ;;  %v2641_v62 = vpop.f32.mrf.mxu1 }
 0x411   : > { %v2593_v15 = vadd.f32 %v6645_v47, %v2592_v14  ;;  %3533 = vmatmul.bf16.gmra.mxu2 %v6578_v49  ;;  %v2772_v14 = vpop.f32.mrf.mxu2 }
 0x413   : > { %v2642_v23 = vadd.f32 %v2641_v62, %v2593_v15 }
 0x415   : > { %2666 = vst [vmem:[%s6653_s25 + $0x50] sm:$0xff] %v2642_v23 }
 0x418   : > { %v2594_v22 = vpop.f32.mrf.mxu0  ;;  %v2643_v29 = vpop.f32.mrf.mxu1 }
 0x419   : > { %v2595_v30 = vadd.f32 %v6645_v47, %v2594_v22  ;;  %v6786_v22 = vsel %vm2787_vm0, %v2772_v14, -inf }
 0x41b   : > { %v2644_v56 = vadd.f32 %v2643_v29, %v2595_v30  ;;  %v2775_v30 = vpop.f32.mrf.mxu2 }
 0x41d   : > { %2667 = vst [vmem:[%s6653_s25 + $0x58] sm:$0xff] %v2644_v56 }
 0x420   : > { %v2597_v31 = vpop.f32.mrf.mxu0  ;;  %v2646_v34 = vpop.f32.mrf.mxu1 }
 0x421   : > { %v2598_v9 = vadd.f32 %v6645_v47, %v2597_v31  ;;  %3538 = vmatmul.bf16.gmra.mxu2 %v6584_v2 }
 0x423   : > { %v2647_v10 = vadd.f32 %v2646_v34, %v2598_v9  ;;  %v2777_v34 = vpop.f32.mrf.mxu2 }
 0x424   : > { %v6800_v50 = vsel %vm2787_vm0, %v2777_v34, -inf }
 0x425   : > { %2668 = vst [vmem:[%s6653_s25 + $0x60] sm:$0xff] %v2647_v10 }
 0x428   : > { %v2599_v51 = vpop.f32.mrf.mxu0  ;;  %v2648_v1 = vpop.f32.mrf.mxu1 }
 0x429   : > { %v2600_v11 = vadd.f32 %v6645_v47, %v2599_v51  ;;  %v2805_v36 = vpop.xlane.xlu0 %2804 }
 0x42a   : > { %vm2836_vm1 = vcmp.eq.f32.partialorder %v6638_v25, %v2805_v36 }
 0x42b   : > { %v2649_v24 = vadd.f32 %v2648_v1, %v2600_v11  ;;  %v6714_v3 = vsel %vm2836_vm1, %v6632_v17, 128  ;;  %v2780_v7 = vpop.f32.mrf.mxu2 }
 0x42c   : > { %v2869_v39 = vshra.s32 %v6714_v3, 16  ;;  %v2868_v9 = vand.u32 65535, %v6714_v3 }
 0x42d   : > { %2669 = vst [vmem:[%s6653_s25 + $0x68] sm:$0xff] %v2649_v24 }
 0x42e   : > { %v6718_v38 = vcvt.s32.f32 %v2869_v39 }
 0x430   : > { %v2651_v63 = vpop.f32.mrf.mxu1  ;;  %2872 = vmin.xlane.f32.xlu0 %v6718_v38  ;;  %v2602_v58 = vpop.f32.mrf.mxu0 }
 0x431   : > { %v2603_v27 = vadd.f32 %v6645_v47, %v2602_v58  ;;  %v2807_v40 = vpop.xlane.xlu0 %2806 }
 0x432   : > { %vm2837_vm2 = vcmp.eq.f32.partialorder %v6643_v46, %v2807_v40 }
 0x433   : > { %v2652_v25 = vadd.f32 %v2651_v63, %v2603_v27  ;;  %v6724_v59 = vsel %vm2837_vm2, %v6632_v17, 128 }
 0x434   : > { %v2883_v41 = vshra.s32 %v6724_v59, 16  ;;  %v2882_v1 = vand.u32 65535, %v6724_v59  ;;  %v6830_v59 = vsel %vm2787_vm0, %v2775_v30, -inf }
 0x435   : > { %2670 = vst [vmem:[%s6653_s25 + $0x70] sm:$0xff] %v2652_v25 }
 0x436   : > { %v6728_v48 = vcvt.s32.f32 %v2883_v41  ;;  %v2884_v24 = vcvt.s32.f32 %v2882_v1 }
 0x438   : > { %2886 = vmin.xlane.f32.xlu1 %v6728_v48  ;;  %2818 = vmax.xlane.f32.xlu0 %v6732_v42  ;;  %v2604_v43 = vpop.f32.mrf.mxu0  ;;  %v2653_v32 = vpop.f32.mrf.mxu1 }
 0x439   : > { %v2605_v46 = vadd.f32 %v6645_v47, %v2604_v43  ;;  %v2809_v53 = vpop.xlane.xlu1 %2808 }
 0x43a   : > { %vm2838_vm3 = vcmp.eq.f32.partialorder %v6658_v28, %v2809_v53 }
 0x43b   : > { %v2654_v54 = vadd.f32 %v2653_v32, %v2605_v46  ;;  %v6739_v57 = vsel %vm2838_vm3, %v6632_v17, 128 }
 0x43c   : > { %v2897_v55 = vshra.s32 %v6739_v57, 16  ;;  %v2896_v58 = vand.u32 65535, %v6739_v57 }
 0x43d   : > { %2671 = vst [vmem:[%s6653_s25 + $0x78] sm:$0xff] %v2654_v54 }
 0x43e   : > { %v6743_v5 = vcvt.s32.f32 %v2897_v55  ;;  %v2782_v55 = vpop.f32.mrf.mxu2 }
 0x440   : > { %2900 = vmin.xlane.f32.xlu1 %v6743_v5  ;;  %2820 = vmax.xlane.f32.xlu0 %v6747_v0 }
 0x441   : > { %v2811_v47 = vpop.xlane.xlu1 %2810 }
 0x442   : > { %vm2839_vm4 = vcmp.eq.f32.partialorder %v6665_v35, %v2811_v47  ;;  %v6853_v47 = vsel %vm2787_vm0, %v2782_v55, -inf }
 0x443   : > { %v6753_v28 = vsel %vm2839_vm4, %v6632_v17, 128 }
 0x444   : > { %v2911_v6 = vshra.s32 %v6753_v28, 16 }
 0x446   : > { %v6756_v44 = vcvt.s32.f32 %v2911_v6 }
 0x448   : > { %2914 = vmin.xlane.f32.xlu2 %v6756_v44  ;;  %2822 = vmax.xlane.f32.xlu1 %v6760_v18 }
 0x449   : > { %v2813_v19 = vpop.xlane.xlu2 %2812 }
 0x44a   : > { %vm2840_vm5 = vcmp.eq.f32.partialorder %v6673_v37, %v2813_v19 }
 0x44b   : > { %v6766_v35 = vsel %vm2840_vm5, %v6632_v17, 128 }
 0x44c   : > { %v2925_v13 = vshra.s32 %v6766_v35, 16 }
 0x44e   : > { %v6769_v20 = vcvt.s32.f32 %v2925_v13 }
 0x450   : > { %2928 = vmin.xlane.f32.xlu2 %v6769_v20  ;;  %2824 = vmax.xlane.f32.xlu1 %v6773_v45 }
 0x451   : > { %v2815_v62 = vpop.xlane.xlu2 %2814 }
 0x452   : > { %vm2841_vm6 = vcmp.eq.f32.partialorder %v6680_v16, %v2815_v62 }
 0x453   : > { %v6779_v37 = vsel %vm2841_vm6, %v6632_v17, 128 }
 0x454   : > { %v2939_v15 = vshra.s32 %v6779_v37, 16 }
 0x456   : > { %v6782_v23 = vcvt.s32.f32 %v2939_v15 }
 0x458   : > { %2942 = vmin.xlane.f32.xlu0 %v6782_v23  ;;  %2826 = vmax.xlane.f32.xlu2 %v6786_v22 }
 0x459   : > { %v2817_v29 = vpop.xlane.xlu2 %2816 }
 0x45a   : > { %vm2842_vm7 = vcmp.eq.f32.partialorder %v6688_v60, %v2817_v29  ;;  %v2870_v60 = vcvt.s32.f32 %v2868_v9 }
 0x45b   : > { %v6792_v16 = vsel %vm2842_vm7, %v6632_v17, 128 }
 0x45c   : > { %v2953_v56 = vshra.s32 %v6792_v16, 16 }
 0x45e   : > { %v6795_v31 = vcvt.s32.f32 %v2953_v56  ;;  %v2952_v56 = vand.u32 65535, %v6792_v16 }
 0x460   : > { %2956 = vmin.xlane.f32.xlu2 %v6795_v31 }
 0x468   : > { %2830 = vmax.xlane.f32.xlu2 %v6800_v50 }
 0x4a3   : > { %v6804_v10 = vpop.xlane.xlu0 %2872 }
 0x4a4   : > { %vm2874_vm8 = vcmp.eq.f32.partialorder %v6718_v38, %v6804_v10 }
 0x4a5   : > { %v2875_v51 = vsel %vm2874_vm8, %v2870_v60, inf  ;;  %v2954_v60 = vcvt.s32.f32 %v2952_v56 }
 0x4a6   : > { %2876 = vmin.xlane.f32.xlu0 %v2875_v51 }
 0x4ab   : > { %v6809_v11 = vpop.xlane.xlu1 %2886  ;;  %v2819_v36 = vpop.xlane.xlu0 %2818 }
 0x4ac   : > { %vm2843_vm9 = vcmp.eq.f32.partialorder %v6732_v42, %v2819_v36  ;;  %vm2888_vm10 = vcmp.eq.f32.partialorder %v6728_v48, %v6809_v11  ;;  %v2910_v48 = vand.u32 65535, %v6753_v28  ;;  %v2898_v42 = vcvt.s32.f32 %v2896_v58 }
 0x4ad   : > { %v6815_v3 = vsel %vm2843_vm9, %v6632_v17, 128  ;;  %v2889_v39 = vsel %vm2888_vm10, %v2884_v24, inf  ;;  %v2924_v28 = vand.u32 65535, %v6766_v35  ;;  %v2938_v35 = vand.u32 65535, %v6779_v37 }
 0x4ae   : > { %2890 = vmin.xlane.f32.xlu1 %v2889_v39  ;;  %v2967_v38 = vshra.s32 %v6815_v3, 16  ;;  %v2912_v54 = vcvt.s32.f32 %v2910_v48  ;;  %v2879_v24 = vcvt.f32.s32 %v6804_v10  ;;  %v2893_v39 = vcvt.f32.s32 %v6809_v11 }
 0x4af   : > { %v2926_v13 = vcvt.s32.f32 %v2924_v28  ;;  %v2940_v29 = vcvt.s32.f32 %v2938_v35  ;;  %v2966_v58 = vand.u32 65535, %v6815_v3  ;;  %v5978_v11 = vmov 1.0|1.0  }
 0x4b0   : > { %v6818_v63 = vcvt.s32.f32 %v2967_v38  ;;  %v2880_v38 = vshll.u32 %v2879_v24, 16 }
 0x4b2   : > { %2970 = vmin.xlane.f32.xlu0 %v6818_v63 }
 0x4b3   : > { %v6822_v27 = vpop.xlane.xlu1 %2900  ;;  %v2821_v40 = vpop.xlane.xlu0 %2820 }
 0x4b4   : > { %vm2844_vm11 = vcmp.eq.f32.partialorder %v6747_v0, %v2821_v40  ;;  %vm2902_vm12 = vcmp.eq.f32.partialorder %v6743_v5, %v6822_v27 }
 0x4b5   : > { %v6826_v25 = vsel %vm2844_vm11, %v6632_v17, 128  ;;  %v2903_v46 = vsel %vm2902_vm12, %v2898_v42, inf }
 0x4b6   : > { %2828 = vmax.xlane.f32.xlu1 %v6830_v59  ;;  %v2981_v41 = vshra.s32 %v6826_v25, 16  ;;  %v2980_v3 = vand.u32 65535, %v6826_v25 }
 0x4b8   : > { %v6837_v43 = vcvt.s32.f32 %v2981_v41  ;;  %v2982_v28 = vcvt.s32.f32 %v2980_v3 }
 0x4ba   : > { %2904 = vmin.xlane.f32.xlu0 %v2903_v46  ;;  %2984 = vmin.xlane.f32.xlu2 %v6837_v43  ;;  %v2968_v46 = vcvt.s32.f32 %v2966_v58  ;;  %v5320_v58 = vld [vmem:[#allocation16 + $0x64] sm:$0xf0] }
 0x4bb   : > { %v6840_v53 = vpop.xlane.xlu2 %2914  ;;  %v2823_v32 = vpop.xlane.xlu1 %2822 }
 0x4bc   : > { %vm2845_vm13 = vcmp.eq.f32.partialorder %v6760_v18, %v2823_v32  ;;  %vm2916_vm14 = vcmp.eq.f32.partialorder %v6756_v44, %v6840_v53  ;;  %v6866_v18 = vsel %vm2787_vm0, %v2780_v7, -inf }
 0x4bd   : > { %v6846_v57 = vsel %vm2845_vm13, %v6632_v17, 128  ;;  %v2917_v4 = vsel %vm2916_vm14, %v2912_v54, inf }
 0x4be   : > { %2918 = vmin.xlane.f32.xlu1 %v2917_v4  ;;  %v2995_v5 = vshra.s32 %v6846_v57, 16  ;;  %v2907_v4 = vcvt.f32.s32 %v6822_v27  ;;  %v2994_v27 = vand.u32 65535, %v6846_v57 }
 0x4c0   : > { %v6849_v0 = vcvt.s32.f32 %v2995_v5  ;;  %v2996_v56 = vcvt.s32.f32 %v2994_v27 }
 0x4c2   : > { %2998 = vmin.xlane.f32.xlu0 %v6849_v0  ;;  %2834 = vmax.xlane.f32.xlu2 %v6853_v47 }
 0x4c3   : > { %v6858_v6 = vpop.xlane.xlu2 %2928  ;;  %v2825_v12 = vpop.xlane.xlu1 %2824 }
 0x4c4   : > { %vm2846_vm15 = vcmp.eq.f32.partialorder %v6773_v45, %v2825_v12  ;;  %vm2930_vm1 = vcmp.eq.f32.partialorder %v6769_v20, %v6858_v6  ;;  %v2921_v12 = vcvt.f32.s32 %v6840_v53 }
 0x4c5   : > { %v6862_v44 = vsel %vm2846_vm15, %v6632_v17, 128  ;;  %v2931_v45 = vsel %vm2930_vm1, %v2926_v13, inf }
 0x4c6   : > { %2832 = vmax.xlane.f32.xlu1 %v6866_v18  ;;  %v3009_v19 = vshra.s32 %v6862_v44, 16 }
 0x4c8   : > { %v6873_v14 = vcvt.s32.f32 %v3009_v19 }
 0x4ca   : > { %2932 = vmin.xlane.f32.xlu0 %v2931_v45  ;;  %3012 = vmin.xlane.f32.xlu2 %v6873_v14  ;;  %v2922_v45 = vshll.u32 %v2921_v12, 16 }
 0x4cb   : > { %v6876_v62 = vpop.xlane.xlu0 %2942  ;;  %v2827_v15 = vpop.xlane.xlu2 %2826 }
 0x4cc   : > { %vm2847_vm0 = vcmp.eq.f32.partialorder %v6786_v22, %v2827_v15  ;;  %vm2944_vm2 = vcmp.eq.f32.partialorder %v6782_v23, %v6876_v62 }
 0x4cd   : > { %v6882_v20 = vsel %vm2847_vm0, %v6632_v17, 128  ;;  %v2945_v37 = vsel %vm2944_vm2, %v2940_v29, inf }
 0x4ce   : > { %2946 = vmin.xlane.f32.xlu1 %v2945_v37  ;;  %v3023_v30 = vshra.s32 %v6882_v20, 16 }
 0x4d0   : > { %v6886_v34 = vcvt.s32.f32 %v3023_v30 }
 0x4d2   : > { %3026 = vmin.xlane.f32.xlu0 %v6886_v34 }
 0x4d3   : > { %v6889_v9 = vpop.xlane.xlu2 %2956 }
 0x4d4   : > { %vm2958_vm3 = vcmp.eq.f32.partialorder %v6795_v31, %v6889_v9 }
 0x4d5   : > { %v2959_v23 = vsel %vm2958_vm3, %v2954_v60, inf  ;;  %v3008_v60 = vand.u32 65535, %v6862_v44 }
 0x4d6   : > { %2960 = vmin.xlane.f32.xlu1 %v2959_v23 }
 0x4db   : > { %v2831_v22 = vpop.xlane.xlu2 %2830 }
 0x4dc   : > { %vm2849_vm4 = vcmp.eq.f32.partialorder %v6800_v50, %v2831_v22  ;;  %v2894_v50 = vshll.u32 %v2893_v39, 16 }
 0x4dd   : > { %v6895_v51 = vsel %vm2849_vm4, %v6632_v17, 128 }
 0x4de   : > { %v3051_v16 = vshra.s32 %v6895_v51, 16 }
 0x4e0   : > { %v6898_v1 = vcvt.s32.f32 %v3051_v16  ;;  %v5322_v16 = vld [vmem:[#allocation16 + $0x74] sm:$0xf0] }
 0x4e2   : > { %3054 = vmin.xlane.f32.xlu1 %v6898_v1 }
 0x519   : > { %v2877_v36 = vpop.xlane.xlu0 %2876 }
 0x51a   : > { %v2878_v31 = vcvt.f32.s32 %v2877_v36  ;;  %v5045_v36 = vld [vmem:[#allocation16 + $0x78] sm:$0xf0] }
 0x51c   : > { %v2881_v7 = vadd.s32 %v2880_v38, %v2878_v31  ;;  %v5035_v38 = vld [vmem:[#allocation16 + $0x60] sm:$0xf] }
 0x51e   : > { %vm3092_vm5 = vcmp.eq.s32.totalorder %v6632_v17, %v2881_v7  ;;  %v2935_v7 = vcvt.f32.s32 %v6858_v6 }
 0x521   : > { %v2891_v40 = vpop.xlane.xlu1 %2890 }
 0x522   : > { %v2892_v41 = vcvt.f32.s32 %v2891_v40  ;;  %v5319_v40 = vld [vmem:[#allocation16 + $0x64] sm:$0xf] }
 0x524   : > { %v2895_v48 = vadd.s32 %v2894_v50, %v2892_v41  ;;  %v5037_v50 = vld [vmem:[#allocation16 + $0x68] sm:$0xf0] }
 0x525   : > { %v6904_v42 = vpop.xlane.xlu0 %2970  ;;  %v5040_v3 = vor.u32 %v5319_v40, %v5037_v50  ;;  %v5313_v40 = vld [vmem:[#allocation16 + $0x34] sm:$0xf] }
 0x526   : > { %vm3093_vm6 = vcmp.eq.s32.totalorder %v6632_v17, %v2895_v48  ;;  %vm2972_vm7 = vcmp.eq.f32.partialorder %v6818_v63, %v6904_v42 }
 0x527   : > { %vm4969_vm8 = vmpackc.low %vm3093_vm6, %vm3092_vm5  ;;  %v2973_v10 = vsel %vm2972_vm7, %v2968_v46, inf  ;;  %v3010_v46 = vcvt.s32.f32 %v3008_v60  ;;  %v5318_v60 = vld [vmem:[#allocation16 + $0x54] sm:$0xf0] }
 0x528   : > { %4970 = vmatmul.msk.bf16.vlgmr.msra.gmra.mxu3 %vm4969_vm8, %v5978_v11  ;;  %2974 = vmin.xlane.f32.xlu2 %v2973_v10  ;;  %v5036_v10 = vor.u32 %v5320_v58, %v5035_v38  ;;  %v5011_v58 = vld [vmem:[#allocation16 + $0x30] sm:$0xf] }
 0x529   : > { %v2829_v32 = vpop.xlane.xlu1 %2828 }
 0x52a   : > { %vm2848_vm9 = vcmp.eq.f32.partialorder %v6830_v59, %v2829_v32  ;;  %v2908_v59 = vshll.u32 %v2907_v4, 16  ;;  %v2949_v32 = vcvt.f32.s32 %v6876_v62 }
 0x52b   : > { %v6914_v54 = vsel %vm2848_vm9, %v6632_v17, 128 }
 0x52c   : > { %v3037_v55 = vshra.s32 %v6914_v54, 16 }
 0x52d   : > { %v2905_v5 = vpop.xlane.xlu0 %2904  ;;  %v6918_v63 = vpop.xlane.xlu2 %2984 }
 0x52e   : > { %v2906_v19 = vcvt.f32.s32 %v2905_v5  ;;  %v6921_v35 = vcvt.s32.f32 %v3037_v55  ;;  %vm2986_vm10 = vcmp.eq.f32.partialorder %v6837_v43, %v6918_v63  ;;  %v2936_v5 = vshll.u32 %v2935_v7, 16  ;;  %v5013_v7 = vld [vmem:[#allocation16 + $0x38] sm:$0xf0] }
 0x52f   : > { %v2987_v25 = vsel %vm2986_vm10, %v2982_v28, inf  ;;  %v3022_v28 = vand.u32 65535, %v6882_v20 }
 0x530   : > { %3040 = vmin.xlane.f32.xlu0 %v6921_v35  ;;  %2988 = vmin.xlane.f32.xlu2 %v2987_v25  ;;  %v2909_v15 = vadd.s32 %v2908_v59, %v2906_v19  ;;  %v2950_v19 = vshll.u32 %v2949_v32, 16  ;;  %v5005_v32 = vld [vmem:[#allocation16 + $0x28] sm:$0xf0] }
 0x531   : > { %v2919_v13 = vpop.xlane.xlu1 %2918 }
 0x532   : > { %v2920_v29 = vcvt.f32.s32 %v2919_v13  ;;  %vm3094_vm13 = vcmp.eq.s32.totalorder %v6632_v17, %v2909_v15  ;;  %v3024_v13 = vcvt.s32.f32 %v3022_v28  ;;  %v5309_v28 = vld [vmem:[#allocation16 + $0x14] sm:$0xf] }
 0x534   : > { %v2923_v37 = vadd.s32 %v2922_v45, %v2920_v29  ;;  %v2963_v45 = vcvt.f32.s32 %v6889_v9 }
 0x535   : > { %v6927_v30 = vpop.xlane.xlu0 %2998  ;;  %v2835_v53 = vpop.xlane.xlu2 %2834 }
 0x536   : > { %vm2851_vm11 = vcmp.eq.f32.partialorder %v6853_v47, %v2835_v53  ;;  %vm3000_vm12 = vcmp.eq.f32.partialorder %v6849_v0, %v6927_v30  ;;  %vm3095_vm14 = vcmp.eq.s32.totalorder %v6632_v17, %v2923_v37  ;;  %v5043_v47 = vld [vmem:[#allocation16 + $0x70] sm:$0xf]  ;;  %v5321_v0 = vld [vmem:[#allocation16 + $0x74] sm:$0xf]  ;;  %v2964_v15 = vshll.u32 %v2963_v45, 16 }
 0x537   : > { %v6935_v43 = vsel %vm2851_vm11, %v6632_v17, 128  ;;  %v3001_v57 = vsel %vm3000_vm12, %v2996_v56, inf  ;;  %vm4971_vm15 = vmpackc.low %vm3095_vm14, %vm3094_vm13  ;;  %v5044_v39 = vor.u32 %v5322_v16, %v5043_v47  ;;  %v5048_v31 = vor.u32 %v5321_v0, %v5045_v36  ;;  %v5019_v0 = vld [vmem:[#allocation16 + $0x40] sm:$0xf]  ;;  %v5316_v36 = vld [vmem:[#allocation16 + $0x44] sm:$0xf0] }
 0x538   : > { %3002 = vmin.xlane.f32.xlu0 %v3001_v57  ;;  %4972 = vmatmul.msk.bf16.gmra.mxu3 %vm4971_vm15, %v5978_v11  ;;  %v3079_v23 = vshra.s32 %v6935_v43, 16  ;;  %v3050_v53 = vand.u32 65535, %v6895_v51  ;;  %v5027_v57 = vld [vmem:[#allocation16 + $0x50] sm:$0xf]  ;;  %v5020_v51 = vor.u32 %v5316_v36, %v5019_v0 }
 0x539   : > { %v2833_v22 = vpop.xlane.xlu1 %2832  ;;  %3317 = vmatpush.bf16.msrb.mxu0 %v5044_v39  ;;  %3366 = vmatpush.bf16.msrb.mxu1 %v5048_v31  ;;  %v5028_v47 = vor.u32 %v5318_v60, %v5027_v57  ;;  %v5315_v39 = vld [vmem:[#allocation16 + $0x44] sm:$0xf]  ;;  %v5021_v31 = vld [vmem:[#allocation16 + $0x48] sm:$0xf0]  ;;  %v3036_v57 = vand.u32 65535, %v6914_v54 }
 0x53a   : > { %vm2850_vm1 = vcmp.eq.f32.partialorder %v6866_v18, %v2833_v22  ;;  %v6941_v24 = vcvt.s32.f32 %v3079_v23  ;;  %v3052_v56 = vcvt.s32.f32 %v3050_v53  ;;  %v5317_v23 = vld [vmem:[#allocation16 + $0x54] sm:$0xf]  ;;  %v5029_v22 = vld [vmem:[#allocation16 + $0x58] sm:$0xf0]  ;;  %v5024_v38 = vor.u32 %v5315_v39, %v5021_v31 }
 0x53b   : > { %v6944_v44 = vsel %vm2850_vm1, %v6632_v17, 128  ;;  %v5032_v16 = vor.u32 %v5317_v23, %v5029_v22  ;;  %v3038_v23 = vcvt.s32.f32 %v3036_v57  ;;  %v2991_v22 = vcvt.f32.s32 %v6918_v63  ;;  %v5305_v54 = vld [vmem:[#allocation14 + $0x74] sm:$0xf]  ;;  %v5295_v57 = vld [vmem:[#allocation14 + $0x24] sm:$0xf] }
 0x53c   : > { %3082 = vmin.xlane.f32.xlu2 %v6941_v24  ;;  %v3065_v41 = vshra.s32 %v6944_v44, 16 }
 0x53d   : > { %v2933_v48 = vpop.xlane.xlu0 %2932  ;;  %v6949_v18 = vpop.xlane.xlu2 %3012  ;;  %3318 = vmatpush.bf16.msrb.mxu0 %v5036_v10  ;;  %3367 = vmatpush.bf16.msrb.mxu1 %v5040_v3  ;;  %v5311_v10 = vld [vmem:[#allocation16 + $0x24] sm:$0xf]  ;;  %v2992_v39 = vshll.u32 %v2991_v22, 16 }
 0x53e   : > { %v2934_v4 = vcvt.f32.s32 %v2933_v48  ;;  %v6952_v55 = vcvt.s32.f32 %v3065_v41  ;;  %vm3014_vm0 = vcmp.eq.f32.partialorder %v6873_v14, %v6949_v18  ;;  %v5016_v41 = vor.u32 %v5313_v40, %v5013_v7  ;;  %v5003_v48 = vld [vmem:[#allocation16 + $0x20] sm:$0xf] }
 0x53f   : > { %v3015_v6 = vsel %vm3014_vm0, %v3010_v46, inf  ;;  %v5312_v46 = vld [vmem:[#allocation16 + $0x24] sm:$0xf0] }
 0x540   : > { %3068 = vmin.xlane.f32.xlu1 %v6952_v55  ;;  %3016 = vmin.xlane.f32.xlu0 %v3015_v6  ;;  %v2937_v25 = vadd.s32 %v2936_v5, %v2934_v4  ;;  %v5004_v3 = vor.u32 %v5312_v46, %v5003_v48  ;;  %v5008_v4 = vor.u32 %v5311_v10, %v5005_v32  ;;  %v4995_v6 = vld [vmem:[#allocation16 + $0x10] sm:$0xf]  ;;  %v5310_v5 = vld [vmem:[#allocation16 + $0x14] sm:$0xf0]  ;;  %v5101_v32 = vld [vmem:[#allocation14 + $0x68] sm:$0xf0] }
 0x541   : > { %v2947_v12 = vpop.xlane.xlu1 %2946  ;;  %3319 = vmatpush.bf16.msrb.mxu0 %v5028_v47  ;;  %3368 = vmatpush.bf16.msrb.mxu1 %v5032_v16  ;;  %v5109_v16 = vld [vmem:[#allocation14 + $0x78] sm:$0xf0] }
 0x542   : > { %v2948_v59 = vcvt.f32.s32 %v2947_v12  ;;  %vm3096_vm3 = vcmp.eq.s32.totalorder %v6632_v17, %v2937_v25  ;;  %v4996_v12 = vor.u32 %v5310_v5, %v4995_v6  ;;  %v5112_v36 = vor.u32 %v5305_v54, %v5109_v16  ;;  %v5293_v16 = vld [vmem:[#allocation14 + $0x14] sm:$0xf] }
 0x544   : > { %v2951_v62 = vadd.s32 %v2950_v19, %v2948_v59  ;;  %v4997_v19 = vld [vmem:[#allocation16 + $0x18] sm:$0xf0]  ;;  %v4987_v59 = vld [vmem:[#allocation16] sm:$0xf]  ;;  %3544 = vmatpush.bf16.msrb.mxu3 %v5112_v36 }
 0x545   : > { %v6958_v27 = vpop.xlane.xlu0 %3026  ;;  %3320 = vmatpush.bf16.msrb.mxu0 %v5020_v51  ;;  %3369 = vmatpush.bf16.msrb.mxu1 %v5024_v38  ;;  %v5000_v25 = vor.u32 %v5309_v28, %v4997_v19  ;;  %v3078_v51 = vand.u32 65535, %v6935_v43 }
 0x546   : > { %vm3028_vm2 = vcmp.eq.f32.partialorder %v6886_v34, %v6958_v27  ;;  %vm3097_vm4 = vcmp.eq.s32.totalorder %v6632_v17, %v2951_v62  ;;  %v5308_v62 = vld [vmem:[#allocation16 + $0x4] sm:$0xf0]  ;;  %v3033_v6 = vcvt.f32.s32 %v6958_v27  ;;  %v5297_v27 = vld [vmem:[#allocation14 + $0x34] sm:$0xf] }
 0x547   : > { %v3029_v14 = vsel %vm3028_vm2, %v3024_v13, inf  ;;  %vm4973_vm5 = vmpackc.low %vm3097_vm4, %vm3096_vm3  ;;  %v5307_v13 = vld [vmem:[#allocation16 + $0x4] sm:$0xf]  ;;  %v4988_v45 = vor.u32 %v5308_v62, %v4987_v59  ;;  %v3080_v7 = vcvt.s32.f32 %v3078_v51 }
 0x548   : > { %3030 = vmin.xlane.f32.xlu1 %v3029_v14  ;;  %4974 = vmatmul.msk.bf16.gmra.mxu3 %vm4973_vm5, %v5978_v11  ;;  %v4989_v14 = vld [vmem:[#allocation16 + $0x8] sm:$0xf0]  ;;  %v3034_v62 = vshll.u32 %v3033_v6, 16 }
 0x549   : > { %v2961_v20 = vpop.xlane.xlu1 %2960  ;;  %3370 = vmatpush.bf16.msrb.mxu1 %v5016_v41 }
 0x54a   : > { %v2962_v29 = vcvt.f32.s32 %v2961_v20  ;;  %v4992_v20 = vor.u32 %v5307_v13, %v4989_v14  ;;  %v5085_v14 = vld [vmem:[#allocation14 + $0x48] sm:$0xf0] }
 0x54c   : > { %v6966_v37 = vadd.s32 %v2964_v15, %v2962_v29  ;;  %v2977_v15 = vcvt.f32.s32 %v6904_v42 }
 0x54d   : > { %3371 = vmatpush.bf16.msrb.mxu1 %v5008_v4  ;;  %v5301_v4 = vld [vmem:[#allocation14 + $0x54] sm:$0xf] }
 0x54e   : > { %v2978_v53 = vshll.u32 %v2977_v15, 16  ;;  %vm3098_vm7 = vcmp.eq.s32.totalorder %v6632_v17, %v6966_v37  ;;  %v3005_v37 = vcvt.f32.s32 %v6927_v30 }
 0x551   : > { %3372 = vmatpush.bf16.msrb.mxu1 %v5000_v25 }
 0x555   : > { %v6969_v9 = vpop.xlane.xlu1 %3054  ;;  %3373 = vmatpush.bf16.msrb.mxu1 %v4992_v20 }
 0x556   : > { %vm3056_vm6 = vcmp.eq.f32.partialorder %v6898_v1, %v6969_v9  ;;  %v5314_v1 = vld [vmem:[#allocation16 + $0x34] sm:$0xf0] }
 0x557   : > { %v3057_v34 = vsel %vm3056_vm6, %v3052_v56, inf  ;;  %v5012_v50 = vor.u32 %v5314_v1, %v5011_v58  ;;  %v3006_v58 = vshll.u32 %v3005_v37, 16  ;;  %v5061_v37 = vld [vmem:[#allocation14 + $0x18] sm:$0xf0] }
 0x558   : > { %3058 = vmin.xlane.f32.xlu0 %v3057_v34 }
 0x559   : > { %3321 = vmatpush.bf16.msrb.mxu0 %v5012_v50  ;;  %v3064_v50 = vand.u32 65535, %v6944_v44 }
 0x55b   : > { %v3066_v48 = vcvt.s32.f32 %v3064_v50 }
 0x55d   : > { %3322 = vmatpush.bf16.msrb.mxu0 %v5004_v3  ;;  %v3019_v3 = vcvt.f32.s32 %v6949_v18  ;;  %v5299_v18 = vld [vmem:[#allocation14 + $0x44] sm:$0xf] }
 0x55e   : > { %v5088_v15 = vor.u32 %v5299_v18, %v5085_v14 }
 0x55f   : > { %v3020_v19 = vshll.u32 %v3019_v3, 16 }
 0x561   : > { %3323 = vmatpush.bf16.msrb.mxu0 %v4996_v12  ;;  %v5093_v12 = vld [vmem:[#allocation14 + $0x58] sm:$0xf0] }
 0x562   : > { %v5096_v25 = vor.u32 %v5301_v4, %v5093_v12 }
 0x565   : > { %3324 = vmatpush.bf16.msrb.mxu0 %v4988_v45 }
 0x59b   : > { %v2975_v29 = vpop.xlane.xlu2 %2974 }
 0x59c   : > { %v2976_v56 = vcvt.f32.s32 %v2975_v29  ;;  %v5077_v29 = vld [vmem:[#allocation14 + $0x38] sm:$0xf0] }
 0x59e   : > { %v2979_v34 = vadd.s32 %v2978_v53, %v2976_v56  ;;  %v5080_v56 = vor.u32 %v5297_v27, %v5077_v29 }
 0x5a0   : > { %vm3099_vm8 = vcmp.eq.s32.totalorder %v6632_v17, %v2979_v34 }
 0x5a1   : > { %vm4975_vm9 = vmpackc.low %vm3099_vm8, %vm3098_vm7 }
 0x5a2   : > { %4976 = vmatmul.msk.bf16.gmra.mxu3 %vm4975_vm9, %v5978_v11 }
 0x5a3   : > { %v6979_v60 = vpop.xlane.xlu0 %3040  ;;  %v2989_v42 = vpop.xlane.xlu2 %2988 }
 0x5a4   : > { %vm3042_vm10 = vcmp.eq.f32.partialorder %v6921_v35, %v6979_v60  ;;  %v2990_v0 = vcvt.f32.s32 %v2989_v42  ;;  %v3047_v51 = vcvt.f32.s32 %v6979_v60 }
 0x5a5   : > { %v3043_v47 = vsel %vm3042_vm10, %v3038_v23, inf  ;;  %v5069_v23 = vld [vmem:[#allocation14 + $0x28] sm:$0xf0] }
 0x5a6   : > { %3044 = vmin.xlane.f32.xlu2 %v3043_v47  ;;  %v2993_v1 = vadd.s32 %v2992_v39, %v2990_v0  ;;  %v5072_v42 = vor.u32 %v5295_v57, %v5069_v23  ;;  %v5064_v0 = vor.u32 %v5293_v16, %v5061_v37  ;;  %v3061_v39 = vcvt.f32.s32 %v6969_v9 }
 0x5a8   : > { %vm3100_vm11 = vcmp.eq.s32.totalorder %v6632_v17, %v2993_v1  ;;  %v5291_v1 = vld [vmem:[#allocation14 + $0x4] sm:$0xf] }
 0x5ab   : > { %v3157_v31 = vpop.f32.mrf.mxu3  ;;  %v3003_v38 = vpop.xlane.xlu0 %3002 }
 0x5ac   : > { %v3004_v35 = vcvt.f32.s32 %v3003_v38  ;;  %v3062_v38 = vshll.u32 %v3061_v39, 16 }
 0x5ae   : > { %v3007_v40 = vadd.s32 %v3006_v58, %v3004_v35  ;;  %v5053_v35 = vld [vmem:[#allocation14 + $0x8] sm:$0xf0] }
 0x5af   : > { %v6987_v63 = vpop.xlane.xlu2 %3082 }
 0x5b0   : > { %vm3101_vm12 = vcmp.eq.s32.totalorder %v6632_v17, %v3007_v40  ;;  %vm3084_vm13 = vcmp.eq.f32.partialorder %v6941_v24, %v6987_v63  ;;  %v5303_v24 = vld [vmem:[#allocation14 + $0x64] sm:$0xf]  ;;  %v3048_v40 = vshll.u32 %v3047_v51, 16  ;;  %v3089_v9 = vcvt.f32.s32 %v6987_v63 }
 0x5b1   : > { %vm4977_vm14 = vmpackc.low %vm3101_vm12, %vm3100_vm11  ;;  %v3085_v30 = vsel %vm3084_vm13, %v3080_v7, inf  ;;  %v5104_v28 = vor.u32 %v5303_v24, %v5101_v32 }
 0x5b2   : > { %4978 = vmatmul.msk.bf16.gmra.mxu3 %vm4977_vm14, %v5978_v11  ;;  %3086 = vmin.xlane.f32.xlu2 %v3085_v30  ;;  %v5056_v30 = vor.u32 %v5291_v1, %v5053_v35 }
 0x5b3   : > { %v3159_v43 = vpop.f32.mrf.mxu3  ;;  %v6994_v41 = vpop.xlane.xlu1 %3068  ;;  %3545 = vmatpush.bf16.msrb.mxu3 %v5104_v28 }
 0x5b4   : > { %v3213_v44 = vpack.c.bf16 %v3159_v43, %v3157_v31  ;;  %vm3070_vm15 = vcmp.eq.f32.partialorder %v6952_v55, %v6994_v41  ;;  %v3017_v46 = vpop.xlane.xlu0 %3016 }
 0x5b5   : > { %v3071_v10 = vsel %vm3070_vm15, %v3066_v48, inf  ;;  %v3018_v5 = vcvt.f32.s32 %v3017_v46 }
 0x5b6   : > { %3374 = vmatmul.bf16.vlgmr.msrb.gmra.mxu1 %v3213_v44  ;;  %3072 = vmin.xlane.f32.xlu1 %v3071_v10  ;;  %v3090_v10 = vshll.u32 %v3089_v9, 16 }
 0x5b7   : > { %3325 = vmatmul.bf16.vlgmr.msrb.gmra.mxu0 %v3213_v44  ;;  %v3021_v13 = vadd.s32 %v3020_v19, %v3018_v5  ;;  %3546 = vmatpush.bf16.msrb.mxu3 %v5096_v25  ;;  %v3075_v44 = vcvt.f32.s32 %v6994_v41 }
 0x5b9   : > { %vm3102_vm1 = vcmp.eq.s32.totalorder %v6632_v17, %v3021_v13  ;;  %v3076_v24 = vshll.u32 %v3075_v44, 16 }
 0x5bb   : > { %v3162_v59 = vpop.f32.mrf.mxu3  ;;  %v3031_v55 = vpop.xlane.xlu1 %3030  ;;  %3547 = vmatpush.bf16.msrb.mxu3 %v5088_v15 }
 0x5bc   : > { %v3032_v45 = vcvt.f32.s32 %v3031_v55 }
 0x5be   : > { %v3035_v20 = vadd.s32 %v3034_v62, %v3032_v45 }
 0x5bf   : > { %3548 = vmatpush.bf16.msrb.mxu3 %v5080_v56 }
 0x5c0   : > { %vm3103_vm0 = vcmp.eq.s32.totalorder %v6632_v17, %v3035_v20 }
 0x5c1   : > { %vm4979_vm2 = vmpackc.low %vm3103_vm0, %vm3102_vm1 }
 0x5c2   : > { %4980 = vmatmul.msk.bf16.gmra.mxu3 %vm4979_vm2, %v5978_v11 }
 0x5c3   : > { %v3164_v53 = vpop.f32.mrf.mxu3  ;;  %3549 = vmatpush.bf16.msrb.mxu3 %v5072_v42 }
 0x5c4   : > { %v3214_v34 = vpack.c.bf16 %v3164_v53, %v3162_v59  ;;  %v575_v53 = vld [vmem:[#allocation17 + $0xa] sm:$0x3] }
 0x5c5   : > { %v7026_v42 = vperm.slane %v575_v53, 0  ;;  %v7029_v16 = vperm.slane %v575_v53, 1 }
 0x5c6   : > { %3379 = vmatmul.bf16.gmra.mxu1 %v3214_v34 }
 0x5c7   : > { %3330 = vmatmul.bf16.gmra.mxu0 %v3214_v34  ;;  %3550 = vmatpush.bf16.msrb.mxu3 %v5064_v0 }
 0x5cb   : > { %v3167_v47 = vpop.f32.mrf.mxu3  ;;  %v3059_v36 = vpop.xlane.xlu0 %3058  ;;  %3551 = vmatpush.bf16.msrb.mxu3 %v5056_v30 }
 0x5cc   : > { %v3060_v31 = vcvt.f32.s32 %v3059_v36 }
 0x5ce   : > { %v3063_v50 = vadd.s32 %v3062_v38, %v3060_v31 }
 0x5d0   : > { %vm3105_vm4 = vcmp.eq.s32.totalorder %v6632_v17, %v3063_v50 }
 0x5d3   : > { %v3169_v22 = vpop.f32.mrf.mxu3 }
 0x5d4   : > { %v3215_v54 = vpack.c.bf16 %v3169_v22, %v3167_v47 }
 0x5d6   : > { %3384 = vmatmul.bf16.gmra.mxu1 %v3215_v54 }
 0x5d7   : > { %3335 = vmatmul.bf16.gmra.mxu0 %v3215_v54 }
 0x619   : > { %v3045_v58 = vpop.xlane.xlu2 %3044 }
 0x61a   : > { %v3046_v7 = vcvt.f32.s32 %v3045_v58 }
 0x61c   : > { %v3049_v43 = vadd.s32 %v3048_v40, %v3046_v7 }
 0x61e   : > { %vm3104_vm3 = vcmp.eq.s32.totalorder %v6632_v17, %v3049_v43 }
 0x61f   : > { %vm4981_vm5 = vmpackc.low %vm3105_vm4, %vm3104_vm3 }
 0x620   : > { %4982 = vmatmul.msk.bf16.gmra.mxu3 %vm4981_vm5, %v5978_v11 }
 0x625   : > { %v3172_v60 = vpop.f32.mrf.mxu3  ;;  %v3087_v48 = vpop.xlane.xlu2 %3086 }
 0x626   : > { %v3088_v46 = vcvt.f32.s32 %v3087_v48 }
 0x628   : > { %v3091_v32 = vadd.s32 %v3090_v10, %v3088_v46 }
 0x629   : > { %v3073_v3 = vpop.xlane.xlu1 %3072 }
 0x62a   : > { %v3074_v4 = vcvt.f32.s32 %v3073_v3  ;;  %vm3107_vm7 = vcmp.eq.s32.totalorder %v6632_v17, %v3091_v32 }
 0x62c   : > { %v3077_v6 = vadd.s32 %v3076_v24, %v3074_v4 }
 0x62d   : > { %v3174_v5 = vpop.f32.mrf.mxu3 }
 0x62e   : > { %v3216_v28 = vpack.c.bf16 %v3174_v5, %v3172_v60  ;;  %vm3106_vm6 = vcmp.eq.s32.totalorder %v6632_v17, %v3077_v6 }
 0x62f   : > { %vm4983_vm8 = vmpackc.low %vm3107_vm7, %vm3106_vm6 }
 0x630   : > { %4984 = vmatmul.msk.bf16.gmra.mxu3 %vm4983_vm8, %v5978_v11  ;;  %3340 = vmatmul.bf16.gmra.mxu0 %v3216_v28 }
 0x631   : > { %3389 = vmatmul.bf16.gmra.mxu1 %v3216_v28 }
 0x633   : > { %v3375_v13 = vpop.f32.mrf.mxu1 }
 0x634   : > { %v3326_v11 = vpop.f32.mrf.mxu0 }
 0x635   : > { %v3177_v63 = vpop.f32.mrf.mxu3 }
 0x63d   : > { %v3179_v41 = vpop.f32.mrf.mxu3 }
 0x63e   : > { %v3217_v12 = vpack.c.bf16 %v3179_v41, %v3177_v63 }
 0x640   : > { %3345 = vmatmul.bf16.gmra.mxu0 %v3217_v12  ;;  %3552 = vmatmul.bf16.vlgmr.msrb.gmra.mxu3 %v6542_v21  ;;  %v3504_v21 = vpop.f32.mrf.mxu2 }
 0x641   : > { %3394 = vmatmul.bf16.gmra.mxu1 %v3217_v12 }
 0x645   : > { %v3182_v19 = vpop.f32.mrf.mxu3 }
 0x64d   : > { %v3184_v25 = vpop.f32.mrf.mxu3 }
 0x64e   : > { %v3218_v59 = vpack.c.bf16 %v3184_v25, %v3182_v19 }
 0x650   : > { %3350 = vmatmul.bf16.gmra.mxu0 %v3218_v59  ;;  %3557 = vmatmul.bf16.gmra.mxu3 %v6548_v33  ;;  %v3506_v33 = vpop.f32.mrf.mxu2 }
 0x651   : > { %3399 = vmatmul.bf16.gmra.mxu1 %v3218_v59 }
 0x658   : > { %v3509_v18 = vpop.f32.mrf.mxu2 }
 0x660   : > { %3562 = vmatmul.bf16.gmra.mxu3 %v6554_v52  ;;  %v3328_v52 = vpop.f32.mrf.mxu0  ;;  %v3511_v57 = vpop.f32.mrf.mxu2 }
 0x661   : > { %v3507_v22 = vadd.f32 %v3506_v33, %v3328_v52 }
 0x668   : > { %v3331_v14 = vpop.f32.mrf.mxu0  ;;  %v3514_v50 = vpop.f32.mrf.mxu2 }
 0x669   : > { %v3510_v35 = vadd.f32 %v3509_v18, %v3331_v14 }
 0x670   : > { %3567 = vmatmul.bf16.gmra.mxu3 %v6560_v26  ;;  %v3377_v26 = vpop.f32.mrf.mxu1  ;;  %v3333_v23 = vpop.f32.mrf.mxu0 }
 0x671   : > { %v3512_v3 = vadd.f32 %v3511_v57, %v3333_v23  ;;  %v3516_v6 = vpop.f32.mrf.mxu2 }
 0x678   : > { %v3380_v56 = vpop.f32.mrf.mxu1  ;;  %v3336_v7 = vpop.f32.mrf.mxu0 }
 0x680   : > { %3572 = vmatmul.bf16.gmra.mxu3 %v6566_v61  ;;  %v574_v61 = vld [vmem:[#allocation17 + $0x8] sm:$0x3]  ;;  %v3382_v58 = vpop.f32.mrf.mxu1  ;;  %v3338_v5 = vpop.f32.mrf.mxu0 }
 0x681   : > { %v7021_v15 = vperm.slane %v574_v61, 0  ;;  %v7024_v29 = vperm.slane %v574_v61, 1 }
 0x683   : > { %v3600_v0 = vadd.f32 %v7021_v15, %v3507_v22  ;;  %v3602_v43 = vadd.f32 %v7021_v15, %v3510_v35  ;;  %v3604_v28 = vadd.f32 %v7021_v15, %v3512_v3 }
 0x685   : > { %v3632_v1 = vmax.f32 %v3600_v0, 0.0  ;;  %v3634_v10 = vmax.f32 %v3602_v43, 0.0  ;;  %v3636_v59 = vmax.f32 %v3604_v28, 0.0 }
 0x687   : > { %v3669_v9 = vmul.f32 %v7026_v42, %v3632_v1  ;;  %v3671_v63 = vmul.f32 %v7026_v42, %v3634_v10  ;;  %v3673_v33 = vmul.f32 %v7026_v42, %v3636_v59 }
 0x688   : > { %v3385_v32 = vpop.f32.mrf.mxu1 }
 0x690   : > { %3577 = vmatmul.bf16.gmra.mxu3 %v6572_v8 }
 0x6a0   : > { %3582 = vmatmul.bf16.gmra.mxu3 %v6578_v49  ;;  %v3505_v49 = vadd.f32 %v3504_v21, %v3326_v11 }
 0x6a2   : > { %v3598_v27 = vadd.f32 %v7021_v15, %v3505_v49 }
 0x6a3   : > { %v3187_v17 = vpop.f32.mrf.mxu3 }
 0x6a4   : > { %v3630_v47 = vmax.f32 %v3598_v27, 0.0 }
 0x6a6   : > { %v3667_v36 = vmul.f32 %v7026_v42, %v3630_v47 }
 0x6ab   : > { %v3189_v55 = vpop.f32.mrf.mxu3 }
 0x6ac   : > { %v3219_v62 = vpack.c.bf16 %v3189_v55, %v3187_v17  ;;  %v3515_v17 = vadd.f32 %v3514_v50, %v3336_v7  ;;  %v3387_v55 = vpop.f32.mrf.mxu1 }
 0x6ae   : > { %3355 = vmatmul.bf16.gmra.mxu0 %v3219_v62  ;;  %3404 = vmatmul.bf16.gmra.mxu1 %v3219_v62  ;;  %v3341_v62 = vpop.f32.mrf.mxu0 }
 0x6b0   : > { %3587 = vmatmul.bf16.gmra.mxu3 %v6584_v2 }
 0x6b3   : > { %v3192_v45 = vpop.f32.mrf.mxu3 }
 0x6b4   : > { %v3390_v27 = vpop.f32.mrf.mxu1 }
 0x6bb   : > { %v3194_v8 = vpop.f32.mrf.mxu3 }
 0x6bc   : > { %v3220_v20 = vpack.c.bf16 %v3194_v8, %v3192_v45  ;;  %v3519_v45 = vpop.f32.mrf.mxu2  ;;  %v3517_v8 = vadd.f32 %v3516_v6, %v3338_v5 }
 0x6be   : > { %3360 = vmatmul.bf16.gmra.mxu0 %v3220_v20  ;;  %3409 = vmatmul.bf16.gmra.mxu1 %v3220_v20  ;;  %v3608_v53 = vadd.f32 %v7021_v15, %v3517_v8 }
 0x6c3   : > { %v3553_v2 = vpop.f32.mrf.mxu3 }
 0x6c4   : > { %v3554_v34 = vadd.f32 %v3553_v2, %v3375_v13  ;;  %v3606_v13 = vadd.f32 %v7021_v15, %v3515_v17  ;;  %v3521_v22 = vpop.f32.mrf.mxu2 }
 0x6c6   : > { %v3599_v54 = vadd.f32 %v7024_v29, %v3554_v34  ;;  %v3638_v14 = vmax.f32 %v3606_v13, 0.0  ;;  %v3343_v34 = vpop.f32.mrf.mxu0 }
 0x6c7   : > { %v3522_v7 = vadd.f32 %v3521_v22, %v3343_v34 }
 0x6c8   : > { %v3631_v37 = vmax.f32 %v3599_v54, 0.0  ;;  %v3640_v54 = vmax.f32 %v3608_v53, 0.0 }
 0x6ca   : > { %v3668_v39 = vmul.f32 %v7029_v16, %v3631_v37  ;;  %v3520_v37 = vadd.f32 %v3519_v45, %v3341_v62 }
 0x6cb   : > { %v3555_v51 = vpop.f32.mrf.mxu3 }
 0x6cc   : > { %v3556_v31 = vadd.f32 %v3555_v51, %v3377_v26  ;;  %v3699_v38 = vadd.f32 %v3668_v39, %v3667_v36  ;;  %v3610_v39 = vadd.f32 %v7021_v15, %v3520_v37  ;;  %v3677_v51 = vmul.f32 %v7026_v42, %v3640_v54  ;;  %v3524_v43 = vpop.f32.mrf.mxu2 }
 0x6ce   : > { %v3601_v40 = vadd.f32 %v7024_v29, %v3556_v31  ;;  %3700 = vadd.xlane.f32.xlu0 %v3699_v38  ;;  %v3392_v38 = vpop.f32.mrf.mxu1  ;;  %v3642_v50 = vmax.f32 %v3610_v39, 0.0 }
 0x6d0   : > { %v3633_v30 = vmax.f32 %v3601_v40, 0.0  ;;  %v3346_v40 = vpop.f32.mrf.mxu0 }
 0x6d2   : > { %v3670_v60 = vmul.f32 %v7029_v16, %v3633_v30 }
 0x6d3   : > { %v3558_v48 = vpop.f32.mrf.mxu3 }
 0x6d4   : > { %v3559_v44 = vadd.f32 %v3558_v48, %v3380_v56  ;;  %v3702_v46 = vadd.f32 %v3670_v60, %v3669_v9  ;;  %v3675_v56 = vmul.f32 %v7026_v42, %v3638_v14  ;;  %v3612_v60 = vadd.f32 %v7021_v15, %v3522_v7 }
 0x6d5   : > { %v3679_v48 = vmul.f32 %v7026_v42, %v3642_v50 }
 0x6d6   : > { %v3603_v24 = vadd.f32 %v7024_v29, %v3559_v44  ;;  %3703 = vadd.xlane.f32.xlu1 %v3702_v46 }
 0x6d8   : > { %v3635_v4 = vmax.f32 %v3603_v24, 0.0  ;;  %v3395_v24 = vpop.f32.mrf.mxu1  ;;  %v3348_v5 = vpop.f32.mrf.mxu0 }
 0x6da   : > { %v3672_v41 = vmul.f32 %v7029_v16, %v3635_v4  ;;  %v3525_v4 = vadd.f32 %v3524_v43, %v3346_v40 }
 0x6db   : > { %v3560_v12 = vpop.f32.mrf.mxu3 }
 0x6dc   : > { %v3561_v19 = vadd.f32 %v3560_v12, %v3382_v58  ;;  %v3705_v25 = vadd.f32 %v3672_v41, %v3671_v63  ;;  %v3526_v63 = vpop.f32.mrf.mxu2  ;;  %v3614_v41 = vadd.f32 %v7021_v15, %v3525_v4 }
 0x6de   : > { %v3605_v21 = vadd.f32 %v7024_v29, %v3561_v19  ;;  %3706 = vadd.xlane.f32.xlu2 %v3705_v25 }
 0x6e0   : > { %v3637_v11 = vmax.f32 %v3605_v21, 0.0  ;;  %v3646_v21 = vmax.f32 %v3614_v41, 0.0  ;;  %v3397_v62 = vpop.f32.mrf.mxu1 }
 0x6e2   : > { %v3674_v52 = vmul.f32 %v7029_v16, %v3637_v11  ;;  %v3527_v11 = vadd.f32 %v3526_v63, %v3348_v5  ;;  %v3683_v45 = vmul.f32 %v7026_v42, %v3646_v21 }
 0x6e3   : > { %v3563_v26 = vpop.f32.mrf.mxu3 }
 0x6e4   : > { %v3564_v18 = vadd.f32 %v3563_v26, %v3385_v32  ;;  %v3708_v61 = vadd.f32 %v3674_v52, %v3673_v33  ;;  %v3644_v32 = vmax.f32 %v3612_v60, 0.0  ;;  %v3351_v33 = vpop.f32.mrf.mxu0  ;;  %v3616_v52 = vadd.f32 %v7021_v15, %v3527_v11 }
 0x6e6   : > { %v3607_v20 = vadd.f32 %v7024_v29, %v3564_v18  ;;  %3709 = vadd.xlane.f32.xlu0 %v3708_v61  ;;  %v3681_v12 = vmul.f32 %v7026_v42, %v3644_v32  ;;  %v3529_v18 = vpop.f32.mrf.mxu2 }
 0x6e8   : > { %v3639_v49 = vmax.f32 %v3607_v20, 0.0  ;;  %v3648_v20 = vmax.f32 %v3616_v52, 0.0 }
 0x6ea   : > { %v3676_v2 = vmul.f32 %v7029_v16, %v3639_v49  ;;  %v3530_v49 = vadd.f32 %v3529_v18, %v3351_v33  ;;  %v3685_v34 = vmul.f32 %v7026_v42, %v3648_v20 }
 0x6eb   : > { %v3565_v57 = vpop.f32.mrf.mxu3 }
 0x6ec   : > { %v3566_v23 = vadd.f32 %v3565_v57, %v3387_v55  ;;  %v3711_v47 = vadd.f32 %v3676_v2, %v3675_v56  ;;  %v3400_v56 = vpop.f32.mrf.mxu1  ;;  %v3618_v2 = vadd.f32 %v7021_v15, %v3530_v49 }
 0x6ee   : > { %v3609_v0 = vadd.f32 %v7024_v29, %v3566_v23  ;;  %3712 = vadd.xlane.f32.xlu1 %v3711_v47  ;;  %v3353_v23 = vpop.f32.mrf.mxu0  ;;  %v3531_v37 = vpop.f32.mrf.mxu2 }
 0x6f0   : > { %v3641_v36 = vmax.f32 %v3609_v0, 0.0  ;;  %v3650_v0 = vmax.f32 %v3618_v2, 0.0 }
 0x6f2   : > { %v3678_v31 = vmul.f32 %v7029_v16, %v3641_v36  ;;  %v3532_v36 = vadd.f32 %v3531_v37, %v3353_v23 }
 0x6f3   : > { %v3568_v58 = vpop.f32.mrf.mxu3 }
 0x6f4   : > { %v3569_v1 = vadd.f32 %v3568_v58, %v3390_v27  ;;  %v3714_v35 = vadd.f32 %v3678_v31, %v3677_v51  ;;  %v3620_v31 = vadd.f32 %v7021_v15, %v3532_v36 }
 0x6f6   : > { %v3611_v30 = vadd.f32 %v7024_v29, %v3569_v1  ;;  %3715 = vadd.xlane.f32.xlu2 %v3714_v35  ;;  %v3402_v1 = vpop.f32.mrf.mxu1  ;;  %v3652_v7 = vmax.f32 %v3620_v31, 0.0 }
 0x6f8   : > { %v3643_v9 = vmax.f32 %v3611_v30, 0.0 }
 0x6fa   : > { %v3680_v44 = vmul.f32 %v7029_v16, %v3643_v9  ;;  %v3689_v9 = vmul.f32 %v7026_v42, %v3652_v7 }
 0x6fb   : > { %v3570_v46 = vpop.f32.mrf.mxu3 }
 0x6fc   : > { %v3571_v10 = vadd.f32 %v3570_v46, %v3392_v38  ;;  %v3717_v3 = vadd.f32 %v3680_v44, %v3679_v48  ;;  %v3687_v38 = vmul.f32 %v7026_v42, %v3650_v0  ;;  %v3534_v48 = vpop.f32.mrf.mxu2 }
 0x6fe   : > { %v3613_v6 = vadd.f32 %v7024_v29, %v3571_v10  ;;  %3718 = vadd.xlane.f32.xlu0 %v3717_v3 }
 0x700   : > { %v3645_v28 = vmax.f32 %v3613_v6, 0.0 }
 0x702   : > { %v3682_v19 = vmul.f32 %v7029_v16, %v3645_v28 }
 0x703   : > { %v3573_v25 = vpop.f32.mrf.mxu3 }
 0x704   : > { %v3574_v59 = vadd.f32 %v3573_v25, %v3395_v24  ;;  %v3720_v17 = vadd.f32 %v3682_v19, %v3681_v12  ;;  %v3536_v4 = vpop.f32.mrf.mxu2 }
 0x706   : > { %v3615_v55 = vadd.f32 %v7024_v29, %v3574_v59  ;;  %3721 = vadd.xlane.f32.xlu1 %v3720_v17 }
 0x708   : > { %v3647_v13 = vmax.f32 %v3615_v55, 0.0 }
 0x70a   : > { %v3684_v26 = vmul.f32 %v7029_v16, %v3647_v13 }
 0x70b   : > { %v3575_v61 = vpop.f32.mrf.mxu3 }
 0x70c   : > { %v3576_v14 = vadd.f32 %v3575_v61, %v3397_v62  ;;  %v3723_v8 = vadd.f32 %v3684_v26, %v3683_v45  ;;  %v3539_v13 = vpop.f32.mrf.mxu2 }
 0x70e   : > { %v3617_v27 = vadd.f32 %v7024_v29, %v3576_v14  ;;  %3724 = vadd.xlane.f32.xlu2 %v3723_v8 }
 0x710   : > { %v3649_v53 = vmax.f32 %v3617_v27, 0.0 }
 0x712   : > { %v3686_v57 = vmul.f32 %v7029_v16, %v3649_v53 }
 0x713   : > { %v3578_v47 = vpop.f32.mrf.mxu3 }
 0x714   : > { %v3579_v22 = vadd.f32 %v3578_v47, %v3400_v56  ;;  %v3726_v54 = vadd.f32 %v3686_v57, %v3685_v34  ;;  %v7087_v56 = vld [vmem:[#allocation17 + $0xc] ss:$0 sm:$0xff]  ;;  %v3541_v23 = vpop.f32.mrf.mxu2 }
 0x716   : > { %v3619_v39 = vadd.f32 %v7024_v29, %v3579_v22  ;;  %3727 = vadd.xlane.f32.xlu0 %v3726_v54 }
 0x718   : > { %v3651_v51 = vmax.f32 %v3619_v39, 0.0 }
 0x71a   : > { %v3688_v58 = vmul.f32 %v7029_v16, %v3651_v51 }
 0x71b   : > { %v3580_v35 = vpop.f32.mrf.mxu3 }
 0x71c   : > { %v3581_v40 = vadd.f32 %v3580_v35, %v3402_v1  ;;  %v3729_v50 = vadd.f32 %v3688_v58, %v3687_v38 }
 0x71e   : > { %v3621_v30 = vadd.f32 %v7024_v29, %v3581_v40  ;;  %3730 = vadd.xlane.f32.xlu1 %v3729_v50 }
 0x720   : > { %v3653_v43 = vmax.f32 %v3621_v30, 0.0 }
 0x722   : > { %v3690_v60 = vmul.f32 %v7029_v16, %v3653_v43 }
 0x723   : > { %v3583_v44 = vpop.f32.mrf.mxu3 }
 0x724   : > { %v3732_v46 = vadd.f32 %v3690_v60, %v3689_v9 }
 0x726   : > { %3733 = vadd.xlane.f32.xlu2 %v3732_v46 }
 0x72b   : > { %v3356_v10 = vpop.f32.mrf.mxu0  ;;  %v3405_v3 = vpop.f32.mrf.mxu1 }
 0x72c   : > { %v3535_v24 = vadd.f32 %v3534_v48, %v3356_v10  ;;  %v3584_v32 = vadd.f32 %v3583_v44, %v3405_v3  ;;  %v3585_v28 = vpop.f32.mrf.mxu3 }
 0x72e   : > { %v3622_v6 = vadd.f32 %v7021_v15, %v3535_v24  ;;  %v3623_v5 = vadd.f32 %v7024_v29, %v3584_v32 }
 0x730   : > { %v3654_v63 = vmax.f32 %v3622_v6, 0.0  ;;  %v3655_v41 = vmax.f32 %v3623_v5, 0.0 }
 0x732   : > { %v3691_v12 = vmul.f32 %v7026_v42, %v3654_v63  ;;  %v3692_v19 = vmul.f32 %v7029_v16, %v3655_v41 }
 0x733   : > { %v3358_v25 = vpop.f32.mrf.mxu0  ;;  %v3407_v59 = vpop.f32.mrf.mxu1 }
 0x734   : > { %v3537_v17 = vadd.f32 %v3536_v4, %v3358_v25  ;;  %v3586_v21 = vadd.f32 %v3585_v28, %v3407_v59  ;;  %v3735_v11 = vadd.f32 %v3692_v19, %v3691_v12  ;;  %v3588_v45 = vpop.f32.mrf.mxu3 }
 0x736   : > { %v3624_v55 = vadd.f32 %v7021_v15, %v3537_v17  ;;  %v3625_v62 = vadd.f32 %v7024_v29, %v3586_v21  ;;  %3736 = vadd.xlane.f32.xlu0 %v3735_v11 }
 0x738   : > { %v3656_v33 = vmax.f32 %v3624_v55, 0.0  ;;  %v3657_v52 = vmax.f32 %v3625_v62, 0.0 }
 0x73a   : > { %v3693_v26 = vmul.f32 %v7026_v42, %v3656_v33  ;;  %v3694_v18 = vmul.f32 %v7029_v16, %v3657_v52 }
 0x73b   : > { %v3361_v61 = vpop.f32.mrf.mxu0  ;;  %v3410_v14 = vpop.f32.mrf.mxu1 }
 0x73c   : > { %v3540_v8 = vadd.f32 %v3539_v13, %v3361_v61  ;;  %v3589_v20 = vadd.f32 %v3588_v45, %v3410_v14  ;;  %v3738_v49 = vadd.f32 %v3694_v18, %v3693_v26  ;;  %v3590_v47 = vpop.f32.mrf.mxu3 }
 0x73e   : > { %v3626_v27 = vadd.f32 %v7021_v15, %v3540_v8  ;;  %v3627_v53 = vadd.f32 %v7024_v29, %v3589_v20  ;;  %3739 = vadd.xlane.f32.xlu1 %v3738_v49 }
 0x740   : > { %v3658_v2 = vmax.f32 %v3626_v27, 0.0  ;;  %v3659_v34 = vmax.f32 %v3627_v53, 0.0 }
 0x741   : > { %v3701_v57 = vpop.xlane.xlu0 %3700 }
 0x742   : > { %v3750_v22 = vadd.f32 %v7087_v56, %v3701_v57  ;;  %v3695_v54 = vmul.f32 %v7026_v42, %v3658_v2  ;;  %v3696_v37 = vmul.f32 %v7029_v16, %v3659_v34 }
 0x743   : > { %v3363_v0 = vpop.f32.mrf.mxu0  ;;  %v3412_v36 = vpop.f32.mrf.mxu1 }
 0x744   : > { %v5113_v39 = vmul.f32 -1.442695, %v3750_v22  ;;  %v3542_v51 = vadd.f32 %v3541_v23, %v3363_v0  ;;  %v3591_v31 = vadd.f32 %v3590_v47, %v3412_v36  ;;  %v3741_v38 = vadd.f32 %v3696_v37, %v3695_v54 }
 0x746   : > { %5479 = vpow2.f32 %v5113_v39  ;;  %v3628_v58 = vadd.f32 %v7021_v15, %v3542_v51  ;;  %v3629_v1 = vadd.f32 %v7024_v29, %v3591_v31  ;;  %3742 = vadd.xlane.f32.xlu2 %v3741_v38 }
 0x748   : > { %v3660_v35 = vmax.f32 %v3628_v58, 0.0  ;;  %v3661_v40 = vmax.f32 %v3629_v1, 0.0 }
 0x749   : > { %v3704_v50 = vpop.xlane.xlu1 %3703 }
 0x74a   : > { %v3751_v7 = vadd.f32 %v7087_v56, %v3704_v50  ;;  %v3697_v30 = vmul.f32 %v7026_v42, %v3660_v35  ;;  %v3698_v43 = vmul.f32 %v7029_v16, %v3661_v40 }
 0x74c   : > { %v5480_v9 = vpop.eup %5479  ;;  %v5114_v60 = vmul.f32 -1.442695, %v3751_v7  ;;  %v3744_v48 = vadd.f32 %v3698_v43, %v3697_v30 }
 0x74d   : > { %v3814_v44 = vadd.f32 1.0, %v5480_v9 }
 0x74e   : > { %5481 = vpow2.f32 %v5114_v60  ;;  %3745 = vadd.xlane.f32.xlu0 %v3744_v48 }
 0x74f   : > { %5483 = vrcp.f32 %v3814_v44  ;;  %v3841_v16 = vand.u32 2147483648, %v3814_v44  ;;  %v3839_v5 = vand.u32 2147483647, %v3814_v44  ;;  %vm3835_vm10 = vweird.f32 %v3814_v44 }
 0x751   : > { %v3707_v15 = vpop.xlane.xlu2 %3706  ;;  %v3842_v25 = vor.u32 1.1754944e-38, %v3841_v16  ;;  %vm3840_vm12 = vcmp.eq.f32.partialorder %v3839_v5, 8.507059e+37 }
 0x752   : > { %v3752_v29 = vadd.f32 %v7087_v56, %v3707_v15 }
 0x754   : > { %v5482_v46 = vpop.eup %5481  ;;  %v5115_v10 = vmul.f32 -1.442695, %v3752_v29 }
 0x755   : > { %v5484_v3 = vpop.eup %5483  ;;  %v7098_v24 = vadd.f32 1.0, %v5482_v46 }
 0x756   : > { %v3831_v32 = vmul.f32 %v5484_v3, %v3814_v44  ;;  %5485 = vpow2.f32 %v5115_v10  ;;  %vm3836_vm9 = vweird.f32 %v5484_v3 }
 0x757   : > { %5487 = vrcp.f32 %v7098_v24  ;;  %vm3837_vm11 = vmor %vm3835_vm10, %vm3836_vm9  ;;  %v3856_v62 = vand.u32 2147483648, %v7098_v24  ;;  %v3854_v52 = vand.u32 2147483647, %v7098_v24  ;;  %vm3850_vm14 = vweird.f32 %v7098_v24 }
 0x758   : > { %v3832_v42 = vsub.f32 1.0, %v3831_v32 }
 0x759   : > { %v3710_v4 = vpop.xlane.xlu0 %3709 }
 0x75a   : > { %v3833_v6 = vmul.f32 %v5484_v3, %v3832_v42  ;;  %v3753_v28 = vadd.f32 %v7087_v56, %v3710_v4 }
 0x75c   : > { %v5486_v63 = vpop.eup %5485  ;;  %v3834_v41 = vadd.f32 %v5484_v3, %v3833_v6  ;;  %v5116_v12 = vmul.f32 -1.442695, %v3753_v28 }
 0x75d   : > { %v5488_v19 = vpop.eup %5487  ;;  %v7102_v59 = vadd.f32 1.0, %v5486_v63 }
 0x75e   : > { %v3838_v17 = vsel %vm3837_vm11, %v5484_v3, %v3834_v41  ;;  %v3846_v21 = vmul.f32 %v5488_v19, %v7098_v24  ;;  %5489 = vpow2.f32 %v5116_v12  ;;  %vm3851_vm13 = vweird.f32 %v5488_v19 }
 0x75f   : > { %v3843_v11 = vsel %vm3840_vm12, %v3842_v25, %v3838_v17  ;;  %5491 = vrcp.f32 %v7102_v59 }
 0x760   : > { %4070 = vst [vmem:[%s7114_s29] sm:$0xff] %v3843_v11  ;;  %v3847_v55 = vsub.f32 1.0, %v3846_v21 }
 0x761   : > { %v3713_v13 = vpop.xlane.xlu1 %3712 }
 0x762   : > { %v3848_v33 = vmul.f32 %v5488_v19, %v3847_v55  ;;  %v3754_v45 = vadd.f32 %v7087_v56, %v3713_v13 }
 0x764   : > { %v5490_v26 = vpop.eup %5489  ;;  %v3849_v18 = vadd.f32 %v5488_v19, %v3848_v33  ;;  %v5117_v61 = vmul.f32 -1.442695, %v3754_v45 }
 0x765   : > { %5870 = shalt.err (!%p5867_p9)
}
 0x766   : > { %s5979_s27 = smov 128   ;;  %s5980_s1 = smov 8   ;;  %v5492_v14 = vpop.eup %5491  ;;  %vm3852_vm15 = vmor %vm3850_vm14, %vm3851_vm13  ;;  %v3857_v8 = vor.u32 1.1754944e-38, %v3856_v62  ;;  %v3817_v20 = vadd.f32 1.0, %v5490_v26  ;;  %vm3855_vm1 = vcmp.eq.f32.partialorder %v3854_v52, 8.507059e+37  ;;  %5493 = vpow2.f32 %v5117_v61 }
 0x767   : > { %5363 = dma.vmem_to_hbm [thread:$0]  (%p6175_p0), %s7119_s30, 2048, %s4107_s26, %s4087_s13, %s5979_s27, %s5979_s27, %s5980_s1   ;;  %v3853_v49 = vsel %vm3852_vm15, %v5488_v19, %v3849_v18  ;;  %v3861_v27 = vmul.f32 %v5492_v14, %v7102_v59  ;;  %v3871_v34 = vand.u32 2147483648, %v7102_v59  ;;  %vm3866_vm0 = vweird.f32 %v5492_v14 }
 0x768   : > { %v3858_v53 = vsel %vm3855_vm1, %v3857_v8, %v3853_v49  ;;  %5495 = vrcp.f32 %v3817_v20  ;;  %v3869_v47 = vand.u32 2147483647, %v7102_v59  ;;  %vm3865_vm2 = vweird.f32 %v7102_v59  ;;  %s4120_s26 = scalar_lea.hbm %s7221_s11, %s5323_s12  ;;  %s4121_s13 = sshll.u32 %s7114_s29, 4  ;;  %s4122_s13 = int_to_ptr.vmem [resolvable:$true] %s4121_s13 }
 0x769   : > { %4071 = vst [vmem:[%s7114_s29 + $0x8] sm:$0xff] %v3858_v53  ;;  %v3862_v2 = vsub.f32 1.0, %v3861_v27  ;;  %v3716_v57 = vpop.xlane.xlu2 %3715  ;;  %vm3867_vm3 = vmor %vm3865_vm2, %vm3866_vm0  ;;  %v3872_v39 = vor.u32 1.1754944e-38, %v3871_v34  ;;  %v3886_v35 = vand.u32 2147483648, %v3817_v20  ;;  %v3884_v7 = vand.u32 2147483647, %v3817_v20 }
 0x76a   : > { %v3755_v22 = vadd.f32 %v7087_v56, %v3716_v57  ;;  %vm3870_vm4 = vcmp.eq.f32.partialorder %v3869_v47, 8.507059e+37  ;;  %vm3880_vm6 = vweird.f32 %v3817_v20  ;;  %s4123_s21 = sshll.u32 %s4120_s26, 4  ;;  %s4092_s24 = scalar_lea.sflag [#allocation21], %s6208_s28  ;;  %s4124_s21 = int_to_ptr.hbm [resolvable:$true] %s4123_s21 }
 0x76b   : > { %v3863_v23 = vmul.f32 %v5492_v14, %v3862_v2  ;;  %v3887_v44 = vor.u32 1.1754944e-38, %v3886_v35  ;;  %vm3885_vm8 = vcmp.eq.f32.partialorder %v3884_v7, 8.507059e+37  ;;  %s5885_s12 = sshra.s32 %s4124_s21, 4  ;;  %s5891_s6 = scalar_lea.hbm %s7221_s11, 256  ;;  %s5886_s12 = int_to_ptr.hbm [resolvable:$true] %s5885_s12 }
 0x76c   : > { %v5494_v54 = vpop.eup %5493  ;;  %v5118_v0 = vmul.f32 -1.442695, %v3755_v22  ;;  %s5887_s22 = scalar_lea.hbm %s5886_s12, 128  ;;  %p5892_p2 = scmp.lt.s32.totalorder %s5886_s12, %s7221_s11 }
 0x76d   : > { %v3864_v37 = vadd.f32 %v5492_v14, %v3863_v23  ;;  %v3818_v51 = vadd.f32 1.0, %v5494_v54  ;;  %p5888_p10 = scmp.ne.s32.totalorder %s5886_s12, %s5887_s22  ;;  %p5893_p4 = scmp.lt.s32.totalorder %s5891_s6, %s5887_s22 }
 0x76e   : > { %v5496_v36 = vpop.eup %5495  ;;  %5497 = vpow2.f32 %v5118_v0 }
 0x76f   : > { %v3868_v31 = vsel %vm3867_vm3, %v5492_v14, %v3864_v37  ;;  %v3876_v38 = vmul.f32 %v5496_v36, %v3817_v20  ;;  %5499 = vrcp.f32 %v3818_v51  ;;  %vm3881_vm5 = vweird.f32 %v5496_v36  ;;  %p5889_p11 = pnand %p5888_p10, %p6175_p0  ;;  %p5894_p1 = por %p5893_p4, %p5892_p2 }
 0x770   : > { %v3873_v58 = vsel %vm3870_vm4, %v3872_v39, %v3868_v31  ;;  %vm3882_vm7 = vmor %vm3880_vm6, %vm3881_vm5  ;;  %v3901_v24 = vand.u32 2147483648, %v3818_v51  ;;  %v3899_v16 = vand.u32 2147483647, %v3818_v51  ;;  %vm3895_vm10 = vweird.f32 %v3818_v51 }
 0x771   : > { %4072 = vst [vmem:[%s7114_s29 + $0x10] sm:$0xff] %v3873_v58  ;;  %v3877_v1 = vsub.f32 1.0, %v3876_v38  ;;  %v3719_v40 = vpop.xlane.xlu0 %3718  ;;  %p5890_p12 = pneg %p5889_p11 }
 0x772   : > { %v3756_v30 = vadd.f32 %v7087_v56, %v3719_v40  ;;  %v3902_v41 = vor.u32 1.1754944e-38, %v3901_v24  ;;  %vm3900_vm12 = vcmp.eq.f32.partialorder %v3899_v16, 8.507059e+37 }
 0x773   : > { %v3878_v50 = vmul.f32 %v5496_v36, %v3877_v1  ;;  %p5895_p3 = pnand %p5894_p1, %p5890_p12 }
 0x774   : > { %v5498_v43 = vpop.eup %5497  ;;  %v5119_v60 = vmul.f32 -1.442695, %v3756_v30 }
 0x775   : > { %v3879_v9 = vadd.f32 %v5496_v36, %v3878_v50  ;;  %v5500_v48 = vpop.eup %5499  ;;  %v3819_v15 = vadd.f32 1.0, %v5498_v43 }
 0x776   : > { %v3891_v46 = vmul.f32 %v5500_v48, %v3818_v51  ;;  %5501 = vpow2.f32 %v5119_v60  ;;  %vm3896_vm9 = vweird.f32 %v5500_v48 }
 0x777   : > { %v3883_v29 = vsel %vm3882_vm7, %v5496_v36, %v3879_v9  ;;  %5503 = vrcp.f32 %v3819_v15  ;;  %vm3897_vm11 = vmor %vm3895_vm10, %vm3896_vm9  ;;  %v3916_v21 = vand.u32 2147483648, %v3819_v15  ;;  %v3914_v62 = vand.u32 2147483647, %v3819_v15 }
 0x778   : > { %v3888_v10 = vsel %vm3885_vm8, %v3887_v44, %v3883_v29  ;;  %v3892_v3 = vsub.f32 1.0, %v3891_v46  ;;  %vm3910_vm14 = vweird.f32 %v3819_v15 }
 0x779   : > { %4073 = vst [vmem:[%s7114_s29 + $0x18] sm:$0xff] %v3888_v10  ;;  %v3722_v32 = vpop.xlane.xlu1 %3721  ;;  %v3917_v18 = vor.u32 1.1754944e-38, %v3916_v21  ;;  %vm3915_vm1 = vcmp.eq.f32.partialorder %v3914_v62, 8.507059e+37 }
 0x77a   : > { %v3893_v42 = vmul.f32 %v5500_v48, %v3892_v3  ;;  %v3757_v4 = vadd.f32 %v7087_v56, %v3722_v32 }
 0x77c   : > { %v5502_v6 = vpop.eup %5501  ;;  %v3894_v5 = vadd.f32 %v5500_v48, %v3893_v42  ;;  %v5120_v28 = vmul.f32 -1.442695, %v3757_v4 }
 0x77d   : > { %v5504_v63 = vpop.eup %5503  ;;  %v3820_v12 = vadd.f32 1.0, %v5502_v6 }
 0x77e   : > { %v3898_v19 = vsel %vm3897_vm11, %v5500_v48, %v3894_v5  ;;  %v3906_v25 = vmul.f32 %v5504_v63, %v3819_v15  ;;  %5505 = vpow2.f32 %v5120_v28  ;;  %vm3911_vm13 = vweird.f32 %v5504_v63 }
 0x77f   : > { %v3903_v59 = vsel %vm3900_vm12, %v3902_v41, %v3898_v19  ;;  %5507 = vrcp.f32 %v3820_v12  ;;  %vm3912_vm15 = vmor %vm3910_vm14, %vm3911_vm13  ;;  %v3931_v27 = vand.u32 2147483648, %v3820_v12  ;;  %v3929_v34 = vand.u32 2147483647, %v3820_v12 }
 0x780   : > { %4074 = vst [vmem:[%s7114_s29 + $0x20] sm:$0xff] %v3903_v59  ;;  %v3907_v17 = vsub.f32 1.0, %v3906_v25  ;;  %vm3925_vm2 = vweird.f32 %v3820_v12 }
 0x781   : > { %v3725_v11 = vpop.xlane.xlu2 %3724  ;;  %v3932_v37 = vor.u32 1.1754944e-38, %v3931_v27  ;;  %vm3930_vm4 = vcmp.eq.f32.partialorder %v3929_v34, 8.507059e+37 }
 0x782   : > { %v3908_v55 = vmul.f32 %v5504_v63, %v3907_v17  ;;  %v3758_v13 = vadd.f32 %v7087_v56, %v3725_v11 }
 0x784   : > { %v5506_v33 = vpop.eup %5505  ;;  %v3909_v52 = vadd.f32 %v5504_v63, %v3908_v55  ;;  %v5121_v45 = vmul.f32 -1.442695, %v3758_v13 }
 0x785   : > { %v5508_v26 = vpop.eup %5507  ;;  %v3821_v61 = vadd.f32 1.0, %v5506_v33 }
 0x786   : > { %v3913_v14 = vsel %vm3912_vm15, %v5504_v63, %v3909_v52  ;;  %v3921_v8 = vmul.f32 %v5508_v26, %v3820_v12  ;;  %5509 = vpow2.f32 %v5121_v45  ;;  %vm3926_vm0 = vweird.f32 %v5508_v26 }
 0x787   : > { %v3918_v20 = vsel %vm3915_vm1, %v3917_v18, %v3913_v14  ;;  %5511 = vrcp.f32 %v3821_v61  ;;  %vm3927_vm3 = vmor %vm3925_vm2, %vm3926_vm0  ;;  %v3946_v38 = vand.u32 2147483648, %v3821_v61  ;;  %v3944_v35 = vand.u32 2147483647, %v3821_v61 }
 0x788   : > { %4075 = vst [vmem:[%s7114_s29 + $0x28] sm:$0xff] %v3918_v20  ;;  %v3922_v49 = vsub.f32 1.0, %v3921_v8  ;;  %vm3940_vm6 = vweird.f32 %v3821_v61 }
 0x789   : > { %v3728_v53 = vpop.xlane.xlu0 %3727  ;;  %v3947_v9 = vor.u32 1.1754944e-38, %v3946_v38  ;;  %vm3945_vm8 = vcmp.eq.f32.partialorder %v3944_v35, 8.507059e+37 }
 0x78a   : > { %v3923_v2 = vmul.f32 %v5508_v26, %v3922_v49  ;;  %v3759_v57 = vadd.f32 %v7087_v56, %v3728_v53 }
 0x78c   : > { %v5510_v23 = vpop.eup %5509  ;;  %v3924_v47 = vadd.f32 %v5508_v26, %v3923_v2  ;;  %v5122_v22 = vmul.f32 -1.442695, %v3759_v57 }
 0x78d   : > { %v5512_v54 = vpop.eup %5511  ;;  %v3822_v0 = vadd.f32 1.0, %v5510_v23 }
 0x78e   : > { %v3928_v36 = vsel %vm3927_vm3, %v5508_v26, %v3924_v47  ;;  %v3936_v39 = vmul.f32 %v5512_v54, %v3821_v61  ;;  %5513 = vpow2.f32 %v5122_v22  ;;  %vm3941_vm5 = vweird.f32 %v5512_v54 }
 0x78f   : > { %v3933_v51 = vsel %vm3930_vm4, %v3932_v37, %v3928_v36  ;;  %5515 = vrcp.f32 %v3822_v0  ;;  %vm3942_vm7 = vmor %vm3940_vm6, %vm3941_vm5  ;;  %v3961_v46 = vand.u32 2147483648, %v3822_v0  ;;  %v3959_v24 = vand.u32 2147483647, %v3822_v0 }
 0x790   : > { %4076 = vst [vmem:[%s7114_s29 + $0x30] sm:$0xff] %v3933_v51  ;;  %v3937_v31 = vsub.f32 1.0, %v3936_v39  ;;  %vm3955_vm10 = vweird.f32 %v3822_v0 }
 0x791   : > { %v3731_v58 = vpop.xlane.xlu1 %3730  ;;  %v3962_v5 = vor.u32 1.1754944e-38, %v3961_v46  ;;  %vm3960_vm12 = vcmp.eq.f32.partialorder %v3959_v24, 8.507059e+37 }
 0x792   : > { %v3938_v1 = vmul.f32 %v5512_v54, %v3937_v31  ;;  %v3760_v40 = vadd.f32 %v7087_v56, %v3731_v58 }
 0x794   : > { %v5514_v50 = vpop.eup %5513  ;;  %v3939_v7 = vadd.f32 %v5512_v54, %v3938_v1  ;;  %v5123_v30 = vmul.f32 -1.442695, %v3760_v40 }
 0x795   : > { %v5516_v43 = vpop.eup %5515  ;;  %v3823_v60 = vadd.f32 1.0, %v5514_v50 }
 0x796   : > { %v3943_v48 = vsel %vm3942_vm7, %v5512_v54, %v3939_v7  ;;  %v3951_v44 = vmul.f32 %v5516_v43, %v3822_v0  ;;  %5517 = vpow2.f32 %v5123_v30  ;;  %vm3956_vm9 = vweird.f32 %v5516_v43 }
 0x797   : > { %v3948_v15 = vsel %vm3945_vm8, %v3947_v9, %v3943_v48  ;;  %5519 = vrcp.f32 %v3823_v60  ;;  %vm3957_vm11 = vmor %vm3955_vm10, %vm3956_vm9  ;;  %v3976_v25 = vand.u32 2147483648, %v3823_v60  ;;  %v3974_v17 = vand.u32 2147483647, %v3823_v60 }
 0x798   : > { %4077 = vst [vmem:[%s7114_s29 + $0x38] sm:$0xff] %v3948_v15  ;;  %v3952_v29 = vsub.f32 1.0, %v3951_v44  ;;  %vm3970_vm14 = vweird.f32 %v3823_v60 }
 0x799   : > { %v3734_v10 = vpop.xlane.xlu2 %3733  ;;  %v3977_v62 = vor.u32 1.1754944e-38, %v3976_v25  ;;  %vm3975_vm1 = vcmp.eq.f32.partialorder %v3974_v17, 8.507059e+37 }
 0x79a   : > { %v3953_v3 = vmul.f32 %v5516_v43, %v3952_v29  ;;  %v3761_v32 = vadd.f32 %v7087_v56, %v3734_v10 }
 0x79c   : > { %v5518_v42 = vpop.eup %5517  ;;  %v3954_v16 = vadd.f32 %v5516_v43, %v3953_v3  ;;  %v5124_v4 = vmul.f32 -1.442695, %v3761_v32 }
 0x79d   : > { %v5520_v6 = vpop.eup %5519  ;;  %v3824_v28 = vadd.f32 1.0, %v5518_v42 }
 0x79e   : > { %v3958_v63 = vsel %vm3957_vm11, %v5516_v43, %v3954_v16  ;;  %v3966_v41 = vmul.f32 %v5520_v6, %v3823_v60  ;;  %5521 = vpow2.f32 %v5124_v4  ;;  %vm3971_vm13 = vweird.f32 %v5520_v6 }
 0x79f   : > { %v3963_v12 = vsel %vm3960_vm12, %v3962_v5, %v3958_v63  ;;  %5523 = vrcp.f32 %v3824_v28  ;;  %vm3972_vm15 = vmor %vm3970_vm14, %vm3971_vm13  ;;  %v3991_v18 = vand.u32 2147483648, %v3824_v28  ;;  %v3989_v8 = vand.u32 2147483647, %v3824_v28 }
 0x7a0   : > { %4078 = vst [vmem:[%s7114_s29 + $0x40] sm:$0xff] %v3963_v12  ;;  %v3967_v19 = vsub.f32 1.0, %v3966_v41  ;;  %vm3985_vm2 = vweird.f32 %v3824_v28 }
 0x7a1   : > { %v3992_v2 = vor.u32 1.1754944e-38, %v3991_v18  ;;  %vm3990_vm4 = vcmp.eq.f32.partialorder %v3989_v8, 8.507059e+37 }
 0x7a2   : > { %v3968_v59 = vmul.f32 %v5520_v6, %v3967_v19 }
 0x7a4   : > { %v5522_v21 = vpop.eup %5521  ;;  %v3969_v11 = vadd.f32 %v5520_v6, %v3968_v59 }
 0x7a5   : > { %v5524_v55 = vpop.eup %5523  ;;  %v3825_v13 = vadd.f32 1.0, %v5522_v21 }
 0x7a6   : > { %v3973_v33 = vsel %vm3972_vm15, %v5520_v6, %v3969_v11  ;;  %v3981_v52 = vmul.f32 %v5524_v55, %v3824_v28  ;;  %vm3986_vm0 = vweird.f32 %v5524_v55 }
 0x7a7   : > { %v3978_v45 = vsel %vm3975_vm1, %v3977_v62, %v3973_v33  ;;  %5525 = vrcp.f32 %v3825_v13  ;;  %vm3987_vm3 = vmor %vm3985_vm2, %vm3986_vm0  ;;  %v4006_v22 = vand.u32 2147483648, %v3825_v13  ;;  %v4004_v0 = vand.u32 2147483647, %v3825_v13 }
 0x7a8   : > { %4079 = vst [vmem:[%s7114_s29 + $0x48] sm:$0xff] %v3978_v45  ;;  %v3982_v26 = vsub.f32 1.0, %v3981_v52  ;;  %vm4000_vm6 = vweird.f32 %v3825_v13 }
 0x7a9   : > { %v3737_v61 = vpop.xlane.xlu0 %3736  ;;  %v4007_v38 = vor.u32 1.1754944e-38, %v4006_v22  ;;  %vm4005_vm8 = vcmp.eq.f32.partialorder %v4004_v0, 8.507059e+37 }
 0x7aa   : > { %v3983_v14 = vmul.f32 %v5524_v55, %v3982_v26  ;;  %v3762_v20 = vadd.f32 %v7087_v56, %v3737_v61 }
 0x7ac   : > { %v3984_v49 = vadd.f32 %v5524_v55, %v3983_v14  ;;  %v5125_v27 = vmul.f32 -1.442695, %v3762_v20 }
 0x7ad   : > { %v5526_v53 = vpop.eup %5525 }
 0x7ae   : > { %v3988_v34 = vsel %vm3987_vm3, %v5524_v55, %v3984_v49  ;;  %v3996_v57 = vmul.f32 %v5526_v53, %v3825_v13  ;;  %5527 = vpow2.f32 %v5125_v27  ;;  %vm4001_vm5 = vweird.f32 %v5526_v53 }
 0x7af   : > { %v3993_v23 = vsel %vm3990_vm4, %v3992_v2, %v3988_v34  ;;  %vm4002_vm7 = vmor %vm4000_vm6, %vm4001_vm5 }
 0x7b0   : > { %4080 = vst [vmem:[%s7114_s29 + $0x50] sm:$0xff] %v3993_v23  ;;  %v3997_v47 = vsub.f32 1.0, %v3996_v57 }
 0x7b1   : > { %v3740_v54 = vpop.xlane.xlu1 %3739 }
 0x7b2   : > { %v3998_v37 = vmul.f32 %v5526_v53, %v3997_v47  ;;  %v3763_v36 = vadd.f32 %v7087_v56, %v3740_v54 }
 0x7b4   : > { %v5528_v39 = vpop.eup %5527  ;;  %v3999_v51 = vadd.f32 %v5526_v53, %v3998_v37  ;;  %v5126_v31 = vmul.f32 -1.442695, %v3763_v36 }
 0x7b5   : > { %v3826_v58 = vadd.f32 1.0, %v5528_v39 }
 0x7b6   : > { %v4003_v1 = vsel %vm4002_vm7, %v5526_v53, %v3999_v51  ;;  %5529 = vpow2.f32 %v5126_v31 }
 0x7b7   : > { %v4008_v35 = vsel %vm4005_vm8, %v4007_v38, %v4003_v1  ;;  %5531 = vrcp.f32 %v3826_v58  ;;  %v4021_v44 = vand.u32 2147483648, %v3826_v58  ;;  %v4019_v46 = vand.u32 2147483647, %v3826_v58 }
 0x7b8   : > { %4081 = vst [vmem:[%s7114_s29 + $0x58] sm:$0xff] %v4008_v35  ;;  %vm4015_vm10 = vweird.f32 %v3826_v58 }
 0x7b9   : > { %v3743_v40 = vpop.xlane.xlu2 %3742  ;;  %v4022_v16 = vor.u32 1.1754944e-38, %v4021_v44  ;;  %vm4020_vm12 = vcmp.eq.f32.partialorder %v4019_v46, 8.507059e+37 }
 0x7ba   : > { %v3764_v50 = vadd.f32 %v7087_v56, %v3743_v40 }
 0x7bc   : > { %v5530_v7 = vpop.eup %5529  ;;  %v5127_v30 = vmul.f32 -1.442695, %v3764_v50 }
 0x7bd   : > { %v5532_v43 = vpop.eup %5531  ;;  %v3827_v9 = vadd.f32 1.0, %v5530_v7 }
 0x7be   : > { %v4011_v60 = vmul.f32 %v5532_v43, %v3826_v58  ;;  %5533 = vpow2.f32 %v5127_v30  ;;  %vm4016_vm9 = vweird.f32 %v5532_v43 }
 0x7bf   : > { %5535 = vrcp.f32 %v3827_v9  ;;  %vm4017_vm11 = vmor %vm4015_vm10, %vm4016_vm9  ;;  %v4036_v41 = vand.u32 2147483648, %v3827_v9  ;;  %vm4030_vm14 = vweird.f32 %v3827_v9 }
 0x7c0   : > { %v4012_v48 = vsub.f32 1.0, %v4011_v60 }
 0x7c1   : > { %v3746_v15 = vpop.xlane.xlu0 %3745  ;;  %v4037_v17 = vor.u32 1.1754944e-38, %v4036_v41 }
 0x7c2   : > { %v4013_v29 = vmul.f32 %v5532_v43, %v4012_v48  ;;  %v3765_v10 = vadd.f32 %v7087_v56, %v3746_v15  ;;  %v4034_v56 = vand.u32 2147483647, %v3827_v9 }
 0x7c4   : > { %v5534_v3 = vpop.eup %5533  ;;  %v4014_v24 = vadd.f32 %v5532_v43, %v4013_v29  ;;  %v5128_v32 = vmul.f32 -1.442695, %v3765_v10  ;;  %vm4035_vm1 = vcmp.eq.f32.partialorder %v4034_v56, 8.507059e+37 }
 0x7c5   : > { %v5536_v42 = vpop.eup %5535  ;;  %v3828_v4 = vadd.f32 1.0, %v5534_v3 }
 0x7c6   : > { %v4018_v6 = vsel %vm4017_vm11, %v5532_v43, %v4014_v24  ;;  %v4026_v5 = vmul.f32 %v5536_v42, %v3827_v9  ;;  %5537 = vpow2.f32 %v5128_v32  ;;  %vm4031_vm13 = vweird.f32 %v5536_v42 }
 0x7c7   : > { %v4023_v28 = vsel %vm4020_vm12, %v4022_v16, %v4018_v6  ;;  %5539 = vrcp.f32 %v3828_v4  ;;  %vm4032_vm15 = vmor %vm4030_vm14, %vm4031_vm13  ;;  %v4051_v33 = vand.u32 2147483648, %v3828_v4  ;;  %v4049_v45 = vand.u32 2147483647, %v3828_v4 }
 0x7c8   : > { %4082 = vst [vmem:[%s7114_s29 + $0x60] sm:$0xff] %v4023_v28  ;;  %v4027_v63 = vsub.f32 1.0, %v4026_v5  ;;  %vm4045_vm2 = vweird.f32 %v3828_v4 }
 0x7c9   : > { %v4052_v61 = vor.u32 1.1754944e-38, %v4051_v33  ;;  %vm4050_vm4 = vcmp.eq.f32.partialorder %v4049_v45, 8.507059e+37 }
 0x7ca   : > { %v4028_v12 = vmul.f32 %v5536_v42, %v4027_v63 }
 0x7cc   : > { %v5538_v19 = vpop.eup %5537  ;;  %v4029_v25 = vadd.f32 %v5536_v42, %v4028_v12 }
 0x7cd   : > { %v5540_v59 = vpop.eup %5539  ;;  %v3829_v21 = vadd.f32 1.0, %v5538_v19 }
 0x7ce   : > { %v4033_v11 = vsel %vm4032_vm15, %v5536_v42, %v4029_v25  ;;  %v4041_v55 = vmul.f32 %v5540_v59, %v3828_v4  ;;  %vm4046_vm0 = vweird.f32 %v5540_v59 }
 0x7cf   : > { %v4038_v62 = vsel %vm4035_vm1, %v4037_v17, %v4033_v11  ;;  %5541 = vrcp.f32 %v3829_v21  ;;  %vm4047_vm3 = vmor %vm4045_vm2, %vm4046_vm0  ;;  %v4066_v27 = vand.u32 2147483648, %v3829_v21  ;;  %v4064_v2 = vand.u32 2147483647, %v3829_v21 }
 0x7d0   : > { %4083 = vst [vmem:[%s7114_s29 + $0x68] sm:$0xff] %v4038_v62  ;;  %v4042_v13 = vsub.f32 1.0, %v4041_v55  ;;  %vm4060_vm6 = vweird.f32 %v3829_v21 }
 0x7d1   : > { %v4067_v57 = vor.u32 1.1754944e-38, %v4066_v27  ;;  %vm4065_vm8 = vcmp.eq.f32.partialorder %v4064_v2, 8.507059e+37 }
 0x7d2   : > { %v4043_v52 = vmul.f32 %v5540_v59, %v4042_v13 }
 0x7d4   : > { %v4044_v26 = vadd.f32 %v5540_v59, %v4043_v52 }
 0x7d5   : > { %v5542_v18 = vpop.eup %5541 }
 0x7d6   : > { %v4048_v14 = vsel %vm4047_vm3, %v5540_v59, %v4044_v26  ;;  %v4056_v8 = vmul.f32 %v5542_v18, %v3829_v21  ;;  %vm4061_vm5 = vweird.f32 %v5542_v18 }
 0x7d7   : > { %v4053_v20 = vsel %vm4050_vm4, %v4052_v61, %v4048_v14  ;;  %vm4062_vm7 = vmor %vm4060_vm6, %vm4061_vm5 }
 0x7d8   : > { %4084 = vst [vmem:[%s7114_s29 + $0x70] sm:$0xff] %v4053_v20  ;;  %v4057_v49 = vsub.f32 1.0, %v4056_v8 }
 0x7da   : > { %v4058_v53 = vmul.f32 %v5542_v18, %v4057_v49 }
 0x7dc   : > { %v4059_v34 = vadd.f32 %v5542_v18, %v4058_v53 }
 0x7de   : > { %v4063_v23 = vsel %vm4062_vm7, %v5542_v18, %v4059_v34 }
 0x7df   : > { %v4068_v47 = vsel %vm4065_vm8, %v4067_v57, %v4063_v23 }
 0x7e0   : > { %4085 = vst [vmem:[%s7114_s29 + $0x78] sm:$0xff] %v4068_v47 }
 0x7e1   : > { %5898 = shalt.err (!%p5895_p3)
}
 0x7e2   : > { %5364 = dma.vmem_to_hbm [thread:$0]  (%p6175_p0), %s4122_s13, 2048, %s4124_s21, %s4092_s24, %s5979_s27, %s5979_s27, %s5980_s1  }
 0x7e3 PF: > { %s4138_s28 = sand.u32 1, %s5949_s17   ;;  %p7246_p5 = scmp.ge.s32.totalorder %s5961_s20, 2 }
 0x7e4   : > { %s4139_s29 = scalar_lea.sflag [#allocation4], %s4138_s28 }
 0x7e5   : > { %p5400_p13 = pnand %p7246_p5, %p6181_p6 }
 0x7e7   : > { %p5401_p7 = pneg %p5400_p13 }
 0x7e9   : > { %5940 = dma.done.wait (%p5401_p7), %s4139_s29, 2048  }
 0x7ea   : > { %5942 = vsyncadd (%p5401_p7), %s4139_s29, 4294965248  ;;  %s4149_s14 = scalar_lea.sflag [#allocation21], %s4138_s28 }
 0x7eb   : > { %5944 = dma.done.wait (%p5401_p7), %s4149_s14, 2048  }
 0x7ec   : > { %5946 = vsyncadd (%p5401_p7), %s4149_s14, 4294965248  ;;  %p33_p0 = scmp.ge.s32.totalorder %s6151_s3, 4   ;;  %s7247_s17 = smov %s5953_s18 }
 0x7ed   : > { %s7248_s18 = smov %s5957_s19  ;;  %s7249_s19 = smov %s6163_s16 }
 0x7ee   : > { %s7250_s20 = smov %s6151_s3  ;;  %35 = sbr.rel (!%p33_p0) target bundleno = 19 (0x13), region = 158 }
 0x7f3   :  { %4155 = vsyncpa [#allocation3], 1 }
 0x7f4   :  { %4157 = vsyncpa [#allocation3 + $0x1], 1 }
 0x7f5   :  { %4158 = vsyncpa [#allocation6], 1 }
 0x7f6   :  { %4159 = vsyncpa [#allocation9], 1 }
 0x7f7   :  { %4160 = vsyncpa [#allocation12], 1 }
 0x7f8   :  { %4161 = vsyncpa [#allocation15], 1 }
 0x7f9   :  { %4162 = vsyncpa [#allocation18], 1 }
 0x7fa   :  { %4163 = vsyncpa [#allocation4], 1 }
 0x7fb   :  { %4165 = vsyncpa [#allocation4 + $0x1], 1 }
 0x7fc   :  { %4166 = vsyncpa [#allocation21], 1 }
 0x7fd   :  { %4168 = vsyncpa [#allocation21 + $0x1], 1 }

</bundles_post_ra>
